<compile_context>
chip_gen: v6e
topology: v6e:2x2x1
jax: 0.10.0
libtpu: 0.0.40
codegen_flags: <defaults>
</compile_context>

<pallas_src>
import math
import numpy as np
import jax
import jax.numpy as jnp
from jax.experimental import pallas as pl
from jax.experimental.pallas import tpu as pltpu

# ---- model config (small, consistent with the module's __init__) -------------
LATENT_DIM = 32          # d_model (divisible by nhead=4)
HIDDEN_DIM = 64          # dim_feedforward
N_LAYERS   = 2
N_NODES    = 8
N_HEAD     = 4
HEAD_DIM   = LATENT_DIM // N_HEAD
BATCH      = 2
TOKENS     = BATCH * N_NODES
EPS        = 1e-5        # LayerNorm eps (torch default)

# ---- packed-parameter slab layout (all offsets static Python ints) -----------
SEG             = 128                         # lane-aligned segment width
SEGS_PER_LAYER  = 4                           # [qkv_w, sa_out_w, ca_out_w, linear1_w]
FC_SEG          = N_LAYERS * SEGS_PER_LAYER   # fc_out weight segment
W32_COLS        = (FC_SEG + 1) * SEG          # (32, 1152) slab for all in_dim=32 weights
W64_COLS        = N_LAYERS * SEG              # (64, 256)  slab for linear2 weights
ROWS_PER_LAYER  = 12
FC_B_ROW        = N_LAYERS * ROWS_PER_LAYER   # 24
BIAS_ROWS       = 32                          # padded to a sublane multiple
BIAS_COLS       = 128
# per-layer bias-row offsets:
#  0 qkv_b (96, q-part pre-scaled)  1 sa_out_b  2 ca_value_bias  3 ca_out_b
#  4 n1_w  5 n1_b  6 n2_w  7 n2_b  8 n3_w  9 n3_b  10 l1_b  11 l2_b


def decoder_kernel(x_ref, w32_ref, w64_ref, bias_ref, out_ref):
    E, H, Nn, B, Hh, hd, T = (LATENT_DIM, HIDDEN_DIM, N_NODES, BATCH,
                              N_HEAD, HEAD_DIM, TOKENS)

    def wslab(ref, seg, width):                 # (in_dim, width) static lane-aligned view
        c = seg * SEG
        return ref[:, c:c + width]

    def bvec(row, width):                       # (1, width) bias / layernorm row
        return bias_ref[row:row + 1, 0:width]

    def layer_norm(h, w, b):
        mu = jnp.mean(h, axis=-1, keepdims=True)
        xc = h - mu
        var = jnp.mean(xc * xc, axis=-1, keepdims=True)
        return xc * jax.lax.rsqrt(var + EPS) * w + b

    x = x_ref[...]                              # (B, E)
    # tgt row t = b*Nn + n  ==  x[b]   (torch (S=B, N=Nn, E) flattened row-major)
    tgt = jnp.concatenate(
        [jnp.broadcast_to(x[b:b + 1, :], (Nn, E)) for b in range(B)], axis=0)

    h = tgt
    for l in range(N_LAYERS):                   # static unrolled layer loop
        seg0 = l * SEGS_PER_LAYER
        row0 = l * ROWS_PER_LAYER

        # ---- self-attention: single fused QKV matmul (scale folded into Wq/bq) ----
        qkv = jnp.dot(h, wslab(w32_ref, seg0 + 0, 3 * E),
                      preferred_element_type=jnp.float32) + bvec(row0 + 0, 3 * E)
        q, k, v = qkv[:, 0:E], qkv[:, E:2 * E], qkv[:, 2 * E:3 * E]
        # sequence length S == B == 2: do both positions explicitly on the VPU
        q0 = q[0:Nn].reshape(Nn, Hh, hd); q1 = q[Nn:T].reshape(Nn, Hh, hd)
        k0 = k[0:Nn].reshape(Nn, Hh, hd); k1 = k[Nn:T].reshape(Nn, Hh, hd)
        v0 = v[0:Nn].reshape(Nn, Hh, hd); v1 = v[Nn:T].reshape(Nn, Hh, hd)
        s00 = jnp.sum(q0 * k0, axis=-1, keepdims=True)     # (Nn, Hh, 1)
        s01 = jnp.sum(q0 * k1, axis=-1, keepdims=True)
        s10 = jnp.sum(q1 * k0, axis=-1, keepdims=True)
        s11 = jnp.sum(q1 * k1, axis=-1, keepdims=True)
        m0 = jnp.maximum(s00, s01)
        e00, e01 = jnp.exp(s00 - m0), jnp.exp(s01 - m0)
        inv0 = pl.reciprocal(e00 + e01, approx=True)
        m1 = jnp.maximum(s10, s11)
        e10, e11 = jnp.exp(s10 - m1), jnp.exp(s11 - m1)
        inv1 = pl.reciprocal(e10 + e11, approx=True)
        c0 = ((e00 * inv0) * v0 + (e01 * inv0) * v1).reshape(Nn, E)
        c1 = ((e10 * inv1) * v0 + (e11 * inv1) * v1).reshape(Nn, E)
        att = jnp.concatenate([c0, c1], axis=0)             # (T, E)
        sa = jnp.dot(att, wslab(w32_ref, seg0 + 1, E),
                     preferred_element_type=jnp.float32) + bvec(row0 + 1, E)
        h = layer_norm(h + sa, bvec(row0 + 4, E), bvec(row0 + 5, E))

        # ---- cross-attention against an all-zero memory (exact simplification) ----
        # memory == 0 => K rows == bk, V rows == bv => softmax exactly uniform
        # => attention output == bv => block output = out_proj(bv) + out_bias.
        ca = jnp.dot(bvec(row0 + 2, E), wslab(w32_ref, seg0 + 2, E),
                     preferred_element_type=jnp.float32) + bvec(row0 + 3, E)   # (1, E)
        h = layer_norm(h + ca, bvec(row0 + 6, E), bvec(row0 + 7, E))

        # ---- feed-forward (relu) ----
        f1 = jnp.maximum(jnp.dot(h, wslab(w32_ref, seg0 + 3, H),
                                 preferred_element_type=jnp.float32)
                         + bvec(row0 + 10, H), 0.0)
        f2 = jnp.dot(f1, wslab(w64_ref, l, E),
                     preferred_element_type=jnp.float32) + bvec(row0 + 11, E)
        h = layer_norm(h + f2, bvec(row0 + 8, E), bvec(row0 + 9, E))

    # ---- fc_out + triu(diag=1)/sigmoid/symmetrize, fully batched, one store ----
    logits = jnp.dot(h, wslab(w32_ref, FC_SEG, Nn),
                     preferred_element_type=jnp.float32) + bvec(FC_B_ROW, Nn)  # (T, Nn)
    logits = logits.reshape(B, Nn, Nn)           # logits[b, n, j] == torch adj_prob[b,n,j]
    rows = jax.lax.broadcasted_iota(jnp.int32, (Nn, Nn), 0)
    cols = jax.lax.broadcasted_iota(jnp.int32, (Nn, Nn), 1)
    masked = jnp.where((cols > rows)[None, :, :], logits, 0.0)
    p = pl.reciprocal(1.0 + jnp.exp(-masked), approx=True)   # sigmoid via EUP exp + vrcp
    out_ref[...] = 0.5 * (p + jnp.swapaxes(p, 1, 2))


# ------------------------- host-side parameter handling -------------------------
def init_params(key):
    """Deterministic synthetic parameters with torch module shapes/layout."""
    L, E, H, Nn = N_LAYERS, LATENT_DIM, HIDDEN_DIM, N_NODES

    def nrm(k, shape, scale=0.1):
        return (scale * jax.random.normal(k, shape)).astype(jnp.float32)

    ks = jax.random.split(key, 20)
    sa_in_w  = nrm(ks[0],  (L, 3 * E, E))        # self_attn.in_proj_weight
    sa_in_b  = nrm(ks[1],  (L, 3 * E))           # self_attn.in_proj_bias
    sa_out_w = nrm(ks[2],  (L, E, E))            # self_attn.out_proj.weight
    sa_out_b = nrm(ks[3],  (L, E))               # self_attn.out_proj.bias
    ca_in_w  = nrm(ks[4],  (L, 3 * E, E))        # multihead_attn.in_proj_weight
    ca_in_b  = nrm(ks[5],  (L, 3 * E))
    ca_out_w = nrm(ks[6],  (L, E, E))
    ca_out_b = nrm(ks[7],  (L, E))
    n1_w = 1.0 + nrm(ks[8],  (L, E)); n1_b = nrm(ks[9],  (L, E))
    n2_w = 1.0 + nrm(ks[10], (L, E)); n2_b = nrm(ks[11], (L, E))
    n3_w = 1.0 + nrm(ks[12], (L, E)); n3_b = nrm(ks[13], (L, E))
    l1_w = nrm(ks[14], (L, H, E)); l1_b = nrm(ks[15], (L, H))     # linear1
    l2_w = nrm(ks[16], (L, E, H)); l2_b = nrm(ks[17], (L, E))     # linear2
    fc_w = nrm(ks[18], (Nn, E));   fc_b = nrm(ks[19], (Nn,))      # fc_out
    return (sa_in_w, sa_in_b, sa_out_w, sa_out_b,
            ca_in_w, ca_in_b, ca_out_w, ca_out_b,
            n1_w, n1_b, n2_w, n2_b, n3_w, n3_b,
            l1_w, l1_b, l2_w, l2_b, fc_w, fc_b)


def pack_params(params):
    """Pack the 21 torch-shaped tensors into 3 lane-dense f32 slabs for the kernel."""
    (sa_in_w, sa_in_b, sa_out_w, sa_out_b,
     ca_in_w, ca_in_b, ca_out_w, ca_out_b,
     n1_w, n1_b, n2_w, n2_b, n3_w, n3_b,
     l1_w, l1_b, l2_w, l2_b, fc_w, fc_b) = [np.asarray(p, np.float32) for p in params]
    E = LATENT_DIM
    scale = 1.0 / math.sqrt(HEAD_DIM)

    w32  = np.zeros((LATENT_DIM, W32_COLS), np.float32)
    w64  = np.zeros((HIDDEN_DIM, W64_COLS), np.float32)
    bias = np.zeros((BIAS_ROWS, BIAS_COLS), np.float32)

    def put_w(slab, seg, mat):                     # mat: (in_dim, out_dim)
        slab[:, seg * SEG: seg * SEG + mat.shape[1]] = mat

    def put_b(row, vec):
        bias[row, :vec.shape[0]] = vec

    for l in range(N_LAYERS):
        seg0 = l * SEGS_PER_LAYER
        row0 = l * ROWS_PER_LAYER
        qkv_w = sa_in_w[l].T.copy()                # (E, 3E), torch Linear is (out, in)
        qkv_w[:, :E] *= scale                      # fold 1/sqrt(head_dim) into Wq
        qkv_b = sa_in_b[l].copy()
        qkv_b[:E] *= scale
        put_w(w32, seg0 + 0, qkv_w)
        put_w(w32, seg0 + 1, sa_out_w[l].T)
        put_w(w32, seg0 + 2, ca_out_w[l].T)
        put_w(w32, seg0 + 3, l1_w[l].T)
        w64[:, l * SEG: l * SEG + E] = l2_w[l].T
        put_b(row0 + 0, qkv_b)
        put_b(row0 + 1, sa_out_b[l])
        put_b(row0 + 2, ca_in_b[l][2 * E:3 * E])   # cross-attn value bias (only part used)
        put_b(row0 + 3, ca_out_b[l])
        put_b(row0 + 4, n1_w[l]); put_b(row0 + 5, n1_b[l])
        put_b(row0 + 6, n2_w[l]); put_b(row0 + 7, n2_b[l])
        put_b(row0 + 8, n3_w[l]); put_b(row0 + 9, n3_b[l])
        put_b(row0 + 10, l1_b[l]); put_b(row0 + 11, l2_b[l])
    put_w(w32, FC_SEG, fc_w.T)
    put_b(FC_B_ROW, fc_b)
    return jnp.asarray(w32), jnp.asarray(w64), jnp.asarray(bias)


@jax.jit
def autoregressive_decoder(x, w32, w64, bias):
    return pl.pallas_call(
        decoder_kernel,
        out_shape=jax.ShapeDtypeStruct((BATCH, N_NODES, N_NODES), jnp.float32),
        in_specs=[pl.BlockSpec(memory_space=pltpu.MemorySpace.VMEM)] * 4,
        out_specs=pl.BlockSpec(memory_space=pltpu.MemorySpace.VMEM),
    )(x, w32, w64, bias)


# ------------------------- pure-JAX reference (torch transliteration) ------------------
def reference_decoder(x, params):
    (sa_in_w, sa_in_b, sa_out_w, sa_out_b,
     ca_in_w, ca_in_b, ca_out_w, ca_out_b,
     n1_w, n1_b, n2_w, n2_b, n3_w, n3_b,
     l1_w, l1_b, l2_w, l2_b, fc_w, fc_b) = params
    B, E, Nn, Hh, hd = BATCH, LATENT_DIM, N_NODES, N_HEAD, HEAD_DIM

    def ln(h, w, b):
        mu = jnp.mean(h, -1, keepdims=True)
        var = jnp.mean((h - mu) ** 2, -1, keepdims=True)
        return (h - mu) / jnp.sqrt(var + EPS) * w + b

    def mha(q_in, k_in, v_in, in_w, in_b, out_w, out_b):
        S, N, _ = q_in.shape
        Sk = k_in.shape[0]
        q = (q_in @ in_w[:E].T + in_b[:E]) * (1.0 / math.sqrt(hd))
        k = k_in @ in_w[E:2 * E].T + in_b[E:2 * E]
        v = v_in @ in_w[2 * E:].T + in_b[2 * E:]
        qh = q.reshape(S, N, Hh, hd).transpose(1, 2, 0, 3)
        kh = k.reshape(Sk, N, Hh, hd).transpose(1, 2, 0, 3)
        vh = v.reshape(Sk, N, Hh, hd).transpose(1, 2, 0, 3)
        s = jnp.einsum('nhqd,nhkd->nhqk', qh, kh)
        p = jax.nn.softmax(s, axis=-1)
        ctx = jnp.einsum('nhqk,nhkd->nhqd', p, vh)
        ctx = ctx.transpose(2, 0, 1, 3).reshape(S, N, E)
        return ctx @ out_w.T + out_b

    tgt = jnp.broadcast_to(x[:, None, :], (B, Nn, E))       # (S=B, N=Nn, E)
    mem = jnp.zeros((B, Nn, E), jnp.float32)
    h = tgt
    for l in range(N_LAYERS):
        sa = mha(h, h, h, sa_in_w[l], sa_in_b[l], sa_out_w[l], sa_out_b[l])
        h = ln(h + sa, n1_w[l], n1_b[l])
        ca = mha(h, mem, mem, ca_in_w[l], ca_in_b[l], ca_out_w[l], ca_out_b[l])
        h = ln(h + ca, n2_w[l], n2_b[l])
        ff = jnp.maximum(h @ l1_w[l].T + l1_b[l], 0.0) @ l2_w[l].T + l2_b[l]
        h = ln(h + ff, n3_w[l], n3_b[l])
    adj_prob = h @ fc_w.T + fc_b                             # (B, Nn, Nn)
    rows = jnp.arange(Nn)[:, None]
    cols = jnp.arange(Nn)[None, :]
    adj_prob = jnp.where(cols > rows, adj_prob, 0.0)
    p = jax.nn.sigmoid(adj_prob)
    return 0.5 * (p + jnp.swapaxes(p, 1, 2))


if __name__ == "__main__":
    key = jax.random.PRNGKey(0)
    pkey, xkey = jax.random.split(key)
    params = init_params(pkey)
    x = jax.random.normal(xkey, (BATCH, LATENT_DIM), dtype=jnp.float32)

    w32, w64, bias = pack_params(params)
    adj = autoregressive_decoder(x, w32, w64, bias)
    jax.block_until_ready(adj)

    assert adj.shape == (BATCH, N_NODES, N_NODES)
    assert bool(jnp.all(jnp.isfinite(adj)))
    # symmetric per batch element
    assert bool(jnp.allclose(adj, jnp.swapaxes(adj, 1, 2), atol=1e-6))
    # matches the straightforward (torch-equivalent) reference within approx-recip error
    ref = reference_decoder(x, params)
    assert bool(jnp.allclose(adj, ref, atol=2e-2)), float(jnp.max(jnp.abs(adj - ref)))
    print("KERNEL_OK")
</pallas_src>

<mosaic_0001>
module attributes {stable_mosaic.version = 11 : i64} {
  func.func @decoder_kernel(%arg0: memref<2x32xf32, #tpu.memory_space<vmem>>, %arg1: memref<32x1152xf32, #tpu.memory_space<vmem>>, %arg2: memref<64x256xf32, #tpu.memory_space<vmem>>, %arg3: memref<32x128xf32, #tpu.memory_space<vmem>>, %arg4: memref<2x8x8xf32, #tpu.memory_space<vmem>>) attributes {dimension_semantics = [], scalar_prefetch = 0 : i64, scratch_operands = 0 : i64, tpu.core_type = #tpu.core_type<tc>} {
    %c0 = arith.constant 0 : index
    %c0_0 = arith.constant 0 : index
    %0 = vector.load %arg0[%c0, %c0_0] : memref<2x32xf32, #tpu.memory_space<vmem>>, vector<2x32xf32>
    %1 = vector.extract_strided_slice %0 {offsets = [0, 0], sizes = [1, 32], strides = [1, 1]} : vector<2x32xf32> to vector<1x32xf32>
    %2 = vector.shape_cast %1 : vector<1x32xf32> to vector<1x32xf32>
    %3 = vector.broadcast %2 : vector<1x32xf32> to vector<8x32xf32>
    %4 = vector.extract_strided_slice %0 {offsets = [1, 0], sizes = [1, 32], strides = [1, 1]} : vector<2x32xf32> to vector<1x32xf32>
    %5 = vector.shape_cast %4 : vector<1x32xf32> to vector<1x32xf32>
    %6 = vector.broadcast %5 : vector<1x32xf32> to vector<8x32xf32>
    %7 = tpu.concatenate %3, %6 in 0 : vector<8x32xf32>, vector<8x32xf32> -> vector<16x32xf32>
    %c0_1 = arith.constant 0 : index
    %c0_2 = arith.constant 0 : index
    %8 = vector.load %arg1[%c0_1, %c0_2] : memref<32x1152xf32, #tpu.memory_space<vmem>>, vector<32x96xf32>
    %cst = arith.constant dense<0.000000e+00> : vector<16x96xf32>
    %9 = tpu.matmul %7, %8, %cst {dimension_numbers = #tpu.dot_dimension_numbers<[1], [0], [0], [1], [0, 0, 1, 1], [], []>} : vector<16x32xf32>, vector<32x96xf32>, vector<16x96xf32> -> vector<16x96xf32>
    %c0_3 = arith.constant 0 : index
    %c0_4 = arith.constant 0 : index
    %10 = vector.load %arg3[%c0_3, %c0_4] : memref<32x128xf32, #tpu.memory_space<vmem>>, vector<1x96xf32>
    %11 = vector.broadcast %10 : vector<1x96xf32> to vector<16x96xf32>
    %12 = arith.addf %9, %11 : vector<16x96xf32>
    %13 = vector.extract_strided_slice %12 {offsets = [0, 0], sizes = [16, 32], strides = [1, 1]} : vector<16x96xf32> to vector<16x32xf32>
    %14 = vector.extract_strided_slice %12 {offsets = [0, 32], sizes = [16, 32], strides = [1, 1]} : vector<16x96xf32> to vector<16x32xf32>
    %15 = vector.extract_strided_slice %12 {offsets = [0, 64], sizes = [16, 32], strides = [1, 1]} : vector<16x96xf32> to vector<16x32xf32>
    %16 = vector.extract_strided_slice %13 {offsets = [0, 0], sizes = [8, 32], strides = [1, 1]} : vector<16x32xf32> to vector<8x32xf32>
    %17 = vector.shape_cast %16 : vector<8x32xf32> to vector<8x4x8xf32>
    %18 = vector.extract_strided_slice %13 {offsets = [8, 0], sizes = [8, 32], strides = [1, 1]} : vector<16x32xf32> to vector<8x32xf32>
    %19 = vector.shape_cast %18 : vector<8x32xf32> to vector<8x4x8xf32>
    %20 = vector.extract_strided_slice %14 {offsets = [0, 0], sizes = [8, 32], strides = [1, 1]} : vector<16x32xf32> to vector<8x32xf32>
    %21 = vector.shape_cast %20 : vector<8x32xf32> to vector<8x4x8xf32>
    %22 = vector.extract_strided_slice %14 {offsets = [8, 0], sizes = [8, 32], strides = [1, 1]} : vector<16x32xf32> to vector<8x32xf32>
    %23 = vector.shape_cast %22 : vector<8x32xf32> to vector<8x4x8xf32>
    %24 = vector.extract_strided_slice %15 {offsets = [0, 0], sizes = [8, 32], strides = [1, 1]} : vector<16x32xf32> to vector<8x32xf32>
    %25 = vector.shape_cast %24 : vector<8x32xf32> to vector<8x4x8xf32>
    %26 = vector.extract_strided_slice %15 {offsets = [8, 0], sizes = [8, 32], strides = [1, 1]} : vector<16x32xf32> to vector<8x32xf32>
    %27 = vector.shape_cast %26 : vector<8x32xf32> to vector<8x4x8xf32>
    %28 = arith.mulf %17, %21 : vector<8x4x8xf32>
    %cst_5 = arith.constant dense<0.000000e+00> : vector<8x4xf32>
    %29 = vector.multi_reduction <add>, %28, %cst_5 [2] : vector<8x4x8xf32> to vector<8x4xf32>
    %30 = vector.shape_cast %29 : vector<8x4xf32> to vector<8x4x1xf32>
    %31 = arith.mulf %17, %23 : vector<8x4x8xf32>
    %cst_6 = arith.constant dense<0.000000e+00> : vector<8x4xf32>
    %32 = vector.multi_reduction <add>, %31, %cst_6 [2] : vector<8x4x8xf32> to vector<8x4xf32>
    %33 = vector.shape_cast %32 : vector<8x4xf32> to vector<8x4x1xf32>
    %34 = arith.mulf %19, %21 : vector<8x4x8xf32>
    %cst_7 = arith.constant dense<0.000000e+00> : vector<8x4xf32>
    %35 = vector.multi_reduction <add>, %34, %cst_7 [2] : vector<8x4x8xf32> to vector<8x4xf32>
    %36 = vector.shape_cast %35 : vector<8x4xf32> to vector<8x4x1xf32>
    %37 = arith.mulf %19, %23 : vector<8x4x8xf32>
    %cst_8 = arith.constant dense<0.000000e+00> : vector<8x4xf32>
    %38 = vector.multi_reduction <add>, %37, %cst_8 [2] : vector<8x4x8xf32> to vector<8x4xf32>
    %39 = vector.shape_cast %38 : vector<8x4xf32> to vector<8x4x1xf32>
    %40 = arith.maximumf %30, %33 : vector<8x4x1xf32>
    %41 = arith.subf %30, %40 : vector<8x4x1xf32>
    %42 = math.exp %41 : vector<8x4x1xf32>
    %43 = arith.subf %33, %40 : vector<8x4x1xf32>
    %44 = math.exp %43 : vector<8x4x1xf32>
    %45 = arith.addf %42, %44 : vector<8x4x1xf32>
    %46 = tpu.reciprocal %45 {approx = true} : vector<8x4x1xf32> -> vector<8x4x1xf32>
    %47 = arith.maximumf %36, %39 : vector<8x4x1xf32>
    %48 = arith.subf %36, %47 : vector<8x4x1xf32>
    %49 = math.exp %48 : vector<8x4x1xf32>
    %50 = arith.subf %39, %47 : vector<8x4x1xf32>
    %51 = math.exp %50 : vector<8x4x1xf32>
    %52 = arith.addf %49, %51 : vector<8x4x1xf32>
    %53 = tpu.reciprocal %52 {approx = true} : vector<8x4x1xf32> -> vector<8x4x1xf32>
    %54 = arith.mulf %42, %46 : vector<8x4x1xf32>
    %55 = vector.broadcast %54 : vector<8x4x1xf32> to vector<8x4x8xf32>
    %56 = arith.mulf %55, %25 : vector<8x4x8xf32>
    %57 = arith.mulf %44, %46 : vector<8x4x1xf32>
    %58 = vector.broadcast %57 : vector<8x4x1xf32> to vector<8x4x8xf32>
    %59 = arith.mulf %58, %27 : vector<8x4x8xf32>
    %60 = arith.addf %56, %59 : vector<8x4x8xf32>
    %61 = vector.shape_cast %60 : vector<8x4x8xf32> to vector<8x32xf32>
    %62 = arith.mulf %49, %53 : vector<8x4x1xf32>
    %63 = vector.broadcast %62 : vector<8x4x1xf32> to vector<8x4x8xf32>
    %64 = arith.mulf %63, %25 : vector<8x4x8xf32>
    %65 = arith.mulf %51, %53 : vector<8x4x1xf32>
    %66 = vector.broadcast %65 : vector<8x4x1xf32> to vector<8x4x8xf32>
    %67 = arith.mulf %66, %27 : vector<8x4x8xf32>
    %68 = arith.addf %64, %67 : vector<8x4x8xf32>
    %69 = vector.shape_cast %68 : vector<8x4x8xf32> to vector<8x32xf32>
    %70 = tpu.concatenate %61, %69 in 0 : vector<8x32xf32>, vector<8x32xf32> -> vector<16x32xf32>
    %c0_9 = arith.constant 0 : index
    %c128 = arith.constant 128 : index
    %71 = vector.load %arg1[%c0_9, %c128] : memref<32x1152xf32, #tpu.memory_space<vmem>>, vector<32x32xf32>
    %cst_10 = arith.constant dense<0.000000e+00> : vector<16x32xf32>
    %72 = tpu.matmul %70, %71, %cst_10 {dimension_numbers = #tpu.dot_dimension_numbers<[1], [0], [0], [1], [0, 0, 1, 1], [], []>} : vector<16x32xf32>, vector<32x32xf32>, vector<16x32xf32> -> vector<16x32xf32>
    %c1 = arith.constant 1 : index
    %c0_11 = arith.constant 0 : index
    %73 = vector.load %arg3[%c1, %c0_11] : memref<32x128xf32, #tpu.memory_space<vmem>>, vector<1x32xf32>
    %74 = vector.broadcast %73 : vector<1x32xf32> to vector<16x32xf32>
    %75 = arith.addf %72, %74 : vector<16x32xf32>
    %76 = arith.addf %7, %75 : vector<16x32xf32>
    %c4 = arith.constant 4 : index
    %c0_12 = arith.constant 0 : index
    %77 = vector.load %arg3[%c4, %c0_12] : memref<32x128xf32, #tpu.memory_space<vmem>>, vector<1x32xf32>
    %c5 = arith.constant 5 : index
    %c0_13 = arith.constant 0 : index
    %78 = vector.load %arg3[%c5, %c0_13] : memref<32x128xf32, #tpu.memory_space<vmem>>, vector<1x32xf32>
    %cst_14 = arith.constant dense<0.000000e+00> : vector<16xf32>
    %79 = vector.multi_reduction <add>, %76, %cst_14 [1] : vector<16x32xf32> to vector<16xf32>
    %80 = vector.shape_cast %79 : vector<16xf32> to vector<16x1xf32>
    %cst_15 = arith.constant 3.200000e+01 : f32
    %81 = vector.broadcast %cst_15 : f32 to vector<16x1xf32>
    %82 = arith.divf %80, %81 : vector<16x1xf32>
    %83 = vector.broadcast %82 : vector<16x1xf32> to vector<16x32xf32>
    %84 = arith.subf %76, %83 : vector<16x32xf32>
    %85 = arith.mulf %84, %84 : vector<16x32xf32>
    %cst_16 = arith.constant dense<0.000000e+00> : vector<16xf32>
    %86 = vector.multi_reduction <add>, %85, %cst_16 [1] : vector<16x32xf32> to vector<16xf32>
    %87 = vector.shape_cast %86 : vector<16xf32> to vector<16x1xf32>
    %cst_17 = arith.constant 3.200000e+01 : f32
    %88 = vector.broadcast %cst_17 : f32 to vector<16x1xf32>
    %89 = arith.divf %87, %88 : vector<16x1xf32>
    %cst_18 = arith.constant 9.99999974E-6 : f32
    %90 = vector.broadcast %cst_18 : f32 to vector<16x1xf32>
    %91 = arith.addf %89, %90 : vector<16x1xf32>
    %92 = math.rsqrt %91 : vector<16x1xf32>
    %93 = vector.broadcast %92 : vector<16x1xf32> to vector<16x32xf32>
    %94 = arith.mulf %84, %93 : vector<16x32xf32>
    %95 = vector.broadcast %77 : vector<1x32xf32> to vector<16x32xf32>
    %96 = arith.mulf %94, %95 : vector<16x32xf32>
    %97 = vector.broadcast %78 : vector<1x32xf32> to vector<16x32xf32>
    %98 = arith.addf %96, %97 : vector<16x32xf32>
    %c2 = arith.constant 2 : index
    %c0_19 = arith.constant 0 : index
    %99 = vector.load %arg3[%c2, %c0_19] : memref<32x128xf32, #tpu.memory_space<vmem>>, vector<1x32xf32>
    %c0_20 = arith.constant 0 : index
    %c256 = arith.constant 256 : index
    %100 = vector.load %arg1[%c0_20, %c256] : memref<32x1152xf32, #tpu.memory_space<vmem>>, vector<32x32xf32>
    %cst_21 = arith.constant dense<0.000000e+00> : vector<1x32xf32>
    %101 = tpu.matmul %99, %100, %cst_21 {dimension_numbers = #tpu.dot_dimension_numbers<[1], [0], [0], [1], [0, 0, 1, 1], [], []>} : vector<1x32xf32>, vector<32x32xf32>, vector<1x32xf32> -> vector<1x32xf32>
    %c3 = arith.constant 3 : index
    %c0_22 = arith.constant 0 : index
    %102 = vector.load %arg3[%c3, %c0_22] : memref<32x128xf32, #tpu.memory_space<vmem>>, vector<1x32xf32>
    %103 = arith.addf %101, %102 : vector<1x32xf32>
    %104 = vector.broadcast %103 : vector<1x32xf32> to vector<16x32xf32>
    %105 = arith.addf %98, %104 : vector<16x32xf32>
    %c6 = arith.constant 6 : index
    %c0_23 = arith.constant 0 : index
    %106 = vector.load %arg3[%c6, %c0_23] : memref<32x128xf32, #tpu.memory_space<vmem>>, vector<1x32xf32>
    %c7 = arith.constant 7 : index
    %c0_24 = arith.constant 0 : index
    %107 = vector.load %arg3[%c7, %c0_24] : memref<32x128xf32, #tpu.memory_space<vmem>>, vector<1x32xf32>
    %cst_25 = arith.constant dense<0.000000e+00> : vector<16xf32>
    %108 = vector.multi_reduction <add>, %105, %cst_25 [1] : vector<16x32xf32> to vector<16xf32>
    %109 = vector.shape_cast %108 : vector<16xf32> to vector<16x1xf32>
    %cst_26 = arith.constant 3.200000e+01 : f32
    %110 = vector.broadcast %cst_26 : f32 to vector<16x1xf32>
    %111 = arith.divf %109, %110 : vector<16x1xf32>
    %112 = vector.broadcast %111 : vector<16x1xf32> to vector<16x32xf32>
    %113 = arith.subf %105, %112 : vector<16x32xf32>
    %114 = arith.mulf %113, %113 : vector<16x32xf32>
    %cst_27 = arith.constant dense<0.000000e+00> : vector<16xf32>
    %115 = vector.multi_reduction <add>, %114, %cst_27 [1] : vector<16x32xf32> to vector<16xf32>
    %116 = vector.shape_cast %115 : vector<16xf32> to vector<16x1xf32>
    %cst_28 = arith.constant 3.200000e+01 : f32
    %117 = vector.broadcast %cst_28 : f32 to vector<16x1xf32>
    %118 = arith.divf %116, %117 : vector<16x1xf32>
    %cst_29 = arith.constant 9.99999974E-6 : f32
    %119 = vector.broadcast %cst_29 : f32 to vector<16x1xf32>
    %120 = arith.addf %118, %119 : vector<16x1xf32>
    %121 = math.rsqrt %120 : vector<16x1xf32>
    %122 = vector.broadcast %121 : vector<16x1xf32> to vector<16x32xf32>
    %123 = arith.mulf %113, %122 : vector<16x32xf32>
    %124 = vector.broadcast %106 : vector<1x32xf32> to vector<16x32xf32>
    %125 = arith.mulf %123, %124 : vector<16x32xf32>
    %126 = vector.broadcast %107 : vector<1x32xf32> to vector<16x32xf32>
    %127 = arith.addf %125, %126 : vector<16x32xf32>
    %c0_30 = arith.constant 0 : index
    %c384 = arith.constant 384 : index
    %128 = vector.load %arg1[%c0_30, %c384] : memref<32x1152xf32, #tpu.memory_space<vmem>>, vector<32x64xf32>
    %cst_31 = arith.constant dense<0.000000e+00> : vector<16x64xf32>
    %129 = tpu.matmul %127, %128, %cst_31 {dimension_numbers = #tpu.dot_dimension_numbers<[1], [0], [0], [1], [0, 0, 1, 1], [], []>} : vector<16x32xf32>, vector<32x64xf32>, vector<16x64xf32> -> vector<16x64xf32>
    %c10 = arith.constant 10 : index
    %c0_32 = arith.constant 0 : index
    %130 = vector.load %arg3[%c10, %c0_32] : memref<32x128xf32, #tpu.memory_space<vmem>>, vector<1x64xf32>
    %131 = vector.broadcast %130 : vector<1x64xf32> to vector<16x64xf32>
    %132 = arith.addf %129, %131 : vector<16x64xf32>
    %cst_33 = arith.constant 0.000000e+00 : f32
    %133 = vector.broadcast %cst_33 : f32 to vector<16x64xf32>
    %134 = arith.maximumf %132, %133 : vector<16x64xf32>
    %c0_34 = arith.constant 0 : index
    %c0_35 = arith.constant 0 : index
    %135 = vector.load %arg2[%c0_34, %c0_35] : memref<64x256xf32, #tpu.memory_space<vmem>>, vector<64x32xf32>
    %cst_36 = arith.constant dense<0.000000e+00> : vector<16x32xf32>
    %136 = tpu.matmul %134, %135, %cst_36 {dimension_numbers = #tpu.dot_dimension_numbers<[1], [0], [0], [1], [0, 0, 1, 1], [], []>} : vector<16x64xf32>, vector<64x32xf32>, vector<16x32xf32> -> vector<16x32xf32>
    %c11 = arith.constant 11 : index
    %c0_37 = arith.constant 0 : index
    %137 = vector.load %arg3[%c11, %c0_37] : memref<32x128xf32, #tpu.memory_space<vmem>>, vector<1x32xf32>
    %138 = vector.broadcast %137 : vector<1x32xf32> to vector<16x32xf32>
    %139 = arith.addf %136, %138 : vector<16x32xf32>
    %140 = arith.addf %127, %139 : vector<16x32xf32>
    %c8 = arith.constant 8 : index
    %c0_38 = arith.constant 0 : index
    %141 = vector.load %arg3[%c8, %c0_38] : memref<32x128xf32, #tpu.memory_space<vmem>>, vector<1x32xf32>
    %c9 = arith.constant 9 : index
    %c0_39 = arith.constant 0 : index
    %142 = vector.load %arg3[%c9, %c0_39] : memref<32x128xf32, #tpu.memory_space<vmem>>, vector<1x32xf32>
    %cst_40 = arith.constant dense<0.000000e+00> : vector<16xf32>
    %143 = vector.multi_reduction <add>, %140, %cst_40 [1] : vector<16x32xf32> to vector<16xf32>
    %144 = vector.shape_cast %143 : vector<16xf32> to vector<16x1xf32>
    %cst_41 = arith.constant 3.200000e+01 : f32
    %145 = vector.broadcast %cst_41 : f32 to vector<16x1xf32>
    %146 = arith.divf %144, %145 : vector<16x1xf32>
    %147 = vector.broadcast %146 : vector<16x1xf32> to vector<16x32xf32>
    %148 = arith.subf %140, %147 : vector<16x32xf32>
    %149 = arith.mulf %148, %148 : vector<16x32xf32>
    %cst_42 = arith.constant dense<0.000000e+00> : vector<16xf32>
    %150 = vector.multi_reduction <add>, %149, %cst_42 [1] : vector<16x32xf32> to vector<16xf32>
    %151 = vector.shape_cast %150 : vector<16xf32> to vector<16x1xf32>
    %cst_43 = arith.constant 3.200000e+01 : f32
    %152 = vector.broadcast %cst_43 : f32 to vector<16x1xf32>
    %153 = arith.divf %151, %152 : vector<16x1xf32>
    %cst_44 = arith.constant 9.99999974E-6 : f32
    %154 = vector.broadcast %cst_44 : f32 to vector<16x1xf32>
    %155 = arith.addf %153, %154 : vector<16x1xf32>
    %156 = math.rsqrt %155 : vector<16x1xf32>
    %157 = vector.broadcast %156 : vector<16x1xf32> to vector<16x32xf32>
    %158 = arith.mulf %148, %157 : vector<16x32xf32>
    %159 = vector.broadcast %141 : vector<1x32xf32> to vector<16x32xf32>
    %160 = arith.mulf %158, %159 : vector<16x32xf32>
    %161 = vector.broadcast %142 : vector<1x32xf32> to vector<16x32xf32>
    %162 = arith.addf %160, %161 : vector<16x32xf32>
    %c0_45 = arith.constant 0 : index
    %c512 = arith.constant 512 : index
    %163 = vector.load %arg1[%c0_45, %c512] : memref<32x1152xf32, #tpu.memory_space<vmem>>, vector<32x96xf32>
    %cst_46 = arith.constant dense<0.000000e+00> : vector<16x96xf32>
    %164 = tpu.matmul %162, %163, %cst_46 {dimension_numbers = #tpu.dot_dimension_numbers<[1], [0], [0], [1], [0, 0, 1, 1], [], []>} : vector<16x32xf32>, vector<32x96xf32>, vector<16x96xf32> -> vector<16x96xf32>
    %c12 = arith.constant 12 : index
    %c0_47 = arith.constant 0 : index
    %165 = vector.load %arg3[%c12, %c0_47] : memref<32x128xf32, #tpu.memory_space<vmem>>, vector<1x96xf32>
    %166 = vector.broadcast %165 : vector<1x96xf32> to vector<16x96xf32>
    %167 = arith.addf %164, %166 : vector<16x96xf32>
    %168 = vector.extract_strided_slice %167 {offsets = [0, 0], sizes = [16, 32], strides = [1, 1]} : vector<16x96xf32> to vector<16x32xf32>
    %169 = vector.extract_strided_slice %167 {offsets = [0, 32], sizes = [16, 32], strides = [1, 1]} : vector<16x96xf32> to vector<16x32xf32>
    %170 = vector.extract_strided_slice %167 {offsets = [0, 64], sizes = [16, 32], strides = [1, 1]} : vector<16x96xf32> to vector<16x32xf32>
    %171 = vector.extract_strided_slice %168 {offsets = [0, 0], sizes = [8, 32], strides = [1, 1]} : vector<16x32xf32> to vector<8x32xf32>
    %172 = vector.shape_cast %171 : vector<8x32xf32> to vector<8x4x8xf32>
    %173 = vector.extract_strided_slice %168 {offsets = [8, 0], sizes = [8, 32], strides = [1, 1]} : vector<16x32xf32> to vector<8x32xf32>
    %174 = vector.shape_cast %173 : vector<8x32xf32> to vector<8x4x8xf32>
    %175 = vector.extract_strided_slice %169 {offsets = [0, 0], sizes = [8, 32], strides = [1, 1]} : vector<16x32xf32> to vector<8x32xf32>
    %176 = vector.shape_cast %175 : vector<8x32xf32> to vector<8x4x8xf32>
    %177 = vector.extract_strided_slice %169 {offsets = [8, 0], sizes = [8, 32], strides = [1, 1]} : vector<16x32xf32> to vector<8x32xf32>
    %178 = vector.shape_cast %177 : vector<8x32xf32> to vector<8x4x8xf32>
    %179 = vector.extract_strided_slice %170 {offsets = [0, 0], sizes = [8, 32], strides = [1, 1]} : vector<16x32xf32> to vector<8x32xf32>
    %180 = vector.shape_cast %179 : vector<8x32xf32> to vector<8x4x8xf32>
    %181 = vector.extract_strided_slice %170 {offsets = [8, 0], sizes = [8, 32], strides = [1, 1]} : vector<16x32xf32> to vector<8x32xf32>
    %182 = vector.shape_cast %181 : vector<8x32xf32> to vector<8x4x8xf32>
    %183 = arith.mulf %172, %176 : vector<8x4x8xf32>
    %cst_48 = arith.constant dense<0.000000e+00> : vector<8x4xf32>
    %184 = vector.multi_reduction <add>, %183, %cst_48 [2] : vector<8x4x8xf32> to vector<8x4xf32>
    %185 = vector.shape_cast %184 : vector<8x4xf32> to vector<8x4x1xf32>
    %186 = arith.mulf %172, %178 : vector<8x4x8xf32>
    %cst_49 = arith.constant dense<0.000000e+00> : vector<8x4xf32>
    %187 = vector.multi_reduction <add>, %186, %cst_49 [2] : vector<8x4x8xf32> to vector<8x4xf32>
    %188 = vector.shape_cast %187 : vector<8x4xf32> to vector<8x4x1xf32>
    %189 = arith.mulf %174, %176 : vector<8x4x8xf32>
    %cst_50 = arith.constant dense<0.000000e+00> : vector<8x4xf32>
    %190 = vector.multi_reduction <add>, %189, %cst_50 [2] : vector<8x4x8xf32> to vector<8x4xf32>
    %191 = vector.shape_cast %190 : vector<8x4xf32> to vector<8x4x1xf32>
    %192 = arith.mulf %174, %178 : vector<8x4x8xf32>
    %cst_51 = arith.constant dense<0.000000e+00> : vector<8x4xf32>
    %193 = vector.multi_reduction <add>, %192, %cst_51 [2] : vector<8x4x8xf32> to vector<8x4xf32>
    %194 = vector.shape_cast %193 : vector<8x4xf32> to vector<8x4x1xf32>
    %195 = arith.maximumf %185, %188 : vector<8x4x1xf32>
    %196 = arith.subf %185, %195 : vector<8x4x1xf32>
    %197 = math.exp %196 : vector<8x4x1xf32>
    %198 = arith.subf %188, %195 : vector<8x4x1xf32>
    %199 = math.exp %198 : vector<8x4x1xf32>
    %200 = arith.addf %197, %199 : vector<8x4x1xf32>
    %201 = tpu.reciprocal %200 {approx = true} : vector<8x4x1xf32> -> vector<8x4x1xf32>
    %202 = arith.maximumf %191, %194 : vector<8x4x1xf32>
    %203 = arith.subf %191, %202 : vector<8x4x1xf32>
    %204 = math.exp %203 : vector<8x4x1xf32>
    %205 = arith.subf %194, %202 : vector<8x4x1xf32>
    %206 = math.exp %205 : vector<8x4x1xf32>
    %207 = arith.addf %204, %206 : vector<8x4x1xf32>
    %208 = tpu.reciprocal %207 {approx = true} : vector<8x4x1xf32> -> vector<8x4x1xf32>
    %209 = arith.mulf %197, %201 : vector<8x4x1xf32>
    %210 = vector.broadcast %209 : vector<8x4x1xf32> to vector<8x4x8xf32>
    %211 = arith.mulf %210, %180 : vector<8x4x8xf32>
    %212 = arith.mulf %199, %201 : vector<8x4x1xf32>
    %213 = vector.broadcast %212 : vector<8x4x1xf32> to vector<8x4x8xf32>
    %214 = arith.mulf %213, %182 : vector<8x4x8xf32>
    %215 = arith.addf %211, %214 : vector<8x4x8xf32>
    %216 = vector.shape_cast %215 : vector<8x4x8xf32> to vector<8x32xf32>
    %217 = arith.mulf %204, %208 : vector<8x4x1xf32>
    %218 = vector.broadcast %217 : vector<8x4x1xf32> to vector<8x4x8xf32>
    %219 = arith.mulf %218, %180 : vector<8x4x8xf32>
    %220 = arith.mulf %206, %208 : vector<8x4x1xf32>
    %221 = vector.broadcast %220 : vector<8x4x1xf32> to vector<8x4x8xf32>
    %222 = arith.mulf %221, %182 : vector<8x4x8xf32>
    %223 = arith.addf %219, %222 : vector<8x4x8xf32>
    %224 = vector.shape_cast %223 : vector<8x4x8xf32> to vector<8x32xf32>
    %225 = tpu.concatenate %216, %224 in 0 : vector<8x32xf32>, vector<8x32xf32> -> vector<16x32xf32>
    %c0_52 = arith.constant 0 : index
    %c640 = arith.constant 640 : index
    %226 = vector.load %arg1[%c0_52, %c640] : memref<32x1152xf32, #tpu.memory_space<vmem>>, vector<32x32xf32>
    %cst_53 = arith.constant dense<0.000000e+00> : vector<16x32xf32>
    %227 = tpu.matmul %225, %226, %cst_53 {dimension_numbers = #tpu.dot_dimension_numbers<[1], [0], [0], [1], [0, 0, 1, 1], [], []>} : vector<16x32xf32>, vector<32x32xf32>, vector<16x32xf32> -> vector<16x32xf32>
    %c13 = arith.constant 13 : index
    %c0_54 = arith.constant 0 : index
    %228 = vector.load %arg3[%c13, %c0_54] : memref<32x128xf32, #tpu.memory_space<vmem>>, vector<1x32xf32>
    %229 = vector.broadcast %228 : vector<1x32xf32> to vector<16x32xf32>
    %230 = arith.addf %227, %229 : vector<16x32xf32>
    %231 = arith.addf %162, %230 : vector<16x32xf32>
    %c16 = arith.constant 16 : index
    %c0_55 = arith.constant 0 : index
    %232 = vector.load %arg3[%c16, %c0_55] : memref<32x128xf32, #tpu.memory_space<vmem>>, vector<1x32xf32>
    %c17 = arith.constant 17 : index
    %c0_56 = arith.constant 0 : index
    %233 = vector.load %arg3[%c17, %c0_56] : memref<32x128xf32, #tpu.memory_space<vmem>>, vector<1x32xf32>
    %cst_57 = arith.constant dense<0.000000e+00> : vector<16xf32>
    %234 = vector.multi_reduction <add>, %231, %cst_57 [1] : vector<16x32xf32> to vector<16xf32>
    %235 = vector.shape_cast %234 : vector<16xf32> to vector<16x1xf32>
    %cst_58 = arith.constant 3.200000e+01 : f32
    %236 = vector.broadcast %cst_58 : f32 to vector<16x1xf32>
    %237 = arith.divf %235, %236 : vector<16x1xf32>
    %238 = vector.broadcast %237 : vector<16x1xf32> to vector<16x32xf32>
    %239 = arith.subf %231, %238 : vector<16x32xf32>
    %240 = arith.mulf %239, %239 : vector<16x32xf32>
    %cst_59 = arith.constant dense<0.000000e+00> : vector<16xf32>
    %241 = vector.multi_reduction <add>, %240, %cst_59 [1] : vector<16x32xf32> to vector<16xf32>
    %242 = vector.shape_cast %241 : vector<16xf32> to vector<16x1xf32>
    %cst_60 = arith.constant 3.200000e+01 : f32
    %243 = vector.broadcast %cst_60 : f32 to vector<16x1xf32>
    %244 = arith.divf %242, %243 : vector<16x1xf32>
    %cst_61 = arith.constant 9.99999974E-6 : f32
    %245 = vector.broadcast %cst_61 : f32 to vector<16x1xf32>
    %246 = arith.addf %244, %245 : vector<16x1xf32>
    %247 = math.rsqrt %246 : vector<16x1xf32>
    %248 = vector.broadcast %247 : vector<16x1xf32> to vector<16x32xf32>
    %249 = arith.mulf %239, %248 : vector<16x32xf32>
    %250 = vector.broadcast %232 : vector<1x32xf32> to vector<16x32xf32>
    %251 = arith.mulf %249, %250 : vector<16x32xf32>
    %252 = vector.broadcast %233 : vector<1x32xf32> to vector<16x32xf32>
    %253 = arith.addf %251, %252 : vector<16x32xf32>
    %c14 = arith.constant 14 : index
    %c0_62 = arith.constant 0 : index
    %254 = vector.load %arg3[%c14, %c0_62] : memref<32x128xf32, #tpu.memory_space<vmem>>, vector<1x32xf32>
    %c0_63 = arith.constant 0 : index
    %c768 = arith.constant 768 : index
    %255 = vector.load %arg1[%c0_63, %c768] : memref<32x1152xf32, #tpu.memory_space<vmem>>, vector<32x32xf32>
    %cst_64 = arith.constant dense<0.000000e+00> : vector<1x32xf32>
    %256 = tpu.matmul %254, %255, %cst_64 {dimension_numbers = #tpu.dot_dimension_numbers<[1], [0], [0], [1], [0, 0, 1, 1], [], []>} : vector<1x32xf32>, vector<32x32xf32>, vector<1x32xf32> -> vector<1x32xf32>
    %c15 = arith.constant 15 : index
    %c0_65 = arith.constant 0 : index
    %257 = vector.load %arg3[%c15, %c0_65] : memref<32x128xf32, #tpu.memory_space<vmem>>, vector<1x32xf32>
    %258 = arith.addf %256, %257 : vector<1x32xf32>
    %259 = vector.broadcast %258 : vector<1x32xf32> to vector<16x32xf32>
    %260 = arith.addf %253, %259 : vector<16x32xf32>
    %c18 = arith.constant 18 : index
    %c0_66 = arith.constant 0 : index
    %261 = vector.load %arg3[%c18, %c0_66] : memref<32x128xf32, #tpu.memory_space<vmem>>, vector<1x32xf32>
    %c19 = arith.constant 19 : index
    %c0_67 = arith.constant 0 : index
    %262 = vector.load %arg3[%c19, %c0_67] : memref<32x128xf32, #tpu.memory_space<vmem>>, vector<1x32xf32>
    %cst_68 = arith.constant dense<0.000000e+00> : vector<16xf32>
    %263 = vector.multi_reduction <add>, %260, %cst_68 [1] : vector<16x32xf32> to vector<16xf32>
    %264 = vector.shape_cast %263 : vector<16xf32> to vector<16x1xf32>
    %cst_69 = arith.constant 3.200000e+01 : f32
    %265 = vector.broadcast %cst_69 : f32 to vector<16x1xf32>
    %266 = arith.divf %264, %265 : vector<16x1xf32>
    %267 = vector.broadcast %266 : vector<16x1xf32> to vector<16x32xf32>
    %268 = arith.subf %260, %267 : vector<16x32xf32>
    %269 = arith.mulf %268, %268 : vector<16x32xf32>
    %cst_70 = arith.constant dense<0.000000e+00> : vector<16xf32>
    %270 = vector.multi_reduction <add>, %269, %cst_70 [1] : vector<16x32xf32> to vector<16xf32>
    %271 = vector.shape_cast %270 : vector<16xf32> to vector<16x1xf32>
    %cst_71 = arith.constant 3.200000e+01 : f32
    %272 = vector.broadcast %cst_71 : f32 to vector<16x1xf32>
    %273 = arith.divf %271, %272 : vector<16x1xf32>
    %cst_72 = arith.constant 9.99999974E-6 : f32
    %274 = vector.broadcast %cst_72 : f32 to vector<16x1xf32>
    %275 = arith.addf %273, %274 : vector<16x1xf32>
    %276 = math.rsqrt %275 : vector<16x1xf32>
    %277 = vector.broadcast %276 : vector<16x1xf32> to vector<16x32xf32>
    %278 = arith.mulf %268, %277 : vector<16x32xf32>
    %279 = vector.broadcast %261 : vector<1x32xf32> to vector<16x32xf32>
    %280 = arith.mulf %278, %279 : vector<16x32xf32>
    %281 = vector.broadcast %262 : vector<1x32xf32> to vector<16x32xf32>
    %282 = arith.addf %280, %281 : vector<16x32xf32>
    %c0_73 = arith.constant 0 : index
    %c896 = arith.constant 896 : index
    %283 = vector.load %arg1[%c0_73, %c896] : memref<32x1152xf32, #tpu.memory_space<vmem>>, vector<32x64xf32>
    %cst_74 = arith.constant dense<0.000000e+00> : vector<16x64xf32>
    %284 = tpu.matmul %282, %283, %cst_74 {dimension_numbers = #tpu.dot_dimension_numbers<[1], [0], [0], [1], [0, 0, 1, 1], [], []>} : vector<16x32xf32>, vector<32x64xf32>, vector<16x64xf32> -> vector<16x64xf32>
    %c22 = arith.constant 22 : index
    %c0_75 = arith.constant 0 : index
    %285 = vector.load %arg3[%c22, %c0_75] : memref<32x128xf32, #tpu.memory_space<vmem>>, vector<1x64xf32>
    %286 = vector.broadcast %285 : vector<1x64xf32> to vector<16x64xf32>
    %287 = arith.addf %284, %286 : vector<16x64xf32>
    %cst_76 = arith.constant 0.000000e+00 : f32
    %288 = vector.broadcast %cst_76 : f32 to vector<16x64xf32>
    %289 = arith.maximumf %287, %288 : vector<16x64xf32>
    %c0_77 = arith.constant 0 : index
    %c128_78 = arith.constant 128 : index
    %290 = vector.load %arg2[%c0_77, %c128_78] : memref<64x256xf32, #tpu.memory_space<vmem>>, vector<64x32xf32>
    %cst_79 = arith.constant dense<0.000000e+00> : vector<16x32xf32>
    %291 = tpu.matmul %289, %290, %cst_79 {dimension_numbers = #tpu.dot_dimension_numbers<[1], [0], [0], [1], [0, 0, 1, 1], [], []>} : vector<16x64xf32>, vector<64x32xf32>, vector<16x32xf32> -> vector<16x32xf32>
    %c23 = arith.constant 23 : index
    %c0_80 = arith.constant 0 : index
    %292 = vector.load %arg3[%c23, %c0_80] : memref<32x128xf32, #tpu.memory_space<vmem>>, vector<1x32xf32>
    %293 = vector.broadcast %292 : vector<1x32xf32> to vector<16x32xf32>
    %294 = arith.addf %291, %293 : vector<16x32xf32>
    %295 = arith.addf %282, %294 : vector<16x32xf32>
    %c20 = arith.constant 20 : index
    %c0_81 = arith.constant 0 : index
    %296 = vector.load %arg3[%c20, %c0_81] : memref<32x128xf32, #tpu.memory_space<vmem>>, vector<1x32xf32>
    %c21 = arith.constant 21 : index
    %c0_82 = arith.constant 0 : index
    %297 = vector.load %arg3[%c21, %c0_82] : memref<32x128xf32, #tpu.memory_space<vmem>>, vector<1x32xf32>
    %cst_83 = arith.constant dense<0.000000e+00> : vector<16xf32>
    %298 = vector.multi_reduction <add>, %295, %cst_83 [1] : vector<16x32xf32> to vector<16xf32>
    %299 = vector.shape_cast %298 : vector<16xf32> to vector<16x1xf32>
    %cst_84 = arith.constant 3.200000e+01 : f32
    %300 = vector.broadcast %cst_84 : f32 to vector<16x1xf32>
    %301 = arith.divf %299, %300 : vector<16x1xf32>
    %302 = vector.broadcast %301 : vector<16x1xf32> to vector<16x32xf32>
    %303 = arith.subf %295, %302 : vector<16x32xf32>
    %304 = arith.mulf %303, %303 : vector<16x32xf32>
    %cst_85 = arith.constant dense<0.000000e+00> : vector<16xf32>
    %305 = vector.multi_reduction <add>, %304, %cst_85 [1] : vector<16x32xf32> to vector<16xf32>
    %306 = vector.shape_cast %305 : vector<16xf32> to vector<16x1xf32>
    %cst_86 = arith.constant 3.200000e+01 : f32
    %307 = vector.broadcast %cst_86 : f32 to vector<16x1xf32>
    %308 = arith.divf %306, %307 : vector<16x1xf32>
    %cst_87 = arith.constant 9.99999974E-6 : f32
    %309 = vector.broadcast %cst_87 : f32 to vector<16x1xf32>
    %310 = arith.addf %308, %309 : vector<16x1xf32>
    %311 = math.rsqrt %310 : vector<16x1xf32>
    %312 = vector.broadcast %311 : vector<16x1xf32> to vector<16x32xf32>
    %313 = arith.mulf %303, %312 : vector<16x32xf32>
    %314 = vector.broadcast %296 : vector<1x32xf32> to vector<16x32xf32>
    %315 = arith.mulf %313, %314 : vector<16x32xf32>
    %316 = vector.broadcast %297 : vector<1x32xf32> to vector<16x32xf32>
    %317 = arith.addf %315, %316 : vector<16x32xf32>
    %c0_88 = arith.constant 0 : index
    %c1024 = arith.constant 1024 : index
    %318 = vector.load %arg1[%c0_88, %c1024] : memref<32x1152xf32, #tpu.memory_space<vmem>>, vector<32x8xf32>
    %cst_89 = arith.constant dense<0.000000e+00> : vector<16x8xf32>
    %319 = tpu.matmul %317, %318, %cst_89 {dimension_numbers = #tpu.dot_dimension_numbers<[1], [0], [0], [1], [0, 0, 1, 1], [], []>} : vector<16x32xf32>, vector<32x8xf32>, vector<16x8xf32> -> vector<16x8xf32>
    %c24 = arith.constant 24 : index
    %c0_90 = arith.constant 0 : index
    %320 = vector.load %arg3[%c24, %c0_90] : memref<32x128xf32, #tpu.memory_space<vmem>>, vector<1x8xf32>
    %321 = vector.broadcast %320 : vector<1x8xf32> to vector<16x8xf32>
    %322 = arith.addf %319, %321 : vector<16x8xf32>
    %323 = vector.shape_cast %322 : vector<16x8xf32> to vector<2x8x8xf32>
    %324 = tpu.iota {dimensions = array<i32: 0>} : vector<8x8xi32>
    %325 = tpu.iota {dimensions = array<i32: 1>} : vector<8x8xi32>
    %326 = arith.cmpi sgt, %325, %324 : vector<8x8xi32>
    %327 = vector.shape_cast %326 : vector<8x8xi1> to vector<1x8x8xi1>
    %cst_91 = arith.constant 0.000000e+00 : f32
    %328 = vector.shape_cast %327 : vector<1x8x8xi1> to vector<1x8x8xi1>
    %329 = vector.broadcast %328 : vector<1x8x8xi1> to vector<2x8x8xi1>
    %330 = vector.broadcast %cst_91 : f32 to vector<2x8x8xf32>
    %331 = arith.select %329, %323, %330 : vector<2x8x8xi1>, vector<2x8x8xf32>
    %cst_92 = arith.constant 0.000000e+00 : f32
    %332 = vector.broadcast %cst_92 : f32 to vector<2x8x8xf32>
    %333 = arith.subf %332, %331 : vector<2x8x8xf32>
    %334 = math.exp %333 : vector<2x8x8xf32>
    %cst_93 = arith.constant 1.000000e+00 : f32
    %335 = vector.broadcast %cst_93 : f32 to vector<2x8x8xf32>
    %336 = arith.addf %335, %334 : vector<2x8x8xf32>
    %337 = tpu.reciprocal %336 {approx = true} : vector<2x8x8xf32> -> vector<2x8x8xf32>
    %338 = tpu.transpose %337, [0, 2, 1] : vector<2x8x8xf32> -> vector<2x8x8xf32>
    %339 = arith.addf %337, %338 : vector<2x8x8xf32>
    %cst_94 = arith.constant 5.000000e-01 : f32
    %340 = vector.broadcast %cst_94 : f32 to vector<2x8x8xf32>
    %341 = arith.mulf %340, %339 : vector<2x8x8xf32>
    %c0_95 = arith.constant 0 : index
    %c0_96 = arith.constant 0 : index
    %c0_97 = arith.constant 0 : index
    %342 = vector.load %arg4[%c0_95, %c0_96, %c0_97] : memref<2x8x8xf32, #tpu.memory_space<vmem>>, vector<2x8x8xf32>
    tpu.vector_store %arg4[%c0_95, %c0_96, %c0_97], %341 {strides = array<i32>} : memref<2x8x8xf32, #tpu.memory_space<vmem>>, vector<2x8x8xf32>,
    return
  }
}

</mosaic_0001>

<bundles_post_ra>
// kernel: autoregressive_decoder.1
= control target key start
LH: loop header
LB: loop body
LE: loop exit
PB: predicated region body
PF: predicated region fallthrough
CT: control target
= control target key end

     0   :  { %9 = vsyncpa [#allocation3], 0  ;;  %s5175_s0 = inlined_call_operand.hbm [shape: f32[2,32], index: 0, kind: input, shape index: {}]   ;;  %s5176_s1 = inlined_call_operand.hbm [shape: f32[32,1152], index: 1, kind: input, shape index: {}]   ;;  %s5177_s2 = inlined_call_operand.hbm [shape: f32[64,256], index: 2, kind: input, shape index: {}]   ;;  %s5178_s3 = inlined_call_operand.hbm [shape: f32[32,128], index: 3, kind: input, shape index: {}]   ;;  %s5179_s4 = inlined_call_operand.hbm [shape: f32[2,8,8], index: 4, kind: output, shape index: {}]  }
   0x1   :  { %10 = vsyncpa [#allocation6], 0 }
   0x2   :  { %11 = vsyncpa [#allocation9], 0 }
   0x3   :  { %12 = vsyncpa [#allocation4], 0  ;;  %s4026_s15 = smov [#allocation5]  }
   0x4   :  { %s28_s16 = sshll.u32 %s4026_s15, 4  ;;  %s29_s16 = int_to_ptr.vmem [resolvable:$true] %s28_s16 }
   0x5   :  { %s3926_s17 = scalar_lea.vmem %s29_s16, 4608  ;;  %p3931_p1 = scmp.lt.s32.totalorder %s29_s16, %s29_s16 }
   0x6   :  { %p3927_p0 = scmp.ne.s32.totalorder %s29_s16, %s3926_s17  ;;  %p3932_p2 = scmp.lt.s32.totalorder %s3926_s17, %s3926_s17 }
   0x8   :  { %p3933_p3 = por %p3932_p2, %p3931_p1 }
   0xa   :  { %p3934_p4 = pnand %p3933_p3, %p3927_p0 }
   0xc   :  { %3937 = shalt.err (!%p3934_p4)
}
   0xd   :  { %s4027_s18 = smov 1152   ;;  %s4028_s19 = smov 72  }
   0xe   :  { %34 = dma.hbm_to_vmem [thread:$0]  %s5176_s1, 4608, %s29_s16, [#allocation6], %s4027_s18, %s4027_s18, %s4028_s19  }
   0xf   :  { %s4029_s22 = smov [#allocation2]   ;;  %s4030_s24 = smov [#allocation7]  }
  0x10   :  { %s19_s23 = sshll.u32 %s4029_s22, 4  ;;  %s40_s25 = sshll.u32 %s4030_s24, 4  ;;  %s20_s23 = int_to_ptr.vmem [resolvable:$true] %s19_s23  ;;  %s41_s25 = int_to_ptr.vmem [resolvable:$true] %s40_s25 }
  0x11   :  { %s3946_s26 = scalar_lea.vmem %s20_s23, 32  ;;  %p3951_p6 = scmp.lt.s32.totalorder %s20_s23, %s20_s23 }
  0x12   :  { %p3947_p5 = scmp.ne.s32.totalorder %s20_s23, %s3946_s26  ;;  %p3952_p7 = scmp.lt.s32.totalorder %s3946_s26, %s3946_s26 }
  0x14   :  { %p3953_p8 = por %p3952_p7, %p3951_p6 }
  0x16   :  { %p3954_p9 = pnand %p3953_p8, %p3947_p5 }
  0x18   :  { %3957 = shalt.err (!%p3954_p9)
}
  0x19   :  { %22 = dma.hbm_to_vmem [thread:$0]  %s5175_s0, 32, %s20_s23, [#allocation3]  }
  0x1a   :  { %s3966_s29 = scalar_lea.vmem %s41_s25, 2048  ;;  %p3971_p11 = scmp.lt.s32.totalorder %s41_s25, %s41_s25 }
  0x1b   :  { %p3967_p10 = scmp.ne.s32.totalorder %s41_s25, %s3966_s29  ;;  %p3972_p12 = scmp.lt.s32.totalorder %s3966_s29, %s3966_s29 }
  0x1d   :  { %p3973_p13 = por %p3972_p12, %p3971_p11 }
  0x1f   :  { %p3974_p0 = pnand %p3973_p13, %p3967_p10 }
  0x21   :  { %3977 = shalt.err (!%p3974_p0)
}
  0x22   :  { %s4031_s1 = smov 256   ;;  %s4032_s30 = smov 16  }
  0x23   :  { %46 = dma.hbm_to_vmem [thread:$0]  %s5177_s2, 2048, %s41_s25, [#allocation6], %s4031_s1, %s4031_s1, %s4032_s30  }
  0x24   :  { %s4033_s7 = smov [#allocation8]  }
  0x25   :  { %s52_s8 = sshll.u32 %s4033_s7, 4  ;;  %s53_s8 = int_to_ptr.vmem [resolvable:$true] %s52_s8 }
  0x26   :  { %s3986_s9 = scalar_lea.vmem %s53_s8, 512  ;;  %p3991_p2 = scmp.lt.s32.totalorder %s53_s8, %s53_s8 }
  0x27   :  { %p3987_p1 = scmp.ne.s32.totalorder %s53_s8, %s3986_s9  ;;  %p3992_p3 = scmp.lt.s32.totalorder %s3986_s9, %s3986_s9 }
  0x29   :  { %p3993_p4 = por %p3992_p3, %p3991_p2 }
  0x2b   :  { %p3994_p5 = pnand %p3993_p4, %p3987_p1 }
  0x2d   :  { %3997 = shalt.err (!%p3994_p5)
}
  0x2e   :  { %s4034_s0 = smov 128   ;;  %s4035_s10 = smov 8  }
  0x2f   :  { %58 = dma.hbm_to_vmem [thread:$0]  %s5178_s3, 512, %s53_s8, [#allocation9], %s4034_s0, %s4034_s0, %s4035_s10  }
  0x30   :  { %4018 = dma.done.wait [#allocation3], 32  }
  0x31   :  { %4019 = vsyncadd [#allocation3], 4294967264 }
  0x32   :  { %4020 = dma.done.wait [#allocation6], 6656  }
  0x33   :  { %4021 = vsyncadd [#allocation6], 4294960640 }
  0x34   :  { %4022 = dma.done.wait [#allocation9], 512  }
  0x35   :  { %4023 = vsyncadd [#allocation9], 4294966784  ;;  %v5180_v0 = vlaneseq  ;;  %v83_v3 = vld [vmem:[#allocation5 + $0xd8] sm:$0xff]  ;;  %v82_v4 = vld [vmem:[#allocation5 + $0x90] sm:$0xff]  ;;  %vm89_vm0 = vcmask 261120   ;;  %s4036_s2 = smov 120  }
  0x36   :  { %3536 = vmatprep.subr.mxu0 %v83_v3  ;;  %v71_v5 = vld [vmem:[#allocation2] sm:$0x3]  ;;  %v81_v7 = vld [vmem:[#allocation5 + $0x48] sm:$0xff]  ;;  %v80_v9 = vld [vmem:[#allocation5] sm:$0xff]  ;;  %v5182_v16 = vmov 0.0   ;;  %s4038_s3 = smov 104  }
  0x37   :  { %v4089_v1 = vshrl.u32 %v5180_v0, 7  ;;  %3537 = vmatpush3.msra.mxu0 %v83_v3  ;;  %v3423_v11 = vld [vmem:[#allocation8] ss:$0 sm:$0xff]  ;;  %s4039_s13 = smov 112   ;;  %s4040_s14 = smov 64   ;;  %vm655_vm1 = vcmask 60416  }
  0x38   :  { %3538 = vmatprep.subr.mxu0 %v82_v4  ;;  %s4041_s15 = smov 96   ;;  %v4042_v23 = vmov 1983009808   ;;  %v4043_v29 = vmov 1934713408   ;;  %s4044_s16 = smov 24  }
  0x39   :  { %5186 = vst [vmem:[#allocation15_spill] sm:$0xff] %v4089_v1  ;;  %v4092_v2 = vsub.s32 0, %v4089_v1  ;;  %v78_v6 = vsub.s32 1, %v4089_v1  ;;  %3539 = vmatpush3.msra.mxu0 %v82_v4  ;;  %v184_v24 = vunpack.c.l.s4 %v4042_v23  ;;  %v216_v30 = vunpack.c.l.s4 %v4043_v29  ;;  %s4046_s17 = smov [#allocation10]  }
  0x3a   :  { %3540 = vmatprep.subr.mxu0 %v81_v7  ;;  %vm1040_vm2 = vcmask 64512   ;;  %vm1042_vm3 = vcmask 130048   ;;  %vm1044_vm4 = vcmask 195584   ;;  %vm4045_vm5 = vmmov 0   ;;  %s3409_s18 = sshll.u32 %s4046_s17, 4  ;;  %s3410_s18 = int_to_ptr.vmem [resolvable:$true] %s3409_s18 }
  0x3b   :  { %5187 = vst [vmem:[#allocation16_spill] sm:$0xff] %v4092_v2  ;;  %v4096_v8 = vrot.slane %v71_v5, %v4092_v2  ;;  %v4100_v10 = vrot.slane %v71_v5, %v78_v6  ;;  %3541 = vmatpush3.msra.mxu0 %v81_v7  ;;  %v185_v27 = vunpack.c.0.s8 %v184_v24  ;;  %v217_v36 = vunpack.c.0.s8 %v216_v30  ;;  %s3998_s19 = scalar_lea.vmem %s3410_s18, 256  ;;  %p4003_p7 = scmp.lt.s32.totalorder %s3410_s18, %s3410_s18 }
  0x3c   :  { %3542 = vmatprep.subr.mxu0 %v80_v9  ;;  %vm1532_vm6 = vcmask 523264   ;;  %p3999_p6 = scmp.ne.s32.totalorder %s3410_s18, %s3998_s19  ;;  %p4004_p8 = scmp.lt.s32.totalorder %s3998_s19, %s3998_s19 }
  0x3d   :  { %3544 = vmatprep.mubr.msk.f32.mxu0 %vm89_vm0, %v4096_v8  ;;  %3543 = vmatpush3.msra.mxu0 %v80_v9  ;;  %v4150_v33 = vsub.s32 %v185_v27, %v4089_v1  ;;  %v4160_v46 = vsub.s32 %v217_v36, %v4089_v1 }
  0x3e   :  { %3545 = vmatmul.mubr.msk.f32.vlgmr.msra.gmra.mxu0 %vm89_vm0, %v4100_v10  ;;  %3558 = vmatprep.subr.mxu0 %v5182_v16  ;;  %p4005_p9 = por %p4004_p8, %p4003_p7 }
  0x40   :  { %p4006_p10 = pnand %p4005_p9, %p3999_p6 }
  0xfe   :  { %v3546_v12 = vpop.f32.mrf.mxu0 }
  0xff   :  { %v4104_v13 = vadd.f32 %v3546_v12, %v3423_v11 }
 0x100   :  { %v162_v14 = vpop.f32.mrf.mxu0 }
 0x101   :  { %v163_v15 = vadd.f32 %v3423_v11, %v162_v14  ;;  %250 = vrot.lane.b32.xlu1 %v4104_v13, %s4036_s2 }
 0x103   :  { %172 = vrot.lane.b32.xlu0 %v163_v15, %s4036_s2 }
 0x105   :  { %178 = vrot.lane.b32.xlu1 %v163_v15, %s4038_s3 }
 0x107   :  { %175 = vrot.lane.b32.xlu0 %v163_v15, %s4039_s13 }
 0x109   :  { %256 = vrot.lane.b32.xlu1 %v4104_v13, %s4038_s3 }
 0x10b   :  { %253 = vrot.lane.b32.xlu0 %v4104_v13, %s4039_s13 }
 0x10d   :  { %487 = vrot.lane.b32.xlu1 %v163_v15, %s4040_s14 }
 0x10f   :  { %407 = vrot.lane.b32.xlu0 %v4104_v13, %s4041_s15 }
 0x113   :  { %327 = vrot.lane.b32.xlu0 %v163_v15, %s4041_s15 }
 0x173   :  { %v4120_v17 = vpop.permute.xlu1 %250 }
 0x174   :  { %409 = vrot.lane.b32.xlu1 %v4120_v17, %s4041_s15 }
 0x175   :  { %v4124_v18 = vpop.permute.xlu0 %172 }
 0x177   :  { %v4126_v19 = vpop.permute.xlu1 %178 }
 0x178   :  { %v197_v34 = vcombine.low %v4124_v18, %v4126_v19  ;;  %v198_v50 = vcombine.high %v4124_v18, %v4126_v19 }
 0x179   :  { %v4128_v20 = vpop.permute.xlu0 %175 }
 0x17a   :  { %v181_v31 = vcombine.low %v163_v15, %v4128_v20  ;;  %v205_v40 = vrot.slane %v197_v34, %v4150_v33  ;;  %v182_v43 = vcombine.high %v163_v15, %v4128_v20  ;;  %v212_v63 = vrot.slane %v198_v50, %v4150_v33 }
 0x17b   :  { %v4130_v21 = vpop.permute.xlu1 %256 }
 0x17c   :  { %413 = vrot.lane.b32.xlu1 %v4130_v21, %s4041_s15  ;;  %v189_v37 = vrot.slane %v181_v31, %v4150_v33  ;;  %v196_v55 = vrot.slane %v182_v43, %v4150_v33  ;;  %v275_v14 = vcombine.low %v4120_v17, %v4130_v21  ;;  %v276_v50 = vcombine.high %v4120_v17, %v4130_v21 }
 0x17d   :  { %v4134_v22 = vpop.permute.xlu0 %253 }
 0x17e   :  { %411 = vrot.lane.b32.xlu0 %v4134_v22, %s4041_s15  ;;  %v213_v49 = vcombine.low %v189_v37, %v205_v40  ;;  %v214_v59 = vcombine.high %v189_v37, %v205_v40  ;;  %v259_v9 = vcombine.low %v4104_v13, %v4134_v22  ;;  %v229_v12 = vcombine.low %v196_v55, %v212_v63 }
 0x17f   :  { %v4144_v25 = vpop.permute.xlu1 %487  ;;  %v283_v37 = vrot.slane %v275_v14, %v4150_v33 }
 0x180   :  { %329 = vrot.lane.b32.xlu1 %v4124_v18, %s4041_s15  ;;  %v221_v61 = vrot.slane %v213_v49, %v4160_v46  ;;  %v228_v11 = vrot.slane %v214_v59, %v4160_v46  ;;  %v267_v31 = vrot.slane %v259_v9, %v4150_v33  ;;  %v4198_v34 = vrot.slane %v229_v12, %v4160_v46 }
 0x181   :  { %v408_v26 = vpop.permute.xlu0 %407 }
 0x182   :  { %331 = vrot.lane.b32.xlu0 %v4128_v20, %s4041_s15  ;;  %v4214_v49 = vcombine.high %v221_v61, %v5182_v16 }
 0x184   :  { %333 = vrot.lane.b32.xlu1 %v4126_v19, %s4041_s15 }
 0x185   :  { %v4147_v32 = vpop.permute.xlu0 %327 }
 0x1e6   :  { %v410_v28 = vpop.permute.xlu1 %409 }
 0x1ee   :  { %v414_v35 = vpop.permute.xlu1 %413 }
 0x1ef   :  { %v435_v38 = vcombine.low %v410_v28, %v414_v35  ;;  %v436_v44 = vcombine.high %v410_v28, %v414_v35  ;;  %v230_v35 = vcombine.high %v196_v55, %v212_v63  ;;  %v290_v63 = vrot.slane %v276_v50, %v4150_v33 }
 0x1f0   :  { %v412_v39 = vpop.permute.xlu0 %411 }
 0x1f1   :  { %v419_v41 = vcombine.low %v408_v26, %v412_v39  ;;  %v420_v42 = vcombine.high %v408_v26, %v412_v39  ;;  %v443_v47 = vrot.slane %v435_v38, %v4150_v33  ;;  %v450_v56 = vrot.slane %v436_v44, %v4150_v33 }
 0x1f2   :  { %v4157_v45 = vpop.permute.xlu1 %329  ;;  %v260_v44 = vcombine.high %v4104_v13, %v4134_v22 }
 0x1f3   :  { %v427_v48 = vrot.slane %v419_v41, %v4150_v33  ;;  %v434_v51 = vrot.slane %v420_v42, %v4150_v33 }
 0x1f4   :  { %v4167_v52 = vpop.permute.xlu0 %331 }
 0x1f5   :  { %v451_v53 = vcombine.low %v427_v48, %v443_v47  ;;  %v452_v54 = vcombine.high %v427_v48, %v443_v47  ;;  %v339_v57 = vcombine.low %v4147_v32, %v4167_v52  ;;  %v467_v3 = vcombine.low %v434_v51, %v450_v56 }
 0x1f6   :  { %v4173_v58 = vpop.permute.xlu1 %333  ;;  %v468_v24 = vcombine.high %v434_v51, %v450_v56  ;;  %v4211_v47 = vrot.slane %v230_v35, %v4160_v46  ;;  %v291_v48 = vcombine.low %v267_v31, %v283_v37  ;;  %v340_v14 = vcombine.high %v4147_v32, %v4167_v52 }
 0x1f7   :  { %v355_v60 = vcombine.low %v4157_v45, %v4173_v58  ;;  %v459_v62 = vrot.slane %v451_v53, %v4160_v46  ;;  %v466_v4 = vrot.slane %v452_v54, %v4160_v46  ;;  %v347_v5 = vrot.slane %v339_v57, %v4150_v33 }
 0x1f8   :  { %v475_v28 = vrot.slane %v467_v3, %v4160_v46  ;;  %v482_v40 = vrot.slane %v468_v24, %v4160_v46  ;;  %v274_v57 = vrot.slane %v260_v44, %v4150_v33  ;;  %v299_v59 = vrot.slane %v291_v48, %v4160_v46 }
 0x1f9   :  { %v363_v6 = vrot.slane %v355_v60, %v4150_v33  ;;  %v680_v7 = vmul.f32 %v459_v62, %v221_v61  ;;  %v682_v27 = vmul.f32 %v466_v4, %v228_v11  ;;  %v483_v43 = vcombine.high %v459_v62, %v5182_v16 }
 0x1fa   :  { %v684_v39 = vmul.f32 %v475_v28, %v4198_v34  ;;  %v686_v53 = vmul.f32 %v482_v40, %v4211_v47  ;;  %v484_v56 = vcombine.high %v466_v4, %v5182_v16  ;;  %v292_v60 = vcombine.high %v267_v31, %v283_v37 }
 0x1fb   :  { %v371_v15 = vcombine.low %v347_v5, %v363_v6  ;;  %v372_v23 = vcombine.high %v347_v5, %v363_v6  ;;  %v688_v26 = vsel %vm655_vm1, %v680_v7, 0.0  ;;  %v694_v38 = vsel %vm655_vm1, %v682_v27, 0.0 }
 0x1fc   :  { %689 = vadd.xlane.f32.xlu1 %v688_v26  ;;  %v700_v51 = vsel %vm655_vm1, %v684_v39, 0.0  ;;  %v681_v55 = vmul.f32 %v483_v43, %v4214_v49  ;;  %v356_v3 = vcombine.high %v4157_v45, %v4173_v58  ;;  %v706_v5 = vsel %vm655_vm1, %v686_v53, 0.0 }
 0x1fd   :  { %v4191_v29 = vrot.slane %v371_v15, %v4160_v46  ;;  %v4194_v30 = vrot.slane %v372_v23, %v4160_v46  ;;  %v744_v6 = vmul.f32 %v459_v62, %v299_v59  ;;  %v485_v12 = vcombine.high %v475_v28, %v5182_v16 }
 0x1fe   :  { %v691_v7 = vsel %vm655_vm1, %v681_v55, 0.0  ;;  %v307_v15 = vcombine.low %v274_v57, %v290_v63  ;;  %v4240_v45 = vcombine.high %v4198_v34, %v5182_v16  ;;  %v370_v58 = vrot.slane %v356_v3, %v4150_v33 }
 0x1ff   :  { %v647_v36 = vmul.f32 %v4191_v29, %v221_v61  ;;  %v649_v42 = vmul.f32 %v4194_v30, %v228_v11  ;;  %v4226_v61 = vcombine.high %v228_v11, %v5182_v16  ;;  %v306_v11 = vrot.slane %v292_v60, %v4160_v46 }
 0x200   :  { %695 = vadd.xlane.f32.xlu1 %v694_v38  ;;  %v752_v62 = vsel %vm655_vm1, %v744_v6, 0.0  ;;  %v685_v26 = vmul.f32 %v485_v12, %v4240_v45  ;;  %v486_v32 = vcombine.high %v482_v40, %v5182_v16  ;;  %v354_v52 = vrot.slane %v340_v14, %v4150_v33 }
 0x201   :  { %v656_v41 = vsel %vm655_vm1, %v647_v36, 0.0  ;;  %v662_v54 = vsel %vm655_vm1, %v649_v42, 0.0  ;;  %v683_v9 = vmul.f32 %v484_v56, %v4226_v61  ;;  %v746_v23 = vmul.f32 %v466_v4, %v306_v11 }
 0x202   :  { %657 = vadd.xlane.f32.xlu0 %v656_v41  ;;  %v315_v27 = vrot.slane %v307_v15, %v4160_v46  ;;  %v308_v31 = vcombine.high %v274_v57, %v290_v63  ;;  %v248_v35 = vcombine.high %v4211_v47, %v5182_v16  ;;  %v387_v36 = vcombine.low %v354_v52, %v370_v58 }
 0x203   :  { %v697_v24 = vsel %vm655_vm1, %v683_v9, 0.0  ;;  %v758_v37 = vsel %vm655_vm1, %v746_v23, 0.0  ;;  %v703_v38 = vsel %vm655_vm1, %v685_v26, 0.0  ;;  %v323_v42 = vcombine.high %v299_v59, %v5182_v16 }
 0x204   :  { %701 = vadd.xlane.f32.xlu1 %v700_v51  ;;  %v748_v4 = vmul.f32 %v475_v28, %v315_v27  ;;  %v687_v39 = vmul.f32 %v486_v32, %v248_v35  ;;  %v322_v41 = vrot.slane %v308_v31, %v4160_v46  ;;  %v388_v44 = vcombine.high %v354_v52, %v370_v58 }
 0x205   :  { %v395_v51 = vrot.slane %v387_v36, %v4160_v46  ;;  %v324_v28 = vcombine.high %v306_v11, %v5182_v16  ;;  %v712_v14 = vmul.f32 %v4191_v29, %v299_v59  ;;  %v404_v58 = vcombine.high %v4194_v30, %v5182_v16 }
 0x206   :  { %663 = vadd.xlane.f32.xlu0 %v662_v54  ;;  %v764_v48 = vsel %vm655_vm1, %v748_v4, 0.0  ;;  %v750_v50 = vmul.f32 %v482_v40, %v322_v41  ;;  %v709_v53 = vsel %vm655_vm1, %v687_v39, 0.0  ;;  %v745_v54 = vmul.f32 %v483_v43, %v323_v42 }
 0x207   :  { %v651_v57 = vmul.f32 %v395_v51, %v4198_v34  ;;  %v402_v60 = vrot.slane %v388_v44, %v4160_v46  ;;  %v747_v3 = vmul.f32 %v484_v56, %v324_v28  ;;  %v325_v40 = vcombine.high %v315_v27, %v5182_v16 }
 0x208   :  { %707 = vadd.xlane.f32.xlu1 %v706_v5  ;;  %v770_v55 = vsel %vm655_vm1, %v750_v50, 0.0  ;;  %v755_v63 = vsel %vm655_vm1, %v745_v54, 0.0  ;;  %v326_v34 = vcombine.high %v322_v41, %v5182_v16  ;;  %v650_v23 = vmul.f32 %v404_v58, %v4226_v61 }
 0x209   :  { %v668_v5 = vsel %vm655_vm1, %v651_v57, 0.0  ;;  %v653_v43 = vmul.f32 %v402_v60, %v4211_v47  ;;  %v761_v6 = vsel %vm655_vm1, %v747_v3, 0.0  ;;  %v720_v47 = vsel %vm655_vm1, %v712_v14, 0.0 }
 0x20a   :  { %692 = vadd.xlane.f32.xlu0 %v691_v7  ;;  %v749_v7 = vmul.f32 %v485_v12, %v325_v40  ;;  %v751_v15 = vmul.f32 %v486_v32, %v326_v34  ;;  %v716_v26 = vmul.f32 %v395_v51, %v315_v27  ;;  %v665_v32 = vsel %vm655_vm1, %v650_v23, 0.0 }
 0x20b   :  { %v674_v9 = vsel %vm655_vm1, %v653_v43, 0.0  ;;  %v406_v31 = vcombine.high %v402_v60, %v5182_v16  ;;  %v403_v61 = vcombine.high %v4191_v29, %v5182_v16  ;;  %v715_v29 = vmul.f32 %v404_v58, %v324_v28 }
 0x20c   :  { %753 = vadd.xlane.f32.xlu1 %v752_v62  ;;  %v767_v56 = vsel %vm655_vm1, %v749_v7, 0.0  ;;  %v714_v62 = vmul.f32 %v4194_v30, %v306_v11  ;;  %v773_v12 = vsel %vm655_vm1, %v751_v15, 0.0  ;;  %v732_v30 = vsel %vm655_vm1, %v716_v26, 0.0 }
 0x20d   :  { %v718_v11 = vmul.f32 %v402_v60, %v322_v41  ;;  %v648_v4 = vmul.f32 %v403_v61, %v4214_v49  ;;  %v729_v44 = vsel %vm655_vm1, %v715_v29, 0.0  ;;  %v719_v50 = vmul.f32 %v406_v31, %v326_v34 }
 0x20e   :  { %698 = vadd.xlane.f32.xlu0 %v697_v24  ;;  %v405_v24 = vcombine.high %v395_v51, %v5182_v16  ;;  %v726_v59 = vsel %vm655_vm1, %v714_v62, 0.0 }
 0x20f   :  { %v738_v27 = vsel %vm655_vm1, %v718_v11, 0.0  ;;  %v659_v39 = vsel %vm655_vm1, %v648_v4, 0.0  ;;  %v741_v49 = vsel %vm655_vm1, %v719_v50, 0.0 }
 0x210   :  { %759 = vadd.xlane.f32.xlu1 %v758_v37  ;;  %v652_v52 = vmul.f32 %v405_v24, %v4240_v45  ;;  %v654_v37 = vmul.f32 %v406_v31, %v248_v35  ;;  %v717_v35 = vmul.f32 %v405_v24, %v325_v40 }
 0x212   :  { %704 = vadd.xlane.f32.xlu0 %v703_v38  ;;  %v671_v36 = vsel %vm655_vm1, %v652_v52, 0.0  ;;  %v677_v45 = vsel %vm655_vm1, %v654_v37, 0.0  ;;  %v713_v38 = vmul.f32 %v403_v61, %v323_v42 }
 0x214   :  { %765 = vadd.xlane.f32.xlu1 %v764_v48  ;;  %v723_v41 = vsel %vm655_vm1, %v713_v38, 0.0  ;;  %v735_v48 = vsel %vm655_vm1, %v717_v35, 0.0 }
 0x216   :  { %710 = vadd.xlane.f32.xlu0 %v709_v53 }
 0x218   :  { %771 = vadd.xlane.f32.xlu1 %v770_v55 }
 0x21a   :  { %756 = vadd.xlane.f32.xlu0 %v755_v63 }
 0x21c   :  { %669 = vadd.xlane.f32.xlu1 %v668_v5 }
 0x21e   :  { %762 = vadd.xlane.f32.xlu0 %v761_v6 }
 0x220   :  { %675 = vadd.xlane.f32.xlu1 %v674_v9 }
 0x222   :  { %768 = vadd.xlane.f32.xlu0 %v767_v56 }
 0x224   :  { %721 = vadd.xlane.f32.xlu1 %v720_v47 }
 0x226   :  { %774 = vadd.xlane.f32.xlu0 %v773_v12 }
 0x228   :  { %727 = vadd.xlane.f32.xlu1 %v726_v59 }
 0x22a   :  { %666 = vadd.xlane.f32.xlu0 %v665_v32 }
 0x22c   :  { %733 = vadd.xlane.f32.xlu1 %v732_v30 }
 0x22e   :  { %672 = vadd.xlane.f32.xlu0 %v671_v36 }
 0x230   :  { %739 = vadd.xlane.f32.xlu1 %v738_v27 }
 0x232   :  { %678 = vadd.xlane.f32.xlu0 %v677_v45 }
 0x234   :  { %660 = vadd.xlane.f32.xlu1 %v659_v39 }
 0x236   :  { %724 = vadd.xlane.f32.xlu0 %v723_v41 }
 0x23a   :  { %730 = vadd.xlane.f32.xlu0 %v729_v44 }
 0x23e   :  { %736 = vadd.xlane.f32.xlu0 %v735_v48 }
 0x242   :  { %742 = vadd.xlane.f32.xlu0 %v741_v49 }
 0x245   :  { %491 = vrot.lane.b32.xlu1 %v4128_v20, %s4040_s14 }
 0x249   :  { %493 = vrot.lane.b32.xlu1 %v4126_v19, %s4040_s14 }
 0x24d   :  { %569 = vrot.lane.b32.xlu1 %v4120_v17, %s4040_s14 }
 0x251   :  { %573 = vrot.lane.b32.xlu1 %v4130_v21, %s4040_s14 }
 0x258   :  { %489 = vrot.lane.b32.xlu0 %v4124_v18, %s4040_s14 }
 0x25c   :  { %567 = vrot.lane.b32.xlu0 %v4104_v13, %s4040_s14 }
 0x260   :  { %571 = vrot.lane.b32.xlu0 %v4134_v22, %s4040_s14 }
 0x285   :  { %v690_v42 = vpop.xlane.xlu1 %689 }
 0x289   :  { %v696_v20 = vpop.xlane.xlu1 %695 }
 0x28b   :  { %v658_v51 = vpop.xlane.xlu0 %657 }
 0x28c   :  { %v776_v17 = vmax.f32 %v658_v51, %v690_v42 }
 0x28d   :  { %v702_v53 = vpop.xlane.xlu1 %701 }
 0x28e   :  { %v784_v18 = vsub.f32 %v658_v51, %v776_v17  ;;  %v808_v60 = vsub.f32 %v690_v42, %v776_v17 }
 0x28f   :  { %v664_v19 = vpop.xlane.xlu0 %663 }
 0x290   :  { %v778_v21 = vmax.f32 %v664_v19, %v696_v20  ;;  %v792_v40 = vmul.f32 1.442695, %v784_v18  ;;  %v816_v5 = vmul.f32 1.442695, %v808_v60 }
 0x291   :  { %v708_v54 = vpop.xlane.xlu1 %707 }
 0x292   :  { %v786_v13 = vsub.f32 %v664_v19, %v778_v21  ;;  %v810_v22 = vsub.f32 %v696_v20, %v778_v21  ;;  %3694 = vpow2.f32 %v792_v40 }
 0x293   :  { %v4308_v28 = vpop.xlane.xlu0 %692  ;;  %3696 = vpow2.f32 %v816_v5 }
 0x294   :  { %v796_v6 = vmul.f32 1.442695, %v786_v13  ;;  %v820_v34 = vmul.f32 1.442695, %v810_v22 }
 0x295   :  { %v754_v55 = vpop.xlane.xlu1 %753 }
 0x296   :  { %3698 = vpow2.f32 %v796_v6 }
 0x297   :  { %v4310_v57 = vpop.xlane.xlu0 %698  ;;  %3700 = vpow2.f32 %v820_v34 }
 0x299   :  { %v760_v63 = vpop.xlane.xlu1 %759 }
 0x29b   :  { %v4312_v3 = vpop.xlane.xlu0 %704 }
 0x29d   :  { %v4314_v43 = vpop.xlane.xlu1 %765 }
 0x29f   :  { %v4316_v7 = vpop.xlane.xlu0 %710  ;;  %v4326_v31 = vpop.eup %3694 }
 0x2a0   :  { %v4328_v11 = vpop.eup %3696 }
 0x2a1   :  { %v4318_v9 = vpop.xlane.xlu1 %771  ;;  %v832_v29 = vadd.f32 %v4328_v11, %v4326_v31 }
 0x2a3   :  { %v4320_v14 = vpop.xlane.xlu0 %756  ;;  %v4332_v4 = vpop.eup %3698 }
 0x2a4   :  { %v4334_v45 = vpop.eup %3700 }
 0x2a5   :  { %v670_v56 = vpop.xlane.xlu1 %669  ;;  %v834_v49 = vadd.f32 %v4334_v45, %v4332_v4 }
 0x2a6   :  { %v780_v15 = vmax.f32 %v670_v56, %v702_v53 }
 0x2a7   :  { %v4322_v58 = vpop.xlane.xlu0 %762 }
 0x2a8   :  { %v788_v47 = vsub.f32 %v670_v56, %v780_v15  ;;  %v812_v62 = vsub.f32 %v702_v53, %v780_v15 }
 0x2a9   :  { %v676_v12 = vpop.xlane.xlu1 %675 }
 0x2aa   :  { %v800_v23 = vmul.f32 1.442695, %v788_v47  ;;  %v824_v24 = vmul.f32 1.442695, %v812_v62  ;;  %v782_v59 = vmax.f32 %v676_v12, %v708_v54 }
 0x2ab   :  { %v4324_v26 = vpop.xlane.xlu0 %768 }
 0x2ac   :  { %3702 = vpow2.f32 %v800_v23  ;;  %v790_v32 = vsub.f32 %v676_v12, %v782_v59  ;;  %v814_v52 = vsub.f32 %v708_v54, %v782_v59 }
 0x2ad   :  { %3704 = vpow2.f32 %v824_v24  ;;  %v722_v30 = vpop.xlane.xlu1 %721 }
 0x2ae   :  { %v804_v61 = vmul.f32 1.442695, %v790_v32  ;;  %v828_v36 = vmul.f32 1.442695, %v814_v52  ;;  %v848_v37 = vmax.f32 %v722_v30, %v754_v55 }
 0x2af   :  { %v4330_v27 = vpop.xlane.xlu0 %774 }
 0x2b0   :  { %3706 = vpow2.f32 %v804_v61  ;;  %v856_v38 = vsub.f32 %v722_v30, %v848_v37  ;;  %v880_v39 = vsub.f32 %v754_v55, %v848_v37 }
 0x2b1   :  { %3708 = vpow2.f32 %v828_v36  ;;  %v728_v41 = vpop.xlane.xlu1 %727 }
 0x2b2   :  { %v864_v44 = vmul.f32 1.442695, %v856_v38  ;;  %v888_v35 = vmul.f32 1.442695, %v880_v39  ;;  %v850_v48 = vmax.f32 %v728_v41, %v760_v63 }
 0x2b3   :  { %v667_v50 = vpop.xlane.xlu0 %666 }
 0x2b4   :  { %v779_v42 = vmax.f32 %v667_v50, %v4310_v57  ;;  %3710 = vpow2.f32 %v864_v44  ;;  %v858_v20 = vsub.f32 %v728_v41, %v850_v48  ;;  %v882_v51 = vsub.f32 %v760_v63, %v850_v48 }
 0x2b5   :  { %3712 = vpow2.f32 %v888_v35  ;;  %v734_v54 = vpop.xlane.xlu1 %733 }
 0x2b6   :  { %v787_v53 = vsub.f32 %v667_v50, %v779_v42  ;;  %v811_v19 = vsub.f32 %v4310_v57, %v779_v42  ;;  %3714 = vrcp.f32 %v832_v29  ;;  %v868_v17 = vmul.f32 1.442695, %v858_v20 }
 0x2b7   :  { %v892_v55 = vmul.f32 1.442695, %v882_v51  ;;  %v852_v21 = vmax.f32 %v734_v54, %v4314_v43  ;;  %v673_v18 = vpop.xlane.xlu0 %672  ;;  %3716 = vrcp.f32 %v834_v49 }
 0x2b8   :  { %v798_v60 = vmul.f32 1.442695, %v787_v53  ;;  %v822_v13 = vmul.f32 1.442695, %v811_v19  ;;  %v781_v22 = vmax.f32 %v673_v18, %v4312_v3  ;;  %3718 = vpow2.f32 %v868_v17 }
 0x2b9   :  { %v860_v40 = vsub.f32 %v734_v54, %v852_v21  ;;  %v884_v63 = vsub.f32 %v4314_v43, %v852_v21  ;;  %v4345_v5 = vpop.eup %3702  ;;  %3720 = vpow2.f32 %v892_v55  ;;  %v740_v34 = vpop.xlane.xlu1 %739 }
 0x2ba   :  { %v789_v57 = vsub.f32 %v673_v18, %v781_v22  ;;  %v813_v6 = vsub.f32 %v4312_v3, %v781_v22  ;;  %v4348_v56 = vpop.eup %3704  ;;  %3722 = vpow2.f32 %v798_v60  ;;  %v854_v62 = vmax.f32 %v740_v34, %v4318_v9 }
 0x2bb   :  { %v872_v15 = vmul.f32 1.442695, %v860_v40  ;;  %v896_v47 = vmul.f32 1.442695, %v884_v63  ;;  %v679_v12 = vpop.xlane.xlu0 %678  ;;  %v836_v23 = vadd.f32 %v4348_v56, %v4345_v5  ;;  %3724 = vpow2.f32 %v822_v13 }
 0x2bc   :  { %v802_v43 = vmul.f32 1.442695, %v789_v57  ;;  %v826_v24 = vmul.f32 1.442695, %v813_v6  ;;  %v862_v59 = vsub.f32 %v740_v34, %v854_v62  ;;  %v886_v32 = vsub.f32 %v4318_v9, %v854_v62 }
 0x2bd   :  { %3726 = vpow2.f32 %v872_v15  ;;  %v783_v3 = vmax.f32 %v679_v12, %v4316_v7  ;;  %v4355_v52 = vpop.eup %3706  ;;  %v661_v30 = vpop.xlane.xlu1 %660 }
 0x2be   :  { %3728 = vrcp.f32 %v836_v23  ;;  %v4357_v61 = vpop.eup %3708  ;;  %v876_v36 = vmul.f32 1.442695, %v862_v59  ;;  %v900_v37 = vmul.f32 1.442695, %v886_v32  ;;  %v777_v9 = vmax.f32 %v661_v30, %v4308_v28 }
 0x2bf   :  { %3730 = vpow2.f32 %v896_v47  ;;  %v791_v38 = vsub.f32 %v679_v12, %v783_v3  ;;  %v725_v39 = vpop.xlane.xlu0 %724  ;;  %v838_v41 = vadd.f32 %v4357_v61, %v4355_v52  ;;  %v815_v29 = vsub.f32 %v4316_v7, %v783_v3 }
 0x2c0   :  { %3732 = vpow2.f32 %v802_v43  ;;  %v849_v35 = vmax.f32 %v725_v39, %v4320_v14  ;;  %v785_v50 = vsub.f32 %v661_v30, %v777_v9  ;;  %v809_v49 = vsub.f32 %v4308_v28, %v777_v9 }
 0x2c1   :  { %3734 = vpow2.f32 %v826_v24  ;;  %v806_v44 = vmul.f32 1.442695, %v791_v38  ;;  %v4364_v48 = vpop.eup %3710  ;;  %v4367_v42 = vpop.permute.xlu1 %491  ;;  %v830_v51 = vmul.f32 1.442695, %v815_v29 }
 0x2c2   :  { %3736 = vrcp.f32 %v838_v41  ;;  %v4369_v20 = vpop.eup %3712  ;;  %v857_v53 = vsub.f32 %v725_v39, %v849_v35  ;;  %v794_v17 = vmul.f32 1.442695, %v785_v50  ;;  %v818_v21 = vmul.f32 1.442695, %v809_v49 }
 0x2c3   :  { %3738 = vpow2.f32 %v876_v36  ;;  %v731_v7 = vpop.xlane.xlu0 %730  ;;  %v3715_v19 = vpop.eup %3714  ;;  %v904_v54 = vadd.f32 %v4369_v20, %v4364_v48  ;;  %v881_v18 = vsub.f32 %v4320_v14, %v849_v35  ;;  %v499_v3 = vcombine.low %v4144_v25, %v4367_v42 }
 0x2c4   :  { %3740 = vpow2.f32 %v900_v37  ;;  %v3717_v55 = vpop.eup %3716  ;;  %v851_v60 = vmax.f32 %v731_v7, %v4322_v58  ;;  %v866_v40 = vmul.f32 1.442695, %v857_v53  ;;  %v4390_v12 = vmul.f32 %v3715_v19, %v4328_v11 }
 0x2c5   :  { %3742 = vpow2.f32 %v806_v44  ;;  %v4374_v28 = vpop.eup %3718  ;;  %v4377_v13 = vpop.permute.xlu1 %493  ;;  %v890_v47 = vmul.f32 1.442695, %v881_v18  ;;  %v500_v38 = vcombine.high %v4144_v25, %v4367_v42  ;;  %v4414_v9 = vmul.f32 %v3717_v55, %v4334_v45 }
 0x2c6   :  { %3744 = vrcp.f32 %v904_v54  ;;  %v4379_v22 = vpop.eup %3720  ;;  %v859_v34 = vsub.f32 %v731_v7, %v851_v60  ;;  %v883_v14 = vsub.f32 %v4322_v58, %v851_v60  ;;  %v4399_v58 = vmul.f32 %v3715_v19, %v4326_v31 }
 0x2c7   :  { %3746 = vpow2.f32 %v830_v51  ;;  %v737_v63 = vpop.xlane.xlu0 %736  ;;  %v4381_v57 = vpop.eup %3722  ;;  %v906_v6 = vadd.f32 %v4379_v22, %v4374_v28  ;;  %v507_v53 = vrot.slane %v499_v3, %v4150_v33 }
 0x2c8   :  { %3748 = vpow2.f32 %v794_v17  ;;  %v4386_v15 = vpop.eup %3724  ;;  %v853_v62 = vmax.f32 %v737_v63, %v4324_v26  ;;  %v870_v24 = vmul.f32 1.442695, %v859_v34  ;;  %v894_v39 = vmul.f32 1.442695, %v883_v14 }
 0x2c9   :  { %3750 = vpow2.f32 %v818_v21  ;;  %v835_v43 = vadd.f32 %v4386_v15, %v4381_v57  ;;  %v4396_v59 = vpop.permute.xlu1 %569 }
 0x2ca   :  { %v4392_v23 = vpop.eup %3726  ;;  %3752 = vrcp.f32 %v906_v6  ;;  %v861_v30 = vsub.f32 %v737_v63, %v853_v62  ;;  %v885_v11 = vsub.f32 %v4324_v26, %v853_v62  ;;  %v4417_v26 = vmul.f32 %v3717_v55, %v4332_v4 }
 0x2cb   :  { %v3729_v32 = vpop.eup %3728  ;;  %3754 = vpow2.f32 %v866_v40  ;;  %v743_v36 = vpop.xlane.xlu0 %742  ;;  %v514_v4 = vrot.slane %v500_v38, %v4150_v33 }
 0x2cc   :  { %v4404_v37 = vpop.eup %3730  ;;  %3756 = vrcp.f32 %v835_v43  ;;  %v855_v41 = vmax.f32 %v743_v36, %v4330_v27  ;;  %v874_v35 = vmul.f32 1.442695, %v861_v30  ;;  %v898_v45 = vmul.f32 1.442695, %v885_v11 }
 0x2cd   :  { %v4409_v31 = vpop.eup %3732  ;;  %v908_v29 = vadd.f32 %v4404_v37, %v4392_v23  ;;  %3758 = vpow2.f32 %v890_v47  ;;  %v574_v49 = vpop.permute.xlu1 %573  ;;  %v4441_v62 = vmul.f32 %v3729_v32, %v4348_v56  ;;  %v924_v43 = vmul.f32 %v3729_v32, %v4345_v5 }
 0x2ce   :  { %v4419_v44 = vpop.eup %3734  ;;  %3760 = vpow2.f32 %v870_v24  ;;  %v863_v25 = vsub.f32 %v743_v36, %v855_v41  ;;  %v887_v50 = vsub.f32 %v4330_v27, %v855_v41  ;;  %v595_v54 = vcombine.low %v4396_v59, %v574_v49 }
 0x2cf   :  { %v3737_v42 = vpop.eup %3736  ;;  %3762 = vrcp.f32 %v908_v29  ;;  %v837_v51 = vadd.f32 %v4419_v44, %v4409_v31  ;;  %v490_v7 = vpop.permute.xlu0 %489  ;;  %v596_v21 = vcombine.high %v4396_v59, %v574_v49 }
 0x2d0   :  { %v4425_v19 = vpop.eup %3738  ;;  %3764 = vpow2.f32 %v894_v39  ;;  %v515_v17 = vcombine.low %v490_v7, %v4377_v13  ;;  %v878_v55 = vmul.f32 1.442695, %v863_v25  ;;  %v516_v18 = vcombine.high %v490_v7, %v4377_v13 }
 0x2d1   :  { %v4430_v27 = vpop.eup %3740  ;;  %3766 = vrcp.f32 %v837_v51  ;;  %v902_v63 = vmul.f32 1.442695, %v887_v50  ;;  %v4447_v24 = vrot.slane %v595_v54, %v4150_v33  ;;  %v610_v5 = vrot.slane %v596_v21, %v4150_v33 }
 0x2d2   :  { %v4434_v60 = vpop.eup %3742  ;;  %v910_v40 = vadd.f32 %v4430_v27, %v4425_v19  ;;  %3768 = vpow2.f32 %v874_v35  ;;  %v523_v6 = vrot.slane %v515_v17, %v4150_v33  ;;  %v530_v14 = vrot.slane %v516_v18, %v4150_v33 }
 0x2d3   :  { %v3745_v34 = vpop.eup %3744  ;;  %3770 = vpow2.f32 %v898_v45  ;;  %v568_v47 = vpop.permute.xlu0 %567  ;;  %v4469_v45 = vmul.f32 %v3737_v42, %v4357_v61  ;;  %v926_v7 = vmul.f32 %v3737_v42, %v4355_v52 }
 0x2d4   :  { %v4444_v13 = vpop.eup %3746  ;;  %3772 = vrcp.f32 %v910_v40  ;;  %v531_v59 = vcombine.low %v507_v53, %v523_v6  ;;  %v532_v3 = vcombine.high %v507_v53, %v523_v6  ;;  %v547_v36 = vcombine.low %v514_v4, %v530_v14 }
 0x2d5   :  { %v4449_v30 = vpop.eup %3748  ;;  %v839_v11 = vadd.f32 %v4444_v13, %v4434_v60  ;;  %3774 = vpow2.f32 %v878_v55  ;;  %v548_v38 = vcombine.high %v514_v4, %v530_v14  ;;  %v1046_v51 = vmul.f32 %v3745_v34, %v4364_v48 }
 0x2d6   :  { %v4453_v56 = vpop.eup %3750  ;;  %3776 = vpow2.f32 %v902_v63  ;;  %v539_v32 = vrot.slane %v531_v59, %v4160_v46  ;;  %v546_v39 = vrot.slane %v532_v3, %v4160_v46  ;;  %v555_v35 = vrot.slane %v547_v36, %v4160_v46 }
 0x2d7   :  { %v3753_v41 = vpop.eup %3752  ;;  %3778 = vrcp.f32 %v839_v11  ;;  %v833_v29 = vadd.f32 %v4453_v56, %v4449_v30  ;;  %v4462_v25 = vrot.slane %v548_v38, %v4160_v46  ;;  %v572_v50 = vpop.permute.xlu0 %571  ;;  %v1062_v55 = vmul.f32 %v3745_v34, %v4369_v20 }
 0x2d8   :  { %v4464_v49 = vpop.eup %3754  ;;  %v1048_v53 = vmul.f32 %v3753_v41, %v4374_v28  ;;  %v4473_v54 = vcombine.high %v539_v32, %v5182_v16  ;;  %v4476_v17 = vcombine.high %v546_v39, %v5182_v16  ;;  %v4482_v48 = vcombine.high %v555_v35, %v5182_v16 }
 0x2d9   :  { %v3757_v4 = vpop.eup %3756  ;;  %3780 = vrcp.f32 %v833_v29  ;;  %v4484_v28 = vmul.f32 %v1046_v51, %v539_v32  ;;  %v579_v61 = vcombine.low %v568_v47, %v572_v50  ;;  %v580_v18 = vcombine.high %v568_v47, %v572_v50 }
 0x2da   :  { %v4479_v21 = vpop.eup %3758  ;;  %v4492_v40 = vcombine.high %v4462_v25, %v5182_v16  ;;  %v1064_v20 = vmul.f32 %v3753_v41, %v4379_v22  ;;  %v923_v63 = vmul.f32 %v3757_v4, %v4381_v57  ;;  %v4496_v34 = vmul.f32 %v1048_v53, %v546_v39 }
 0x2db   :  { %v4486_v52 = vpop.eup %3760  ;;  %v905_v42 = vadd.f32 %v4479_v21, %v4464_v49  ;;  %v587_v14 = vrot.slane %v579_v61, %v4150_v33  ;;  %v594_v47 = vrot.slane %v580_v18, %v4150_v33  ;;  %v928_v59 = vmul.f32 %v4399_v58, %v539_v32 }
 0x2dc   :  { %v3763_v6 = vpop.eup %3762  ;;  %v930_v36 = vmul.f32 %v4417_v26, %v546_v39  ;;  %v932_v38 = vmul.f32 %v924_v43, %v555_v35  ;;  %v931_v53 = vmul.f32 %v923_v63, %v4476_v17 }
 0x2dd   :  { %v4501_v3 = vpop.eup %3764  ;;  %3782 = vrcp.f32 %v905_v42  ;;  %v1050_v11 = vmul.f32 %v3763_v6, %v4392_v23  ;;  %v611_v41 = vcombine.low %v587_v14, %v4447_v24  ;;  %v612_v29 = vcombine.high %v587_v14, %v4447_v24 }
 0x2de   :  { %v3767_v22 = vpop.eup %3766  ;;  %v907_v57 = vadd.f32 %v4501_v3, %v4486_v52  ;;  %v627_v50 = vcombine.low %v594_v47, %v610_v5  ;;  %v628_v58 = vcombine.high %v594_v47, %v610_v5  ;;  %v934_v23 = vmul.f32 %v926_v7, %v4462_v25 }
 0x2df   :  { %v4509_v51 = vpop.eup %3768  ;;  %v925_v32 = vmul.f32 %v3767_v22, %v4409_v31  ;;  %v619_v43 = vrot.slane %v611_v41, %v4160_v46  ;;  %v626_v39 = vrot.slane %v612_v29, %v4160_v46  ;;  %v1066_v5 = vmul.f32 %v3763_v6, %v4404_v37 }
 0x2e0   :  { %v4514_v26 = vpop.eup %3770  ;;  %3784 = vrcp.f32 %v907_v57  ;;  %v635_v61 = vrot.slane %v627_v50, %v4160_v46  ;;  %v642_v31 = vrot.slane %v628_v58, %v4160_v46  ;;  %v939_v42 = vmul.f32 %v3757_v4, %v4386_v15 }
 0x2e1   :  { %v3773_v24 = vpop.eup %3772  ;;  %v909_v18 = vadd.f32 %v4514_v26, %v4509_v51  ;;  %v1058_v14 = vmul.f32 %v1050_v11, %v555_v35  ;;  %v933_v47 = vmul.f32 %v925_v32, %v4482_v48  ;;  %v941_v57 = vmul.f32 %v3767_v22, %v4419_v44 }
 0x2e2   :  { %v4524_v7 = vpop.eup %3774  ;;  %v1052_v63 = vmul.f32 %v3773_v24, %v4425_v19  ;;  %v1068_v29 = vmul.f32 %v3773_v24, %v4430_v27  ;;  %v644_v37 = vcombine.high %v626_v39, %v5182_v16  ;;  %v4534_v6 = vcombine.high %v635_v61, %v5182_v16 }
 0x2e3   :  { %v4529_v41 = vpop.eup %3776  ;;  %3786 = vrcp.f32 %v909_v18  ;;  %v4539_v19 = vcombine.high %v642_v31, %v5182_v16  ;;  %v944_v35 = vmul.f32 %v4390_v12, %v619_v43  ;;  %v946_v44 = vmul.f32 %v4414_v9, %v626_v39 }
 0x2e4   :  { %v3779_v15 = vpop.eup %3778  ;;  %v911_v4 = vadd.f32 %v4529_v41, %v4524_v7  ;;  %v643_v11 = vcombine.high %v619_v43, %v5182_v16  ;;  %v948_v27 = vmul.f32 %v4441_v62, %v635_v61  ;;  %v950_v22 = vmul.f32 %v4469_v45, %v642_v31 }
 0x2e5   :  { %v1070_v50 = vmul.f32 %v1062_v55, %v619_v43  ;;  %v1072_v32 = vmul.f32 %v1064_v20, %v626_v39  ;;  %v927_v24 = vmul.f32 %v3779_v15, %v4434_v60  ;;  %v943_v18 = vmul.f32 %v3779_v15, %v4444_v13 }
 0x2e6   :  { %v3781_v58 = vpop.eup %3780  ;;  %3788 = vrcp.f32 %v911_v4  ;;  %v947_v1 = vmul.f32 %v939_v42, %v644_v37  ;;  %v949_v9 = vmul.f32 %v941_v57, %v4534_v6  ;;  %v952_v45 = vadd.f32 %v944_v35, %v928_v59 }
 0x2e7   :  { %v921_v0 = vmul.f32 %v3781_v58, %v4449_v30  ;;  %v937_v12 = vmul.f32 %v3781_v58, %v4453_v56  ;;  %v935_v16 = vmul.f32 %v927_v24, %v4492_v40  ;;  %v951_v62 = vmul.f32 %v943_v18, %v4539_v19 }
 0x2e8   :  { %v954_v55 = vadd.f32 %v946_v44, %v930_v36  ;;  %v1074_v43 = vmul.f32 %v1066_v5, %v635_v61  ;;  %v956_v60 = vadd.f32 %v948_v27, %v932_v38  ;;  %v955_v13 = vadd.f32 %v947_v1, %v931_v53 }
 0x2e9   :  { %v929_v20 = vmul.f32 %v921_v0, %v4473_v54  ;;  %v945_v39 = vmul.f32 %v937_v12, %v643_v11  ;;  %v957_v15 = vadd.f32 %v949_v9, %v933_v47  ;;  %v958_v30 = vadd.f32 %v950_v22, %v934_v23 }
 0x2ea   :  { %v3783_v4 = vpop.eup %3782  ;;  %v959_v2 = vadd.f32 %v951_v62, %v935_v16  ;;  %v960_v57 = vcombine.low %v952_v45, %v954_v55  ;;  %v1060_v24 = vmul.f32 %v1052_v63, %v4462_v25  ;;  %v1076_v59 = vmul.f32 %v1068_v29, %v642_v31  ;;  %v1172_v63 = vld [vmem:[#allocation5 + $0xe0] sm:$0xff] }
 0x2eb   :  { %v1063_v56 = vmul.f32 %v3783_v4, %v4479_v21  ;;  %v953_v42 = vadd.f32 %v945_v39, %v929_v20  ;;  %v1047_v58 = vmul.f32 %v3783_v4, %v4464_v49  ;;  %v976_v36 = vcombine.low %v956_v60, %v958_v30  ;;  %3547 = vmatprep.subr.mxu1 %v1172_v63  ;;  %v1171_v60 = vld [vmem:[#allocation5 + $0x98] sm:$0xff]  ;;  %v1170_v4 = vld [vmem:[#allocation5 + $0x50] sm:$0xff] }
 0x2ec   :  { %v984_v61 = vcombine.low %v957_v15, %v959_v2  ;;  %v1078_v1 = vadd.f32 %v1070_v50, %v4484_v28  ;;  %v967_v25 = vrot.slane %v960_v57, %v4150_v33  ;;  %v1080_v2 = vadd.f32 %v1072_v32, %v4496_v34  ;;  %3548 = vmatpush3.msra.mxu1 %v1172_v63 }
 0x2ed   :  { %v3785_v5 = vpop.eup %3784  ;;  %v1071_v0 = vmul.f32 %v1063_v56, %v643_v11  ;;  %v968_v35 = vcombine.low %v953_v42, %v955_v13  ;;  %v1055_v38 = vmul.f32 %v1047_v58, %v4473_v54  ;;  %v983_v21 = vrot.slane %v976_v36, %v4150_v33  ;;  %3549 = vmatprep.subr.mxu1 %v1171_v60 }
 0x2ee   :  { %v1065_v16 = vmul.f32 %v3785_v5, %v4501_v3  ;;  %v991_v53 = vrot.slane %v984_v61, %v4150_v33  ;;  %v1049_v49 = vmul.f32 %v3785_v5, %v4486_v52  ;;  %v1082_v31 = vadd.f32 %v1074_v43, %v1058_v14  ;;  %3550 = vmatpush3.msra.mxu1 %v1171_v60 }
 0x2ef   :  { %v975_v23 = vrot.slane %v968_v35, %v4150_v33  ;;  %v1079_v50 = vadd.f32 %v1071_v0, %v1055_v38  ;;  %v1084_v14 = vadd.f32 %v1076_v59, %v1060_v24  ;;  %v1086_v39 = vcombine.low %v1078_v1, %v1080_v2  ;;  %3551 = vmatprep.subr.mxu1 %v1170_v4 }
 0x2f0   :  { %v3787_v47 = vpop.eup %3786  ;;  %v1073_v54 = vmul.f32 %v1065_v16, %v644_v37  ;;  %v1009_v29 = vcombine.high %v983_v21, %v991_v53  ;;  %v1008_v28 = vcombine.low %v983_v21, %v991_v53  ;;  %v1057_v3 = vmul.f32 %v1049_v49, %v4476_v17  ;;  %3552 = vmatpush3.msra.mxu1 %v1170_v4 }
 0x2f1   :  { %v1067_v44 = vmul.f32 %v3787_v47, %v4514_v26  ;;  %v993_v11 = vcombine.high %v967_v25, %v975_v23  ;;  %v992_v27 = vcombine.low %v967_v25, %v975_v23  ;;  %v1051_v52 = vmul.f32 %v3787_v47, %v4509_v51 }
 0x2f2   :  { %v1023_v22 = vrot.slane %v1009_v29, %v4160_v46  ;;  %v1081_v34 = vadd.f32 %v1073_v54, %v1057_v3  ;;  %v1016_v12 = vrot.slane %v1008_v28, %v4160_v46  ;;  %v1093_v30 = vrot.slane %v1086_v39, %v4150_v33  ;;  %v1306_v3 = vld [vmem:[#allocation5 + $0xe8] sm:$0xff] }
 0x2f3   :  { %v3789_v32 = vpop.eup %3788  ;;  %v1075_v37 = vmul.f32 %v1067_v44, %v4534_v6  ;;  %v1007_v18 = vrot.slane %v993_v11, %v4160_v46  ;;  %v1000_v17 = vrot.slane %v992_v27, %v4160_v46  ;;  %v1059_v51 = vmul.f32 %v1051_v52, %v4482_v48  ;;  %v1305_v44 = vld [vmem:[#allocation5 + $0xa0] sm:$0xff]  ;;  %3559 = vmatpush3.msra.mxu0 %v1306_v3  ;;  %v1304_v27 = vld [vmem:[#allocation5 + $0x58] sm:$0xff]  ;;  %v1303_v52 = vld [vmem:[#allocation5 + $0x10] sm:$0xff] }
 0x2f4   :  { %v1069_v26 = vmul.f32 %v3789_v32, %v4529_v41  ;;  %v1053_v9 = vmul.f32 %v3789_v32, %v4524_v7  ;;  %v1094_v62 = vcombine.low %v1079_v50, %v1081_v34  ;;  %v1102_v48 = vcombine.low %v1082_v31, %v1084_v14  ;;  %v3426_v50 = vld [vmem:[#allocation8 + $0x1] ss:$0 sm:$0xff]  ;;  %v1429_v3 = vld [vmem:[#allocation5 + $0xa8] sm:$0xff] }
 0x2f5   :  { %v1026_v45 = vcombine.low %v1007_v18, %v1023_v22  ;;  %v1025_v55 = vcombine.high %v1000_v17, %v1016_v12  ;;  %v1024_v43 = vcombine.low %v1000_v17, %v1016_v12  ;;  %v1083_v41 = vadd.f32 %v1075_v37, %v1059_v51 }
 0x2f6   :  { %v1077_v20 = vmul.f32 %v1069_v26, %v4539_v19  ;;  %v1061_v6 = vmul.f32 %v1053_v9, %v4492_v40  ;;  %v1101_v7 = vrot.slane %v1094_v62, %v4150_v33  ;;  %v1027_v15 = vcombine.high %v1007_v18, %v1023_v22  ;;  %v1169_v40 = vld [vmem:[#allocation5 + $0x8] sm:$0xff]  ;;  %v1302_v22 = vld [vmem:[#allocation8 + $0x2] sm:$0x1] }
 0x2f7   :  { %1033 = vrot.lane.b32.xlu1 %v1026_v45, %s4032_s30  ;;  %1029 = vrot.lane.b32.xlu0 %v1025_v55, %s4035_s10  ;;  %v1109_v56 = vrot.slane %v1102_v48, %v4150_v33  ;;  %v5188_v11 = vmov 0.0  }
 0x2f8   :  { %v1085_v13 = vadd.f32 %v1077_v20, %v1061_v6  ;;  %v1119_v57 = vcombine.high %v1093_v30, %v1101_v7  ;;  %v1118_v58 = vcombine.low %v1093_v30, %v1101_v7  ;;  %3553 = vmatprep.subr.mxu1 %v1169_v40  ;;  %3566 = vmatprep.mubr.msk.f32.mxu0 %vm4045_vm5, %v5188_v11  ;;  %v1307_v30 = vld [vmem:[#allocation8 + $0x3] sm:$0x1] }
 0x2f9   :  { %3554 = vmatpush3.msra.mxu1 %v1169_v40  ;;  %3560 = vmatprep.subr.mxu0 %v5188_v11 }
 0x2fa   :  { %v1110_v19 = vcombine.low %v1083_v41, %v1085_v13  ;;  %v1133_v36 = vrot.slane %v1119_v57, %v4160_v46  ;;  %v1126_v5 = vrot.slane %v1118_v58, %v4160_v46  ;;  %3561 = vmatpush3.msra.mxu0 %v1305_v44  ;;  %v3430_v57 = vld [vmem:[#allocation8 + $0x5] ss:$0 sm:$0xff]  ;;  %v5189_v58 = vld [vmem:[#allocation16_spill] sm:$0xff] }
 0x2fb   :  { %1037 = vrot.lane.b32.xlu1 %v1027_v15, %s4044_s16  ;;  %3562 = vmatprep.subr.mxu0 %v5188_v11  ;;  %v1428_v44 = vld [vmem:[#allocation5 + $0x60] sm:$0xff] }
 0x2fc   :  { %v1117_v42 = vrot.slane %v1110_v19, %v4150_v33  ;;  %3563 = vmatpush3.msra.mxu0 %v1304_v27  ;;  %v1427_v27 = vld [vmem:[#allocation5 + $0x18] sm:$0xff] }
 0x2fd   :  { %3564 = vmatprep.subr.mxu0 %v5188_v11 }
 0x2fe   :  { %v1135_v24 = vcombine.high %v1109_v56, %v1117_v42  ;;  %v1134_v59 = vcombine.low %v1109_v56, %v1117_v42  ;;  %3565 = vmatpush3.msra.mxu0 %v1303_v52  ;;  %v3429_v56 = vld [vmem:[#allocation8 + $0x4] ss:$0 sm:$0xff]  ;;  %v1526_v52 = vld [vmem:[#allocation7 + $0x70] sm:$0xff] }
 0x2ff   :  { %3567 = vmatmul.mubr.msk.f32.vlgmr.msra.gmra.mxu0 %vm89_vm0, %v1302_v22  ;;  %v1525_v22 = vld [vmem:[#allocation7 + $0x60] sm:$0xff]  ;;  %3580 = vmatprep.subr.mxu0 %v1526_v52 }
 0x300   :  { %v1149_v61 = vrot.slane %v1135_v24, %v4160_v46  ;;  %v1142_v0 = vrot.slane %v1134_v59, %v4160_v46  ;;  %3581 = vmatpush3.msra.mxu0 %v1526_v52 }
 0x301   :  { %3582 = vmatprep.subr.mxu0 %v1525_v22 }
 0x302   :  { %v1153_v35 = vcombine.high %v1133_v36, %v1149_v61  ;;  %v1150_v38 = vcombine.low %v1126_v5, %v1142_v0  ;;  %v1151_v1 = vcombine.high %v1126_v5, %v1142_v0  ;;  %v1152_v16 = vcombine.low %v1133_v36, %v1149_v61  ;;  %3583 = vmatpush3.msra.mxu0 %v1525_v22  ;;  %v3440_v22 = vld [vmem:[#allocation8 + $0x8] ss:$0 sm:$0xff] }
 0x304   :  { %1163 = vrot.lane.b32.xlu1 %v1153_v35, %s4044_s16  ;;  %1155 = vrot.lane.b32.xlu0 %v1151_v1, %s4035_s10 }
 0x308   :  { %1159 = vrot.lane.b32.xlu0 %v1152_v16, %s4032_s30 }
 0x369   :  { %v1034_v21 = vpop.permute.xlu1 %1033  ;;  %v1030_v53 = vpop.permute.xlu0 %1029 }
 0x36a   :  { %v1041_v49 = vsel %vm1040_vm2, %v1024_v43, %v1030_v53 }
 0x36b   :  { %v1043_v23 = vsel %vm1042_vm3, %v1041_v49, %v1034_v21 }
 0x36d   :  { %v1038_v25 = vpop.permute.xlu1 %1037 }
 0x36e   :  { %v1045_v2 = vsel %vm1044_vm4, %v1043_v23, %v1038_v25 }
 0x36f   :  { %3555 = vmatprep.mubr.msk.f32.mxu1 %vm89_vm0, %v1045_v2 }
 0x376   :  { %v1156_v31 = vpop.permute.xlu0 %1155  ;;  %v1164_v54 = vpop.permute.xlu1 %1163 }
 0x377   :  { %v1166_v63 = vsel %vm1040_vm2, %v1150_v38, %v1156_v31 }
 0x37a   :  { %v1160_v47 = vpop.permute.xlu0 %1159 }
 0x37b   :  { %v1167_v29 = vsel %vm1042_vm3, %v1166_v63, %v1160_v47 }
 0x37c   :  { %v1168_v28 = vsel %vm1044_vm4, %v1167_v29, %v1164_v54 }
 0x37d   :  { %3556 = vmatmul.mubr.msk.f32.vlgmr.msra.gmra.mxu1 %vm89_vm0, %v1168_v28  ;;  %v1430_v28 = vld [vmem:[#allocation5 + $0xf0] sm:$0xff] }
 0x37e   :  { %3569 = vmatprep.subr.mxu1 %v1430_v28 }
 0x37f   :  { %3570 = vmatpush3.msra.mxu1 %v1430_v28 }
 0x380   :  { %3571 = vmatprep.subr.mxu1 %v1429_v3 }
 0x381   :  { %3572 = vmatpush3.msra.mxu1 %v1429_v3 }
 0x382   :  { %3573 = vmatprep.subr.mxu1 %v1428_v44 }
 0x383   :  { %3574 = vmatpush3.msra.mxu1 %v1428_v44 }
 0x384   :  { %3575 = vmatprep.subr.mxu1 %v1427_v27 }
 0x385   :  { %3576 = vmatpush3.msra.mxu1 %v1427_v27 }
 0x3bf   :  { %v1377_v60 = vpop.f32.mrf.mxu0 }
 0x3c0   :  { %v1378_v19 = vadd.f32 %v1377_v60, %v1307_v30  ;;  %v1521_v60 = vld [vmem:[#allocation7 + $0x20] sm:$0xff] }
 0x3c2   :  { %v1384_v24 = vrot.slane %v1378_v19, %v5189_v58 }
 0x43d   :  { %v3557_v34 = vpop.f32.mrf.mxu1 }
 0x43e   :  { %v1256_v14 = vadd.f32 %v3557_v34, %v3426_v50  ;;  %v1523_v34 = vld [vmem:[#allocation7 + $0x40] sm:$0xff] }
 0x43f   :  { %v1250_v32 = vpop.f32.mrf.mxu1 }
 0x440   :  { %v1251_v37 = vadd.f32 %v3426_v50, %v1250_v32  ;;  %v1260_v18 = vadd.f32 %v1256_v14, %v4100_v10  ;;  %v1524_v50 = vld [vmem:[#allocation7 + $0x50] sm:$0xff] }
 0x441   :  { %3584 = vmatprep.subr.mxu0 %v1524_v50 }
 0x442   :  { %v1266_v17 = vsel %vm89_vm0, %v1260_v18, 0.0  ;;  %v1259_v12 = vadd.f32 %v1251_v37, %v4096_v8  ;;  %v3568_v8 = vpop.f32.mrf.mxu0  ;;  %3585 = vmatpush3.msra.mxu0 %v1524_v50 }
 0x443   :  { %1267 = vadd.xlane.f32.xlu1 %v1266_v17  ;;  %3586 = vmatprep.subr.mxu0 %v1523_v34  ;;  %v1520_v8 = vld [vmem:[#allocation7 + $0x10] sm:$0xff] }
 0x444   :  { %v1263_v26 = vsel %vm89_vm0, %v1259_v12, 0.0  ;;  %3587 = vmatpush3.msra.mxu0 %v1523_v34 }
 0x445   :  { %1264 = vadd.xlane.f32.xlu0 %v1263_v26 }
 0x4cc   :  { %v1268_v9 = vpop.xlane.xlu1 %1267 }
 0x4cd   :  { %v1271_v51 = vmul.f32 0.03125, %v1268_v9  ;;  %v3432_v9 = vld [vmem:[#allocation8 + $0x6] ss:$0 sm:$0xff] }
 0x4ce   :  { %v1265_v62 = vpop.xlane.xlu0 %1264 }
 0x4cf   :  { %v1270_v45 = vmul.f32 0.03125, %v1265_v62  ;;  %v1273_v55 = vsub.f32 %v1260_v18, %v1271_v51  ;;  %v3433_v62 = vld [vmem:[#allocation8 + $0x7] ss:$0 sm:$0xff] }
 0x4d1   :  { %v1272_v43 = vsub.f32 %v1259_v12, %v1270_v45  ;;  %v1275_v39 = vmul.f32 %v1273_v55, %v1273_v55 }
 0x4d3   :  { %v1274_v20 = vmul.f32 %v1272_v43, %v1272_v43  ;;  %v1279_v10 = vsel %vm89_vm0, %v1275_v39, 0.0 }
 0x4d5   :  { %v1276_v6 = vsel %vm89_vm0, %v1274_v20, 0.0 }
 0x4d6   :  { %1277 = vadd.xlane.f32.xlu0 %v1276_v6 }
 0x4da   :  { %1280 = vadd.xlane.f32.xlu0 %v1279_v10  ;;  %v1522_v10 = vld [vmem:[#allocation7 + $0x30] sm:$0xff] }
 0x4db   :  { %3588 = vmatprep.subr.mxu0 %v1522_v10 }
 0x4dc   :  { %3589 = vmatpush3.msra.mxu0 %v1522_v10 }
 0x4dd   :  { %3590 = vmatprep.subr.mxu0 %v1521_v60 }
 0x4de   :  { %3591 = vmatpush3.msra.mxu0 %v1521_v60 }
 0x4df   :  { %3592 = vmatprep.subr.mxu0 %v1520_v8 }
 0x4e0   :  { %3593 = vmatpush3.msra.mxu0 %v1520_v8 }
 0x55f   :  { %v1278_v4 = vpop.xlane.xlu0 %1277 }
 0x560   :  { %v1282_v41 = vmul.f32 0.03125, %v1278_v4  ;;  %v1519_v4 = vld [vmem:[#allocation7] sm:$0xff] }
 0x561   :  { %3594 = vmatprep.subr.mxu0 %v1519_v4 }
 0x562   :  { %v1284_v13 = vadd.f32 1e-05, %v1282_v41  ;;  %3595 = vmatpush3.msra.mxu0 %v1519_v4  ;;  %v3434_v41 = vld [vmem:[#allocation8 + $0xa] ss:$0 sm:$0xff] }
 0x563   :  { %v1281_v7 = vpop.xlane.xlu0 %1280  ;;  %3621 = vmatprep.subr.mxu0 %v5188_v11 }
 0x564   :  { %3790 = vrsqrt.f32 %v1284_v13  ;;  %v1283_v48 = vmul.f32 0.03125, %v1281_v7 }
 0x566   :  { %v1285_v15 = vadd.f32 1e-05, %v1283_v48 }
 0x568   :  { %3792 = vrsqrt.f32 %v1285_v15 }
 0x571   :  { %v3791_v40 = vpop.eup %3790 }
 0x572   :  { %v1288_v42 = vmul.f32 %v3791_v40, %v1272_v43  ;;  %v3437_v40 = vld [vmem:[#allocation8 + $0xb] ss:$0 sm:$0xff] }
 0x574   :  { %v1294_v59 = vmul.f32 %v3429_v56, %v1288_v42 }
 0x575   :  { %v3793_v36 = vpop.eup %3792 }
 0x576   :  { %v1300_v61 = vadd.f32 %v3430_v57, %v1294_v59  ;;  %v1289_v5 = vmul.f32 %v3793_v36, %v1273_v55 }
 0x578   :  { %v1385_v0 = vadd.f32 %v1384_v24, %v1300_v61  ;;  %v1295_v35 = vmul.f32 %v3429_v56, %v1289_v5 }
 0x57a   :  { %v1389_v38 = vsel %vm89_vm0, %v1385_v0, 0.0  ;;  %v1301_v1 = vadd.f32 %v3430_v57, %v1295_v35 }
 0x57b   :  { %1390 = vadd.xlane.f32.xlu1 %v1389_v38 }
 0x57c   :  { %v1386_v16 = vadd.f32 %v1384_v24, %v1301_v1 }
 0x57e   :  { %v1392_v21 = vsel %vm89_vm0, %v1386_v16, 0.0 }
 0x57f   :  { %1393 = vadd.xlane.f32.xlu0 %v1392_v21 }
 0x604   :  { %v1391_v53 = vpop.xlane.xlu1 %1390 }
 0x605   :  { %v1395_v49 = vmul.f32 0.03125, %v1391_v53 }
 0x607   :  { %v1397_v25 = vsub.f32 %v1385_v0, %v1395_v49 }
 0x608   :  { %v1394_v23 = vpop.xlane.xlu0 %1393 }
 0x609   :  { %v1396_v2 = vmul.f32 0.03125, %v1394_v23  ;;  %v1399_v31 = vmul.f32 %v1397_v25, %v1397_v25 }
 0x60b   :  { %v1398_v63 = vsub.f32 %v1386_v16, %v1396_v2  ;;  %v1401_v47 = vsel %vm89_vm0, %v1399_v31, 0.0  ;;  %v1659_v2 = vld [vmem:[#allocation5 + $0xf8] sm:$0xff]  ;;  %v1658_v31 = vld [vmem:[#allocation5 + $0xb0] sm:$0xff] }
 0x60c   :  { %1402 = vadd.xlane.f32.xlu1 %v1401_v47  ;;  %3599 = vmatprep.subr.mxu1 %v1659_v2  ;;  %v1656_v47 = vld [vmem:[#allocation5 + $0x20] sm:$0xff] }
 0x60d   :  { %v1400_v54 = vmul.f32 %v1398_v63, %v1398_v63 }
 0x60f   :  { %v1404_v29 = vsel %vm89_vm0, %v1400_v54, 0.0 }
 0x610   :  { %1405 = vadd.xlane.f32.xlu0 %v1404_v29 }
 0x695   :  { %v1403_v14 = vpop.xlane.xlu1 %1402 }
 0x696   :  { %v1407_v32 = vmul.f32 0.03125, %v1403_v14 }
 0x698   :  { %v1409_v37 = vadd.f32 1e-05, %v1407_v32 }
 0x699   :  { %v1406_v18 = vpop.xlane.xlu0 %1405 }
 0x69a   :  { %3794 = vrsqrt.f32 %v1409_v37  ;;  %v1408_v17 = vmul.f32 0.03125, %v1406_v18  ;;  %v3441_v37 = vld [vmem:[#allocation8 + $0x9] ss:$0 sm:$0xff] }
 0x69c   :  { %v1410_v12 = vadd.f32 1e-05, %v1408_v17 }
 0x69e   :  { %3796 = vrsqrt.f32 %v1410_v12 }
 0x6a7   :  { %v3795_v26 = vpop.eup %3794 }
 0x6a8   :  { %v1413_v51 = vmul.f32 %v3795_v26, %v1397_v25  ;;  %v3442_v26 = vld [vmem:[#allocation8 + $0xc] ss:$0 sm:$0xff] }
 0x6aa   :  { %v1419_v45 = vmul.f32 %v3432_v9, %v1413_v51 }
 0x6ab   :  { %v3797_v55 = vpop.eup %3796 }
 0x6ac   :  { %v1414_v43 = vmul.f32 %v3797_v55, %v1398_v63  ;;  %v1425_v20 = vadd.f32 %v3433_v62, %v1419_v45  ;;  %v1657_v63 = vld [vmem:[#allocation5 + $0x68] sm:$0xff] }
 0x6ae   :  { %v1420_v6 = vmul.f32 %v3432_v9, %v1414_v43  ;;  %3577 = vmatprep.mubr.msk.f32.mxu1 %vm89_vm0, %v1425_v20 }
 0x6b0   :  { %v1426_v39 = vadd.f32 %v3433_v62, %v1420_v6 }
 0x6b2   :  { %3578 = vmatmul.mubr.msk.f32.vlgmr.msra.gmra.mxu1 %vm89_vm0, %v1426_v39 }
 0x6b3   :  { %3600 = vmatpush3.msra.mxu1 %v1659_v2 }
 0x6b4   :  { %3601 = vmatprep.subr.mxu1 %v1658_v31 }
 0x6b5   :  { %3602 = vmatpush3.msra.mxu1 %v1658_v31 }
 0x6b6   :  { %3603 = vmatprep.subr.mxu1 %v1657_v63 }
 0x6b7   :  { %3604 = vmatpush3.msra.mxu1 %v1657_v63 }
 0x6b8   :  { %3605 = vmatprep.subr.mxu1 %v1656_v47 }
 0x6b9   :  { %3606 = vmatpush3.msra.mxu1 %v1656_v47 }
 0x772   :  { %v3579_v13 = vpop.f32.mrf.mxu1 }
 0x773   :  { %v1514_v7 = vadd.f32 %v3579_v13, %v3434_v41 }
 0x774   :  { %v1508_v48 = vpop.f32.mrf.mxu1 }
 0x775   :  { %v1509_v15 = vadd.f32 %v3434_v41, %v1508_v48  ;;  %v1518_v19 = vmax.f32 %v1514_v7, 0.0 }
 0x777   :  { %v1517_v30 = vmax.f32 %v1509_v15, 0.0 }
 0x779   :  { %3596 = vmatprep.mubr.msk.f32.mxu0 %vm1532_vm6, %v1517_v30 }
 0x77a   :  { %3597 = vmatmul.mubr.msk.f32.vlgmr.msra.gmra.mxu0 %vm1532_vm6, %v1518_v19 }
 0x77b   :  { %3629 = vmatprep.mubr.msk.f32.mxu0 %vm4045_vm5, %v5188_v11 }
 0x83a   :  { %v3598_v56 = vpop.f32.mrf.mxu0 }
 0x83b   :  { %v1611_v42 = vadd.f32 %v3598_v56, %v3437_v40 }
 0x83c   :  { %v1605_v57 = vpop.f32.mrf.mxu0 }
 0x83d   :  { %v1606_v24 = vadd.f32 %v3437_v40, %v1605_v57  ;;  %v1615_v59 = vadd.f32 %v1611_v42, %v1426_v39 }
 0x83f   :  { %v1621_v36 = vsel %vm89_vm0, %v1615_v59, 0.0  ;;  %v1614_v61 = vadd.f32 %v1606_v24, %v1425_v20 }
 0x840   :  { %1622 = vadd.xlane.f32.xlu0 %v1621_v36 }
 0x841   :  { %v1618_v5 = vsel %vm89_vm0, %v1614_v61, 0.0 }
 0x842   :  { %1619 = vadd.xlane.f32.xlu1 %v1618_v5 }
 0x8c9   :  { %v1623_v0 = vpop.xlane.xlu0 %1622 }
 0x8ca   :  { %v1625_v35 = vmul.f32 0.03125, %v1623_v0 }
 0x8cb   :  { %v1620_v38 = vpop.xlane.xlu1 %1619 }
 0x8cc   :  { %v1627_v1 = vsub.f32 %v1615_v59, %v1625_v35  ;;  %v1624_v16 = vmul.f32 0.03125, %v1620_v38 }
 0x8ce   :  { %v1626_v21 = vsub.f32 %v1614_v61, %v1624_v16  ;;  %v1629_v53 = vmul.f32 %v1627_v1, %v1627_v1 }
 0x8d0   :  { %v1633_v49 = vsel %vm89_vm0, %v1629_v53, 0.0  ;;  %v1628_v25 = vmul.f32 %v1626_v21, %v1626_v21 }
 0x8d1   :  { %1634 = vadd.xlane.f32.xlu0 %v1633_v49 }
 0x8d2   :  { %v1630_v23 = vsel %vm89_vm0, %v1628_v25, 0.0 }
 0x8d3   :  { %1631 = vadd.xlane.f32.xlu1 %v1630_v23 }
 0x95a   :  { %v1635_v54 = vpop.xlane.xlu0 %1634 }
 0x95b   :  { %v1637_v29 = vmul.f32 0.03125, %v1635_v54 }
 0x95c   :  { %v1632_v28 = vpop.xlane.xlu1 %1631 }
 0x95d   :  { %v1639_v3 = vadd.f32 1e-05, %v1637_v29  ;;  %v1636_v44 = vmul.f32 0.03125, %v1632_v28 }
 0x95f   :  { %3798 = vrsqrt.f32 %v1639_v3  ;;  %v1638_v27 = vadd.f32 1e-05, %v1636_v44 }
 0x961   :  { %3800 = vrsqrt.f32 %v1638_v27 }
 0x96c   :  { %v3799_v52 = vpop.eup %3798 }
 0x96d   :  { %v1643_v50 = vmul.f32 %v3799_v52, %v1627_v1 }
 0x96e   :  { %v3801_v34 = vpop.eup %3800 }
 0x96f   :  { %v1642_v14 = vmul.f32 %v3801_v34, %v1626_v21  ;;  %v1649_v32 = vmul.f32 %v3440_v22, %v1643_v50 }
 0x971   :  { %v1648_v18 = vmul.f32 %v3440_v22, %v1642_v14  ;;  %v4631_v12 = vadd.f32 %v3441_v37, %v1649_v32 }
 0x973   :  { %v4629_v17 = vadd.f32 %v3441_v37, %v1648_v18 }
 0x975   :  { %3607 = vmatprep.mubr.msk.f32.mxu1 %vm89_vm0, %v4629_v17 }
 0x976   :  { %3608 = vmatmul.mubr.msk.f32.vlgmr.msra.gmra.mxu1 %vm89_vm0, %v4631_v12 }
 0xa36   :  { %v3609_v9 = vpop.f32.mrf.mxu1 }
 0xa37   :  { %v4637_v51 = vadd.f32 %v3609_v9, %v3442_v26 }
 0xa38   :  { %v1737_v62 = vpop.f32.mrf.mxu1 }
 0xa39   :  { %v1738_v45 = vadd.f32 %v3442_v26, %v1737_v62  ;;  %1825 = vrot.lane.b32.xlu1 %v4637_v51, %s4036_s2 }
 0xa3b   :  { %1750 = vrot.lane.b32.xlu0 %v1738_v45, %s4039_s13 }
 0xa3d   :  { %1747 = vrot.lane.b32.xlu1 %v1738_v45, %s4036_s2 }
 0xa3f   :  { %1828 = vrot.lane.b32.xlu0 %v4637_v51, %s4039_s13 }
 0xa41   :  { %1753 = vrot.lane.b32.xlu1 %v1738_v45, %s4038_s3 }
 0xa43   :  { %1982 = vrot.lane.b32.xlu0 %v4637_v51, %s4041_s15 }
 0xa45   :  { %1831 = vrot.lane.b32.xlu1 %v4637_v51, %s4038_s3 }
 0xa47   :  { %1902 = vrot.lane.b32.xlu0 %v1738_v45, %s4041_s15 }
 0xa49   :  { %2062 = vrot.lane.b32.xlu1 %v1738_v45, %s4040_s14 }
 0xaab   :  { %v4652_v55 = vpop.permute.xlu1 %1825 }
 0xaac   :  { %1984 = vrot.lane.b32.xlu1 %v4652_v55, %s4041_s15 }
 0xaad   :  { %v4656_v43 = vpop.permute.xlu0 %1750 }
 0xaae   :  { %v1756_v48 = vcombine.low %v1738_v45, %v4656_v43  ;;  %v1757_v59 = vcombine.high %v1738_v45, %v4656_v43 }
 0xaaf   :  { %v4658_v20 = vpop.permute.xlu1 %1747 }
 0xab0   :  { %v1764_v56 = vrot.slane %v1756_v48, %v4150_v33  ;;  %v1771_v25 = vrot.slane %v1757_v59, %v4150_v33 }
 0xab1   :  { %v4660_v6 = vpop.permute.xlu0 %1828 }
 0xab2   :  { %1986 = vrot.lane.b32.xlu0 %v4660_v6, %s4041_s15  ;;  %v1834_v52 = vcombine.low %v4637_v51, %v4660_v6 }
 0xab3   :  { %v4664_v39 = vpop.permute.xlu1 %1753 }
 0xab4   :  { %v1772_v41 = vcombine.low %v4658_v20, %v4664_v39  ;;  %v1773_v19 = vcombine.high %v4658_v20, %v4664_v39 }
 0xab5   :  { %v1983_v60 = vpop.permute.xlu0 %1982 }
 0xab6   :  { %1906 = vrot.lane.b32.xlu0 %v4656_v43, %s4041_s15  ;;  %v1780_v15 = vrot.slane %v1772_v41, %v4150_v33  ;;  %v1787_v38 = vrot.slane %v1773_v19, %v4150_v33 }
 0xab7   :  { %v4668_v10 = vpop.permute.xlu1 %1831 }
 0xab8   :  { %1988 = vrot.lane.b32.xlu1 %v4668_v10, %s4041_s15  ;;  %v1788_v35 = vcombine.low %v1764_v56, %v1780_v15  ;;  %v1789_v49 = vcombine.high %v1764_v56, %v1780_v15  ;;  %v1850_v54 = vcombine.low %v4652_v55, %v4668_v10  ;;  %v1804_v27 = vcombine.low %v1771_v25, %v1787_v38 }
 0xab9   :  { %v4676_v8 = vpop.permute.xlu0 %1902  ;;  %v1805_v26 = vcombine.high %v1771_v25, %v1787_v38 }
 0xaba   :  { %v1796_v31 = vrot.slane %v1788_v35, %v4160_v46  ;;  %v1803_v44 = vrot.slane %v1789_v49, %v4160_v46  ;;  %v1858_v18 = vrot.slane %v1850_v54, %v4150_v33  ;;  %v4715_v45 = vrot.slane %v1804_v27, %v4160_v46 }
 0xabb   :  { %v4678_v4 = vpop.permute.xlu1 %2062  ;;  %v4730_v19 = vrot.slane %v1805_v26, %v4160_v46 }
 0xabc   :  { %1904 = vrot.lane.b32.xlu1 %v4658_v20, %s4041_s15 }
 0xac0   :  { %1908 = vrot.lane.b32.xlu1 %v4664_v39, %s4041_s15 }
 0xb1e   :  { %v1985_v13 = vpop.permute.xlu1 %1984 }
 0xb24   :  { %v1987_v7 = vpop.permute.xlu0 %1986 }
 0xb25   :  { %v1994_v30 = vcombine.low %v1983_v60, %v1987_v7  ;;  %v1995_v42 = vcombine.high %v1983_v60, %v1987_v7  ;;  %v1842_v60 = vrot.slane %v1834_v52, %v4150_v33 }
 0xb27   :  { %v2002_v36 = vrot.slane %v1994_v30, %v4150_v33  ;;  %v2009_v16 = vrot.slane %v1995_v42, %v4150_v33  ;;  %v1851_v30 = vcombine.high %v4652_v55, %v4668_v10  ;;  %v1835_v42 = vcombine.high %v4637_v51, %v4660_v6 }
 0xb28   :  { %v4689_v61 = vpop.permute.xlu0 %1906  ;;  %v1867_v38 = vcombine.high %v1842_v60, %v1858_v18 }
 0xb29   :  { %v1914_v23 = vcombine.low %v4676_v8, %v4689_v61 }
 0xb2a   :  { %v1989_v40 = vpop.permute.xlu1 %1988 }
 0xb2b   :  { %v2010_v57 = vcombine.low %v1985_v13, %v1989_v40  ;;  %v2011_v24 = vcombine.high %v1985_v13, %v1989_v40  ;;  %v1922_v22 = vrot.slane %v1914_v23, %v4150_v33  ;;  %v1866_v40 = vcombine.low %v1842_v60, %v1858_v18 }
 0xb2c   :  { %v1823_v60 = vcombine.high %v4730_v19, %v5188_v11 }
 0xb2d   :  { %v2018_v5 = vrot.slane %v2010_v57, %v4150_v33  ;;  %v2025_v0 = vrot.slane %v2011_v24, %v4150_v33  ;;  %v4742_v35 = vrot.slane %v1866_v40, %v4160_v46 }
 0xb2e   :  { %v4694_v1 = vpop.permute.xlu1 %1904 }
 0xb2f   :  { %v2026_v21 = vcombine.low %v2002_v36, %v2018_v5  ;;  %v2027_v53 = vcombine.high %v2002_v36, %v2018_v5  ;;  %v2042_v2 = vcombine.low %v2009_v16, %v2025_v0  ;;  %v2043_v50 = vcombine.high %v2009_v16, %v2025_v0 }
 0xb30   :  { %v1865_v0 = vrot.slane %v1851_v30, %v4150_v33  ;;  %v4745_v16 = vcombine.high %v1796_v31, %v5188_v11 }
 0xb31   :  { %v2034_v63 = vrot.slane %v2026_v21, %v4160_v46  ;;  %v2041_v47 = vrot.slane %v2027_v53, %v4160_v46  ;;  %v2050_v37 = vrot.slane %v2042_v2, %v4160_v46  ;;  %v2057_v41 = vrot.slane %v2043_v50, %v4160_v46 }
 0xb32   :  { %v1909_v29 = vpop.permute.xlu1 %1908  ;;  %v1849_v21 = vrot.slane %v1835_v42, %v4150_v33  ;;  %v1898_v42 = vcombine.high %v4742_v35, %v5188_v11 }
 0xb33   :  { %v1930_v28 = vcombine.low %v4694_v1, %v1909_v29  ;;  %v2254_v3 = vmul.f32 %v2034_v63, %v1796_v31  ;;  %v2256_v32 = vmul.f32 %v2041_v47, %v1803_v44  ;;  %v2258_v7 = vmul.f32 %v2050_v37, %v4715_v45 }
 0xb34   :  { %v2260_v57 = vmul.f32 %v2057_v41, %v4730_v19  ;;  %v2058_v5 = vcombine.high %v2034_v63, %v5188_v11  ;;  %v1931_v53 = vcombine.high %v4694_v1, %v1909_v29  ;;  %v2318_v49 = vmul.f32 %v2034_v63, %v4742_v35 }
 0xb35   :  { %v1938_v34 = vrot.slane %v1930_v28, %v4150_v33  ;;  %v2262_v14 = vsel %vm655_vm1, %v2254_v3, 0.0  ;;  %v2268_v13 = vsel %vm655_vm1, %v2256_v32, 0.0  ;;  %v2274_v24 = vsel %vm655_vm1, %v2258_v7, 0.0 }
 0xb36   :  { %2263 = vadd.xlane.f32.xlu1 %v2262_v14  ;;  %v2280_v25 = vsel %vm655_vm1, %v2260_v57, 0.0  ;;  %v2255_v2 = vmul.f32 %v2058_v5, %v4745_v16  ;;  %v2059_v54 = vcombine.high %v2041_v47, %v5188_v11  ;;  %v1882_v28 = vcombine.low %v1849_v21, %v1865_v0 }
 0xb37   :  { %v1946_v9 = vcombine.low %v1922_v22, %v1938_v34  ;;  %v1947_v62 = vcombine.high %v1922_v22, %v1938_v34  ;;  %v1915_v3 = vcombine.high %v4676_v8, %v4689_v61  ;;  %v4758_v1 = vcombine.high %v1803_v44, %v5188_v11 }
 0xb38   :  { %v1945_v63 = vrot.slane %v1931_v53, %v4150_v33  ;;  %v2326_v29 = vsel %vm655_vm1, %v2318_v49, 0.0  ;;  %v2265_v27 = vsel %vm655_vm1, %v2255_v2, 0.0  ;;  %v2060_v50 = vcombine.high %v2050_v37, %v5188_v11 }
 0xb39   :  { %v4722_v48 = vrot.slane %v1946_v9, %v4160_v46  ;;  %v4725_v15 = vrot.slane %v1947_v62, %v4160_v46  ;;  %v2257_v22 = vmul.f32 %v2059_v54, %v4758_v1  ;;  %v1929_v8 = vrot.slane %v1915_v3, %v4150_v33 }
 0xb3a   :  { %2269 = vadd.xlane.f32.xlu1 %v2268_v13  ;;  %v1890_v61 = vrot.slane %v1882_v28, %v4160_v46  ;;  %v1883_v34 = vcombine.high %v1849_v21, %v1865_v0  ;;  %v2061_v9 = vcombine.high %v2057_v41, %v5188_v11  ;;  %v2319_v0 = vmul.f32 %v2058_v5, %v1898_v42 }
 0xb3b   :  { %v2222_v56 = vmul.f32 %v4722_v48, %v1796_v31  ;;  %v2224_v36 = vmul.f32 %v4725_v15, %v1803_v44  ;;  %v1881_v31 = vrot.slane %v1867_v38, %v4160_v46  ;;  %v1822_v44 = vcombine.high %v4715_v45, %v5188_v11 }
 0xb3c   :  { %v1962_v14 = vcombine.low %v1929_v8, %v1945_v63  ;;  %v2322_v32 = vmul.f32 %v2050_v37, %v1890_v61  ;;  %v1897_v62 = vrot.slane %v1883_v34, %v4160_v46  ;;  %v1963_v13 = vcombine.high %v1929_v8, %v1945_v63 }
 0xb3d   :  { %v2230_v59 = vsel %vm655_vm1, %v2222_v56, 0.0  ;;  %v2236_v23 = vsel %vm655_vm1, %v2224_v36, 0.0  ;;  %v2320_v52 = vmul.f32 %v2041_v47, %v1881_v31  ;;  %v2271_v47 = vsel %vm655_vm1, %v2257_v22, 0.0 }
 0xb3e   :  { %2275 = vadd.xlane.f32.xlu1 %v2274_v24  ;;  %2231 = vadd.xlane.f32.xlu0 %v2230_v59  ;;  %v2259_v26 = vmul.f32 %v2060_v50, %v1822_v44  ;;  %v1970_v7 = vrot.slane %v1962_v14, %v4160_v46  ;;  %v2338_v30 = vsel %vm655_vm1, %v2322_v32, 0.0  ;;  %v2324_v40 = vmul.f32 %v2057_v41, %v1897_v62 }
 0xb3f   :  { %v2332_v18 = vsel %vm655_vm1, %v2320_v52, 0.0  ;;  %v2261_v56 = vmul.f32 %v2061_v9, %v1823_v60  ;;  %v1977_v57 = vrot.slane %v1963_v13, %v4160_v46  ;;  %v1899_v38 = vcombine.high %v1881_v31, %v5188_v11 }
 0xb40   :  { %v2277_v37 = vsel %vm655_vm1, %v2259_v26, 0.0  ;;  %v2344_v24 = vsel %vm655_vm1, %v2324_v40, 0.0  ;;  %v2226_v36 = vmul.f32 %v1970_v7, %v4715_v45  ;;  %v2329_v21 = vsel %vm655_vm1, %v2319_v0, 0.0 }
 0xb41   :  { %v2283_v59 = vsel %vm655_vm1, %v2261_v56, 0.0  ;;  %v2228_v53 = vmul.f32 %v1977_v57, %v4730_v19  ;;  %v2321_v49 = vmul.f32 %v2059_v54, %v1899_v38  ;;  %v2286_v5 = vmul.f32 %v4722_v48, %v4742_v35 }
 0xb42   :  { %2281 = vadd.xlane.f32.xlu1 %v2280_v25  ;;  %2237 = vadd.xlane.f32.xlu0 %v2236_v23  ;;  %v2242_v41 = vsel %vm655_vm1, %v2226_v36, 0.0  ;;  %v1900_v25 = vcombine.high %v1890_v61, %v5188_v11  ;;  %v1901_v28 = vcombine.high %v1897_v62, %v5188_v11  ;;  %v2288_v3 = vmul.f32 %v4725_v15, %v1881_v31 }
 0xb43   :  { %v2248_v23 = vsel %vm655_vm1, %v2228_v53, 0.0  ;;  %v2335_v45 = vsel %vm655_vm1, %v2321_v49, 0.0  ;;  %v2294_v19 = vsel %vm655_vm1, %v2286_v5, 0.0  ;;  %v2292_v8 = vmul.f32 %v1977_v57, %v1897_v62 }
 0xb44   :  { %v2323_v2 = vmul.f32 %v2060_v50, %v1900_v25  ;;  %v2325_v63 = vmul.f32 %v2061_v9, %v1901_v28  ;;  %v2300_v35 = vsel %vm655_vm1, %v2288_v3, 0.0  ;;  %v1980_v50 = vcombine.high %v1970_v7, %v5188_v11 }
 0xb45   :  { %v2312_v32 = vsel %vm655_vm1, %v2292_v8, 0.0 }
 0xb46   :  { %2327 = vadd.xlane.f32.xlu1 %v2326_v29  ;;  %2266 = vadd.xlane.f32.xlu0 %v2265_v27  ;;  %v2341_v54 = vsel %vm655_vm1, %v2323_v2, 0.0  ;;  %v1979_v29 = vcombine.high %v4725_v15, %v5188_v11  ;;  %v2290_v27 = vmul.f32 %v1970_v7, %v1890_v61  ;;  %v2347_v52 = vsel %vm655_vm1, %v2325_v63, 0.0 }
 0xb47   :  { %v2227_v14 = vmul.f32 %v1980_v50, %v1822_v44  ;;  %v1981_v15 = vcombine.high %v1977_v57, %v5188_v11  ;;  %v1978_v61 = vcombine.high %v4722_v48, %v5188_v11  ;;  %v2291_v7 = vmul.f32 %v1980_v50, %v1900_v25 }
 0xb48   :  { %v2225_v22 = vmul.f32 %v1979_v29, %v4758_v1  ;;  %v2306_v31 = vsel %vm655_vm1, %v2290_v27, 0.0  ;;  %v2289_v62 = vmul.f32 %v1979_v29, %v1899_v38 }
 0xb49   :  { %v2245_v1 = vsel %vm655_vm1, %v2227_v14, 0.0  ;;  %v2287_v9 = vmul.f32 %v1978_v61, %v1898_v42 }
 0xb4a   :  { %2333 = vadd.xlane.f32.xlu1 %v2332_v18  ;;  %2272 = vadd.xlane.f32.xlu0 %v2271_v47  ;;  %v2239_v34 = vsel %vm655_vm1, %v2225_v22, 0.0  ;;  %v2229_v18 = vmul.f32 %v1981_v15, %v1823_v60  ;;  %v2223_v47 = vmul.f32 %v1978_v61, %v4745_v16  ;;  %v2303_v13 = vsel %vm655_vm1, %v2289_v62, 0.0 }
 0xb4b   :  { %v2297_v48 = vsel %vm655_vm1, %v2287_v9, 0.0  ;;  %v2309_v60 = vsel %vm655_vm1, %v2291_v7, 0.0  ;;  %v2293_v16 = vmul.f32 %v1981_v15, %v1901_v28 }
 0xb4c   :  { %v2251_v26 = vsel %vm655_vm1, %v2229_v18, 0.0  ;;  %v2233_v44 = vsel %vm655_vm1, %v2223_v47, 0.0 }
 0xb4e   :  { %2339 = vadd.xlane.f32.xlu1 %v2338_v30  ;;  %2278 = vadd.xlane.f32.xlu0 %v2277_v37  ;;  %v2315_v30 = vsel %vm655_vm1, %v2293_v16, 0.0 }
 0xb52   :  { %2345 = vadd.xlane.f32.xlu1 %v2344_v24  ;;  %2284 = vadd.xlane.f32.xlu0 %v2283_v59 }
 0xb56   :  { %2243 = vadd.xlane.f32.xlu1 %v2242_v41  ;;  %2330 = vadd.xlane.f32.xlu0 %v2329_v21 }
 0xb5a   :  { %2249 = vadd.xlane.f32.xlu1 %v2248_v23  ;;  %2336 = vadd.xlane.f32.xlu0 %v2335_v45 }
 0xb5e   :  { %2295 = vadd.xlane.f32.xlu1 %v2294_v19  ;;  %2342 = vadd.xlane.f32.xlu0 %v2341_v54 }
 0xb62   :  { %2301 = vadd.xlane.f32.xlu1 %v2300_v35  ;;  %2348 = vadd.xlane.f32.xlu0 %v2347_v52 }
 0xb66   :  { %2307 = vadd.xlane.f32.xlu1 %v2306_v31  ;;  %2240 = vadd.xlane.f32.xlu0 %v2239_v34 }
 0xb6a   :  { %2313 = vadd.xlane.f32.xlu1 %v2312_v32  ;;  %2246 = vadd.xlane.f32.xlu0 %v2245_v1 }
 0xb6e   :  { %2252 = vadd.xlane.f32.xlu0 %v2251_v26  ;;  %2234 = vadd.xlane.f32.xlu1 %v2233_v44 }
 0xb72   :  { %2298 = vadd.xlane.f32.xlu0 %v2297_v48 }
 0xb76   :  { %2304 = vadd.xlane.f32.xlu0 %v2303_v13 }
 0xb7a   :  { %2310 = vadd.xlane.f32.xlu0 %v2309_v60 }
 0xb7e   :  { %2316 = vadd.xlane.f32.xlu0 %v2315_v30 }
 0xb7f   :  { %2066 = vrot.lane.b32.xlu1 %v4656_v43, %s4040_s14 }
 0xb83   :  { %2068 = vrot.lane.b32.xlu1 %v4664_v39, %s4040_s14 }
 0xb87   :  { %2144 = vrot.lane.b32.xlu1 %v4652_v55, %s4040_s14 }
 0xb8b   :  { %2148 = vrot.lane.b32.xlu1 %v4668_v10, %s4040_s14 }
 0xb94   :  { %2064 = vrot.lane.b32.xlu0 %v4658_v20, %s4040_s14 }
 0xb98   :  { %2142 = vrot.lane.b32.xlu0 %v4637_v51, %s4040_s14 }
 0xb9c   :  { %2146 = vrot.lane.b32.xlu0 %v4660_v6, %s4040_s14 }
 0xbbf   :  { %v2264_v37 = vpop.xlane.xlu1 %2263 }
 0xbc3   :  { %v2270_v43 = vpop.xlane.xlu1 %2269 }
 0xbc7   :  { %v2232_v40 = vpop.xlane.xlu0 %2231  ;;  %v2276_v56 = vpop.xlane.xlu1 %2275 }
 0xbc8   :  { %v2350_v24 = vmax.f32 %v2232_v40, %v2264_v37 }
 0xbca   :  { %v2358_v36 = vsub.f32 %v2232_v40, %v2350_v24  ;;  %v2382_v0 = vsub.f32 %v2264_v37, %v2350_v24 }
 0xbcb   :  { %v2238_v39 = vpop.xlane.xlu0 %2237  ;;  %v2282_v42 = vpop.xlane.xlu1 %2281 }
 0xbcc   :  { %v2352_v20 = vmax.f32 %v2238_v39, %v2270_v43  ;;  %v2366_v21 = vmul.f32 1.442695, %v2358_v36  ;;  %v2390_v53 = vmul.f32 1.442695, %v2382_v0 }
 0xbce   :  { %v2360_v6 = vsub.f32 %v2238_v39, %v2352_v20  ;;  %v2384_v41 = vsub.f32 %v2270_v43, %v2352_v20  ;;  %3802 = vpow2.f32 %v2366_v21 }
 0xbcf   :  { %v4831_v57 = vpop.xlane.xlu0 %2266  ;;  %v2328_v55 = vpop.xlane.xlu1 %2327  ;;  %3804 = vpow2.f32 %v2390_v53 }
 0xbd0   :  { %v2370_v23 = vmul.f32 1.442695, %v2360_v6  ;;  %v2394_v45 = vmul.f32 1.442695, %v2384_v41 }
 0xbd2   :  { %3806 = vpow2.f32 %v2370_v23 }
 0xbd3   :  { %v4833_v10 = vpop.xlane.xlu0 %2272  ;;  %v2334_v59 = vpop.xlane.xlu1 %2333  ;;  %3808 = vpow2.f32 %v2394_v45 }
 0xbd7   :  { %v4835_v51 = vpop.xlane.xlu0 %2278  ;;  %v4837_v38 = vpop.xlane.xlu1 %2339 }
 0xbdb   :  { %v4839_v49 = vpop.xlane.xlu0 %2284  ;;  %v4841_v25 = vpop.xlane.xlu1 %2345 }
 0xbdc   :  { %v4849_v32 = vpop.eup %3802 }
 0xbdd   :  { %v4853_v47 = vpop.eup %3804 }
 0xbde   :  { %v2406_v60 = vadd.f32 %v4853_v47, %v4849_v32 }
 0xbdf   :  { %v4843_v5 = vpop.xlane.xlu0 %2330  ;;  %v2244_v2 = vpop.xlane.xlu1 %2243 }
 0xbe0   :  { %v2354_v28 = vmax.f32 %v2244_v2, %v2276_v56  ;;  %v4855_v48 = vpop.eup %3806 }
 0xbe1   :  { %v4857_v62 = vpop.eup %3808 }
 0xbe2   :  { %v2362_v3 = vsub.f32 %v2244_v2, %v2354_v28  ;;  %v2386_v19 = vsub.f32 %v2276_v56, %v2354_v28  ;;  %v2408_v39 = vadd.f32 %v4857_v62, %v4855_v48 }
 0xbe3   :  { %v4845_v54 = vpop.xlane.xlu0 %2336  ;;  %v2250_v63 = vpop.xlane.xlu1 %2249 }
 0xbe4   :  { %v2374_v29 = vmul.f32 1.442695, %v2362_v3  ;;  %v2398_v27 = vmul.f32 1.442695, %v2386_v19  ;;  %v2356_v35 = vmax.f32 %v2250_v63, %v2282_v42 }
 0xbe6   :  { %3810 = vpow2.f32 %v2374_v29  ;;  %v2364_v52 = vsub.f32 %v2250_v63, %v2356_v35  ;;  %v2388_v22 = vsub.f32 %v2282_v42, %v2356_v35 }
 0xbe7   :  { %3812 = vpow2.f32 %v2398_v27  ;;  %v4847_v50 = vpop.xlane.xlu0 %2342  ;;  %v2296_v31 = vpop.xlane.xlu1 %2295 }
 0xbe8   :  { %v2378_v8 = vmul.f32 1.442695, %v2364_v52  ;;  %v2402_v34 = vmul.f32 1.442695, %v2388_v22  ;;  %v2422_v14 = vmax.f32 %v2296_v31, %v2328_v55 }
 0xbea   :  { %3814 = vpow2.f32 %v2378_v8  ;;  %v2430_v15 = vsub.f32 %v2296_v31, %v2422_v14  ;;  %v2454_v61 = vsub.f32 %v2328_v55, %v2422_v14 }
 0xbeb   :  { %3816 = vpow2.f32 %v2402_v34  ;;  %v4851_v1 = vpop.xlane.xlu0 %2348  ;;  %v2302_v18 = vpop.xlane.xlu1 %2301 }
 0xbec   :  { %v2438_v26 = vmul.f32 1.442695, %v2430_v15  ;;  %v2462_v44 = vmul.f32 1.442695, %v2454_v61  ;;  %v2424_v9 = vmax.f32 %v2302_v18, %v2334_v59 }
 0xbee   :  { %3818 = vpow2.f32 %v2438_v26  ;;  %v2432_v13 = vsub.f32 %v2302_v18, %v2424_v9  ;;  %v2456_v7 = vsub.f32 %v2334_v59, %v2424_v9 }
 0xbef   :  { %3820 = vpow2.f32 %v2462_v44  ;;  %v2241_v16 = vpop.xlane.xlu0 %2240  ;;  %v2308_v30 = vpop.xlane.xlu1 %2307 }
 0xbf0   :  { %v2442_v37 = vmul.f32 1.442695, %v2432_v13  ;;  %v2466_v43 = vmul.f32 1.442695, %v2456_v7  ;;  %v2353_v40 = vmax.f32 %v2241_v16, %v4833_v10  ;;  %v2426_v56 = vmax.f32 %v2308_v30, %v4837_v38 }
 0xbf2   :  { %3822 = vpow2.f32 %v2442_v37  ;;  %v2361_v42 = vsub.f32 %v2241_v16, %v2353_v40  ;;  %v2385_v55 = vsub.f32 %v4833_v10, %v2353_v40  ;;  %v2434_v24 = vsub.f32 %v2308_v30, %v2426_v56 }
 0xbf3   :  { %v4866_v59 = vpop.eup %3810  ;;  %3824 = vpow2.f32 %v2466_v43  ;;  %v2458_v20 = vsub.f32 %v4837_v38, %v2426_v56  ;;  %v2247_v36 = vpop.xlane.xlu0 %2246 }
 0xbf4   :  { %v2314_v0 = vpop.xlane.xlu1 %2313  ;;  %v4869_v6 = vpop.eup %3812  ;;  %3826 = vrcp.f32 %v2406_v60  ;;  %v2372_v41 = vmul.f32 1.442695, %v2361_v42  ;;  %v2396_v21 = vmul.f32 1.442695, %v2385_v55  ;;  %v2355_v53 = vmax.f32 %v2247_v36, %v4835_v51 }
 0xbf5   :  { %3828 = vrcp.f32 %v2408_v39  ;;  %v2410_v23 = vadd.f32 %v4869_v6, %v4866_v59  ;;  %v2446_v10 = vmul.f32 1.442695, %v2434_v24  ;;  %v2428_v45 = vmax.f32 %v2314_v0, %v4841_v25 }
 0xbf6   :  { %3830 = vpow2.f32 %v2372_v41  ;;  %v2470_v2 = vmul.f32 1.442695, %v2458_v20  ;;  %v2363_v28 = vsub.f32 %v2247_v36, %v2355_v53  ;;  %v2387_v38 = vsub.f32 %v4835_v51, %v2355_v53 }
 0xbf7   :  { %v4876_v3 = vpop.eup %3814  ;;  %3832 = vrcp.f32 %v2410_v23  ;;  %v2436_v19 = vsub.f32 %v2314_v0, %v2428_v45  ;;  %v2253_v63 = vpop.xlane.xlu0 %2252  ;;  %v2460_v52 = vsub.f32 %v4841_v25, %v2428_v45 }
 0xbf8   :  { %v2235_v29 = vpop.xlane.xlu1 %2234  ;;  %v4878_v27 = vpop.eup %3816  ;;  %3834 = vpow2.f32 %v2396_v21  ;;  %v2376_v35 = vmul.f32 1.442695, %v2363_v28  ;;  %v2357_v22 = vmax.f32 %v2253_v63, %v4839_v49  ;;  %v2400_v8 = vmul.f32 1.442695, %v2387_v38 }
 0xbf9   :  { %v2412_v31 = vadd.f32 %v4878_v27, %v4876_v3  ;;  %3836 = vpow2.f32 %v2446_v10  ;;  %v2450_v51 = vmul.f32 1.442695, %v2436_v19  ;;  %v2351_v15 = vmax.f32 %v2235_v29, %v4831_v57 }
 0xbfa   :  { %3838 = vpow2.f32 %v2470_v2  ;;  %v2365_v34 = vsub.f32 %v2253_v63, %v2357_v22  ;;  %v2389_v14 = vsub.f32 %v4839_v49, %v2357_v22  ;;  %v2474_v44 = vmul.f32 1.442695, %v2460_v52 }
 0xbfb   :  { %v4886_v61 = vpop.eup %3818  ;;  %3840 = vrcp.f32 %v2412_v31  ;;  %v2299_v18 = vpop.xlane.xlu0 %2298  ;;  %v2359_v13 = vsub.f32 %v2235_v29, %v2351_v15  ;;  %v2383_v49 = vsub.f32 %v4831_v57, %v2351_v15 }
 0xbfc   :  { %v4888_v26 = vpop.permute.xlu1 %2066  ;;  %v4890_v25 = vpop.eup %3820  ;;  %3842 = vpow2.f32 %v2376_v35  ;;  %v2380_v9 = vmul.f32 1.442695, %v2365_v34  ;;  %v2423_v60 = vmax.f32 %v2299_v18, %v4843_v5  ;;  %v2404_v16 = vmul.f32 1.442695, %v2389_v14 }
 0xbfd   :  { %v2478_v7 = vadd.f32 %v4890_v25, %v4886_v61  ;;  %3844 = vpow2.f32 %v2400_v8  ;;  %v2368_v39 = vmul.f32 1.442695, %v2359_v13  ;;  %v2392_v20 = vmul.f32 1.442695, %v2383_v49 }
 0xbfe   :  { %3846 = vpow2.f32 %v2450_v51  ;;  %v2431_v37 = vsub.f32 %v2299_v18, %v2423_v60  ;;  %v2455_v43 = vsub.f32 %v4843_v5, %v2423_v60  ;;  %v2074_v18 = vcombine.low %v4678_v4, %v4888_v26 }
 0xbff   :  { %v4896_v30 = vpop.eup %3822  ;;  %3848 = vrcp.f32 %v2478_v7  ;;  %v2305_v40 = vpop.xlane.xlu0 %2304 }
 0xc00   :  { %v4899_v56 = vpop.eup %3824  ;;  %3850 = vpow2.f32 %v2474_v44  ;;  %v2425_v42 = vmax.f32 %v2305_v40, %v4845_v54  ;;  %v4902_v55 = vpop.permute.xlu1 %2068  ;;  %v2440_v0 = vmul.f32 1.442695, %v2431_v37  ;;  %v2464_v21 = vmul.f32 1.442695, %v2455_v43 }
 0xc01   :  { %v3827_v57 = vpop.eup %3826  ;;  %v2480_v24 = vadd.f32 %v4899_v56, %v4896_v30  ;;  %3852 = vpow2.f32 %v2380_v9  ;;  %v2075_v44 = vcombine.high %v4678_v4, %v4888_v26 }
 0xc02   :  { %v4906_v36 = vpop.eup %3828  ;;  %3854 = vpow2.f32 %v2404_v16  ;;  %v2433_v5 = vsub.f32 %v2305_v40, %v2425_v42  ;;  %v2457_v53 = vsub.f32 %v4845_v54, %v2425_v42  ;;  %v4950_v4 = vmul.f32 %v3827_v57, %v4853_v47 }
 0xc03   :  { %v4908_v41 = vpop.eup %3830  ;;  %3856 = vrcp.f32 %v2480_v24  ;;  %v2311_v23 = vpop.xlane.xlu0 %2310  ;;  %v2496_v40 = vmul.f32 %v4906_v36, %v4855_v48  ;;  %v2089_v47 = vrot.slane %v2075_v44, %v4150_v33 }
 0xc04   :  { %v4911_v10 = vpop.eup %3832  ;;  %3858 = vpow2.f32 %v2368_v39  ;;  %v2427_v45 = vmax.f32 %v2311_v23, %v4847_v50  ;;  %v2444_v28 = vmul.f32 1.442695, %v2433_v5  ;;  %v4921_v54 = vpop.permute.xlu1 %2144  ;;  %v2468_v52 = vmul.f32 1.442695, %v2457_v53 }
 0xc05   :  { %v4914_v2 = vpop.eup %3834  ;;  %3860 = vpow2.f32 %v2392_v20 }
 0xc06   :  { %v4916_v38 = vpop.eup %3836  ;;  %v2409_v19 = vadd.f32 %v4914_v2, %v4908_v41  ;;  %3862 = vpow2.f32 %v2440_v0  ;;  %v2435_v63 = vsub.f32 %v2311_v23, %v2427_v45  ;;  %v2459_v29 = vsub.f32 %v4847_v50, %v2427_v45 }
 0xc07   :  { %v4923_v35 = vpop.eup %3838  ;;  %3864 = vpow2.f32 %v2464_v21  ;;  %v2317_v22 = vpop.xlane.xlu0 %2316  ;;  %v4933_v50 = vmul.f32 %v3827_v57, %v4849_v32  ;;  %v2082_v0 = vrot.slane %v2074_v18, %v4150_v33 }
 0xc08   :  { %v4925_v31 = vpop.eup %3840  ;;  %3866 = vrcp.f32 %v2409_v19  ;;  %v2482_v8 = vadd.f32 %v4923_v35, %v4916_v38  ;;  %v2448_v51 = vmul.f32 1.442695, %v2435_v63  ;;  %v2429_v14 = vmax.f32 %v2317_v22, %v4851_v1  ;;  %v2149_v37 = vpop.permute.xlu1 %2148 }
 0xc09   :  { %v4929_v34 = vpop.eup %3842  ;;  %3868 = vpow2.f32 %v2444_v28  ;;  %v2472_v9 = vmul.f32 1.442695, %v2459_v29  ;;  %v2170_v57 = vcombine.low %v4921_v54, %v2149_v37  ;;  %v2171_v63 = vcombine.high %v4921_v54, %v2149_v37 }
 0xc0a   :  { %v4935_v15 = vpop.eup %3844  ;;  %3870 = vrcp.f32 %v2482_v8  ;;  %v2437_v49 = vsub.f32 %v2317_v22, %v2429_v14  ;;  %v2461_v32 = vsub.f32 %v4851_v1, %v2429_v14  ;;  %v4978_v14 = vmul.f32 %v4906_v36, %v4857_v62 }
 0xc0b   :  { %v4941_v13 = vpop.eup %3846  ;;  %v2411_v7 = vadd.f32 %v4935_v15, %v4929_v34  ;;  %3872 = vpow2.f32 %v2468_v52  ;;  %v2065_v60 = vpop.permute.xlu0 %2064 }
 0xc0c   :  { %v3849_v16 = vpop.eup %3848  ;;  %3874 = vpow2.f32 %v2448_v51  ;;  %v2090_v43 = vcombine.low %v2065_v60, %v4902_v55  ;;  %v2452_v39 = vmul.f32 1.442695, %v2437_v49  ;;  %v2476_v42 = vmul.f32 1.442695, %v2461_v32 }
 0xc0d   :  { %v4952_v26 = vpop.eup %3850  ;;  %3876 = vrcp.f32 %v2411_v7  ;;  %v2091_v24 = vcombine.high %v2065_v60, %v4902_v55  ;;  %v2498_v51 = vmul.f32 %v4911_v10, %v4866_v59  ;;  %v4989_v7 = vmul.f32 %v4911_v10, %v4869_v6 }
 0xc0e   :  { %v4955_v1 = vpop.eup %3852  ;;  %v2484_v20 = vadd.f32 %v4952_v26, %v4941_v13  ;;  %3878 = vpow2.f32 %v2472_v9  ;;  %v2098_v48 = vrot.slane %v2090_v43, %v4150_v33  ;;  %v2500_v9 = vmul.f32 %v4925_v31, %v4876_v3 }
 0xc0f   :  { %v4961_v5 = vpop.eup %3854  ;;  %3880 = vpow2.f32 %v2452_v39  ;;  %v2105_v21 = vrot.slane %v2091_v24, %v4150_v33  ;;  %v2143_v55 = vpop.permute.xlu0 %2142  ;;  %v2178_v59 = vrot.slane %v2170_v57, %v4150_v33  ;;  %v5000_v60 = vmul.f32 %v4925_v31, %v4878_v27 }
 0xc10   :  { %v3857_v53 = vpop.eup %3856  ;;  %3882 = vrcp.f32 %v2484_v20  ;;  %v2413_v23 = vadd.f32 %v4961_v5, %v4955_v1  ;;  %v2106_v45 = vcombine.low %v2082_v0, %v2098_v48  ;;  %v2107_v28 = vcombine.high %v2082_v0, %v2098_v48 }
 0xc11   :  { %v4968_v19 = vpop.eup %3858  ;;  %3884 = vpow2.f32 %v2476_v42  ;;  %v2122_v29 = vcombine.low %v2089_v47, %v2105_v21  ;;  %v2123_v52 = vcombine.high %v2089_v47, %v2105_v21  ;;  %v2185_v3 = vrot.slane %v2171_v63, %v4150_v33 }
 0xc12   :  { %v4971_v22 = vpop.eup %3860  ;;  %3886 = vrcp.f32 %v2413_v23  ;;  %v2114_v8 = vrot.slane %v2106_v45, %v4160_v46  ;;  %v2121_v54 = vrot.slane %v2107_v28, %v4160_v46  ;;  %v2617_v10 = vmul.f32 %v3849_v16, %v4886_v61 }
 0xc13   :  { %v4980_v18 = vpop.eup %3862  ;;  %v2407_v44 = vadd.f32 %v4971_v22, %v4968_v19  ;;  %v2130_v62 = vrot.slane %v2122_v29, %v4160_v46  ;;  %v4996_v36 = vrot.slane %v2123_v52, %v4160_v46  ;;  %v2147_v32 = vpop.permute.xlu0 %2146  ;;  %v2619_v42 = vmul.f32 %v3857_v53, %v4896_v30 }
 0xc14   :  { %v4991_v49 = vpop.eup %3864  ;;  %v5009_v39 = vcombine.high %v2114_v8, %v5188_v11  ;;  %v5013_v24 = vmul.f32 %v3849_v16, %v4890_v25  ;;  %v5016_v27 = vmul.f32 %v3857_v53, %v4899_v56  ;;  %v5019_v20 = vcombine.high %v2121_v54, %v5188_v11 }
 0xc15   :  { %v3867_v37 = vpop.eup %3866  ;;  %3888 = vrcp.f32 %v2407_v44  ;;  %v2479_v6 = vadd.f32 %v4991_v49, %v4980_v18  ;;  %v5022_v61 = vmul.f32 %v4933_v50, %v2114_v8  ;;  %v2154_v0 = vcombine.low %v2143_v55, %v2147_v32 }
 0xc16   :  { %v5006_v43 = vpop.eup %3868  ;;  %v5027_v47 = vcombine.high %v2130_v62, %v5188_v11  ;;  %v5031_v25 = vcombine.high %v4996_v36, %v5188_v11  ;;  %v5033_v30 = vmul.f32 %v2496_v40, %v2121_v54  ;;  %v2155_v56 = vcombine.high %v2143_v55, %v2147_v32 }
 0xc17   :  { %v3871_v31 = vpop.eup %3870  ;;  %3890 = vrcp.f32 %v2479_v6  ;;  %v2497_v50 = vmul.f32 %v3867_v37, %v4908_v41  ;;  %v5040_v21 = vmul.f32 %v2498_v51, %v2130_v62  ;;  %v2162_v53 = vrot.slane %v2154_v0, %v4150_v33 }
 0xc18   :  { %v5024_v48 = vpop.eup %3872  ;;  %v5044_v45 = vmul.f32 %v2500_v9, %v4996_v36  ;;  %v2625_v28 = vmul.f32 %v2617_v10, %v2114_v8  ;;  %v2627_v63 = vmul.f32 %v2619_v42, %v2121_v54  ;;  %v2169_v40 = vrot.slane %v2155_v56, %v4150_v33 }
 0xc19   :  { %v5035_v16 = vpop.eup %3874  ;;  %v2481_v57 = vadd.f32 %v5024_v48, %v5006_v43  ;;  %v2621_v52 = vmul.f32 %v3871_v31, %v4916_v38  ;;  %v2186_v41 = vcombine.low %v2162_v53, %v2178_v59  ;;  %v2187_v32 = vcombine.high %v2162_v53, %v2178_v59 }
 0xc1a   :  { %v3877_v23 = vpop.eup %3876  ;;  %v2202_v9 = vcombine.low %v2169_v40, %v2185_v3  ;;  %v2203_v6 = vcombine.high %v2169_v40, %v2185_v3  ;;  %v2505_v54 = vmul.f32 %v2497_v50, %v5019_v20  ;;  %v2513_v10 = vmul.f32 %v3867_v37, %v4914_v2 }
 0xc1b   :  { %v5047_v55 = vpop.eup %3878  ;;  %3892 = vrcp.f32 %v2481_v57  ;;  %v2499_v29 = vmul.f32 %v3877_v23, %v4929_v34  ;;  %v2194_v42 = vrot.slane %v2186_v41, %v4160_v46  ;;  %v2637_v34 = vmul.f32 %v3871_v31, %v4923_v35 }
 0xc1c   :  { %v5051_v51 = vpop.eup %3880  ;;  %v2483_v44 = vadd.f32 %v5047_v55, %v5035_v16  ;;  %v2201_v56 = vrot.slane %v2187_v32, %v4160_v46  ;;  %v2210_v59 = vrot.slane %v2202_v9, %v4160_v46  ;;  %v2629_v50 = vmul.f32 %v2621_v52, %v2130_v62 }
 0xc1d   :  { %v3883_v8 = vpop.eup %3882  ;;  %v2515_v2 = vmul.f32 %v3877_v23, %v4935_v15  ;;  %v2217_v37 = vrot.slane %v2203_v6, %v4160_v46  ;;  %v2507_v31 = vmul.f32 %v2499_v29, %v5027_v47  ;;  %v2218_v53 = vcombine.high %v2194_v42, %v5188_v11 }
 0xc1e   :  { %v5059_v0 = vpop.eup %3884  ;;  %3894 = vrcp.f32 %v2483_v44  ;;  %v2623_v38 = vmul.f32 %v3883_v8, %v4941_v13  ;;  %v2219_v13 = vcombine.high %v2201_v56, %v5188_v11  ;;  %v2220_v41 = vcombine.high %v2210_v59, %v5188_v11 }
 0xc1f   :  { %v3887_v57 = vpop.eup %3886  ;;  %v2485_v3 = vadd.f32 %v5059_v0, %v5051_v51  ;;  %v2518_v44 = vmul.f32 %v4950_v4, %v2194_v42  ;;  %v2520_v29 = vmul.f32 %v4978_v14, %v2201_v56  ;;  %v2639_v4 = vmul.f32 %v3883_v8, %v4952_v26 }
 0xc20   :  { %v2501_v35 = vmul.f32 %v3887_v57, %v4955_v1  ;;  %v2631_v40 = vmul.f32 %v2623_v38, %v4996_v36  ;;  %v2517_v23 = vmul.f32 %v3887_v57, %v4961_v5  ;;  %v5078_v1 = vcombine.high %v2217_v37, %v5188_v11 }
 0xc21   :  { %3896 = vrcp.f32 %v2485_v3  ;;  %v2521_v9 = vmul.f32 %v2513_v10, %v2219_v13  ;;  %v2522_v36 = vmul.f32 %v4989_v7, %v2210_v59  ;;  %v2523_v38 = vmul.f32 %v2515_v2, %v2220_v41 }
 0xc22   :  { %v3889_v62 = vpop.eup %3888  ;;  %v2509_v15 = vmul.f32 %v2501_v35, %v5031_v25  ;;  %v2641_v3 = vmul.f32 %v5013_v24, %v2194_v42  ;;  %v2643_v5 = vmul.f32 %v5016_v27, %v2201_v56  ;;  %v2525_v10 = vmul.f32 %v2517_v23, %v5078_v1 }
 0xc23   :  { %v2495_v52 = vmul.f32 %v3889_v62, %v4968_v19  ;;  %v2511_v32 = vmul.f32 %v3889_v62, %v4971_v22  ;;  %v2524_v22 = vmul.f32 %v5000_v60, %v2217_v37  ;;  %v2645_v7 = vmul.f32 %v2637_v34, %v2210_v59 }
 0xc24   :  { %v3891_v6 = vpop.eup %3890  ;;  %v2647_v62 = vmul.f32 %v2639_v4, %v2217_v37  ;;  %v5092_v2 = vadd.f32 %v2641_v3, %v2625_v28  ;;  %v2651_v26 = vadd.f32 %v2643_v5, %v2627_v63  ;;  %v2526_v24 = vadd.f32 %v2518_v44, %v5022_v61 }
 0xc25   :  { %v2618_v57 = vmul.f32 %v3891_v6, %v4980_v18  ;;  %v2503_v35 = vmul.f32 %v2495_v52, %v5009_v39  ;;  %v2634_v14 = vmul.f32 %v3891_v6, %v4991_v49  ;;  %v2519_v19 = vmul.f32 %v2511_v32, %v2218_v53  ;;  %v2743_v6 = vld [vmem:[#allocation5 + $0x100] sm:$0xff] }
 0xc26   :  { %v2528_v56 = vadd.f32 %v2520_v29, %v5033_v30  ;;  %v2529_v49 = vadd.f32 %v2521_v9, %v2505_v54  ;;  %v2530_v34 = vadd.f32 %v2522_v36, %v5040_v21  ;;  %v2531_v59 = vadd.f32 %v2523_v38, %v2507_v31  ;;  %3610 = vmatprep.subr.mxu1 %v2743_v6 }
 0xc27   :  { %v2527_v8 = vadd.f32 %v2519_v19, %v2503_v35  ;;  %v2626_v18 = vmul.f32 %v2618_v57, %v5009_v39  ;;  %v2642_v42 = vmul.f32 %v2634_v14, %v2218_v53  ;;  %v2532_v28 = vadd.f32 %v2524_v22, %v5044_v45  ;;  %3611 = vmatpush3.msra.mxu1 %v2743_v6  ;;  %v2742_v14 = vld [vmem:[#allocation5 + $0xb8] sm:$0xff]  ;;  %v2741_v19 = vld [vmem:[#allocation5 + $0x70] sm:$0xff] }
 0xc28   :  { %v3893_v27 = vpop.eup %3892  ;;  %v2533_v63 = vadd.f32 %v2525_v10, %v2509_v15  ;;  %v2534_v37 = vcombine.low %v2526_v24, %v2528_v56  ;;  %v2653_v53 = vadd.f32 %v2645_v7, %v2629_v50  ;;  %v2655_v32 = vadd.f32 %v2647_v62, %v2631_v40  ;;  %3612 = vmatprep.subr.mxu1 %v2742_v14  ;;  %v2740_v56 = vld [vmem:[#allocation5 + $0x28] sm:$0xff] }
 0xc29   :  { %v2620_v52 = vmul.f32 %v3893_v27, %v5006_v43  ;;  %v2636_v60 = vmul.f32 %v3893_v27, %v5024_v48  ;;  %v2542_v61 = vcombine.low %v2527_v8, %v2529_v49  ;;  %v2650_v54 = vadd.f32 %v2642_v42, %v2626_v18  ;;  %3613 = vmatpush3.msra.mxu1 %v2742_v14 }
 0xc2a   :  { %v2541_v48 = vrot.slane %v2534_v37, %v4150_v33  ;;  %v2550_v45 = vcombine.low %v2530_v34, %v2532_v28  ;;  %v2558_v15 = vcombine.low %v2531_v59, %v2533_v63  ;;  %v2657_v3 = vcombine.low %v5092_v2, %v2651_v26  ;;  %3614 = vmatprep.subr.mxu1 %v2741_v19 }
 0xc2b   :  { %v3895_v44 = vpop.eup %3894  ;;  %v2628_v23 = vmul.f32 %v2620_v52, %v5019_v20  ;;  %v2644_v39 = vmul.f32 %v2636_v60, %v2219_v13  ;;  %v2549_v21 = vrot.slane %v2542_v61, %v4150_v33  ;;  %v2673_v35 = vcombine.low %v2653_v53, %v2655_v32  ;;  %3615 = vmatpush3.msra.mxu1 %v2741_v19 }
 0xc2c   :  { %v2622_v30 = vmul.f32 %v3895_v44, %v5035_v16  ;;  %v2638_v43 = vmul.f32 %v3895_v44, %v5047_v55  ;;  %v2557_v55 = vrot.slane %v2550_v45, %v4150_v33  ;;  %v2565_v40 = vrot.slane %v2558_v15, %v4150_v33  ;;  %3616 = vmatprep.subr.mxu1 %v2740_v56  ;;  %v2876_v15 = vld [vmem:[#allocation5 + $0x108] sm:$0xff] }
 0xc2d   :  { %v2652_v31 = vadd.f32 %v2644_v39, %v2628_v23  ;;  %v2567_v20 = vcombine.high %v2541_v48, %v2549_v21  ;;  %v2566_v13 = vcombine.low %v2541_v48, %v2549_v21  ;;  %v2680_v24 = vrot.slane %v2673_v35, %v4150_v33  ;;  %3617 = vmatpush3.msra.mxu1 %v2740_v56 }
 0xc2e   :  { %v3897_v29 = vpop.eup %3896  ;;  %v2630_v9 = vmul.f32 %v2622_v30, %v5027_v47  ;;  %v2646_v36 = vmul.f32 %v2638_v43, %v2220_v41  ;;  %v2582_v57 = vcombine.low %v2557_v55, %v2565_v40  ;;  %3622 = vmatpush3.msra.mxu0 %v2876_v15  ;;  %v3095_v15 = vld [vmem:[#allocation7 + $0x68] sm:$0xff] }
 0xc2f   :  { %v2624_v50 = vmul.f32 %v3897_v29, %v5051_v51  ;;  %v2640_v16 = vmul.f32 %v3897_v29, %v5059_v0  ;;  %v2581_v38 = vrot.slane %v2567_v20, %v4160_v46  ;;  %v2574_v4 = vrot.slane %v2566_v13, %v4160_v46  ;;  %v2875_v29 = vld [vmem:[#allocation5 + $0xc0] sm:$0xff]  ;;  %3623 = vmatprep.subr.mxu0 %v5188_v11  ;;  %v2872_v20 = vld [vmem:[#allocation8 + $0xe] sm:$0x1]  ;;  %v3445_v13 = vld [vmem:[#allocation8 + $0xd] ss:$0 sm:$0xff] }
 0xc30   :  { %v2665_v5 = vcombine.low %v2650_v54, %v2652_v31  ;;  %v2583_v51 = vcombine.high %v2557_v55, %v2565_v40  ;;  %v2654_v0 = vadd.f32 %v2646_v36, %v2630_v9  ;;  %v2590_v7 = vrot.slane %v2582_v57, %v4160_v46  ;;  %v2874_v9 = vld [vmem:[#allocation5 + $0x78] sm:$0xff]  ;;  %3624 = vmatpush3.msra.mxu0 %v2875_v29  ;;  %v2873_v36 = vld [vmem:[#allocation5 + $0x30] sm:$0xff] }
 0xc31   :  { %v2632_v47 = vmul.f32 %v2624_v50, %v5031_v25  ;;  %v2648_v41 = vmul.f32 %v2640_v16, %v5078_v1  ;;  %v2664_v1 = vrot.slane %v2657_v3, %v4150_v33  ;;  %3625 = vmatprep.subr.mxu0 %v5188_v11  ;;  %v3094_v29 = vld [vmem:[#allocation7 + $0x58] sm:$0xff] }
 0xc32   :  { %v2597_v10 = vrot.slane %v2583_v51, %v4160_v46  ;;  %v2672_v62 = vrot.slane %v2665_v5, %v4150_v33  ;;  %v2599_v25 = vcombine.high %v2574_v4, %v2590_v7  ;;  %v2598_v8 = vcombine.low %v2574_v4, %v2590_v7  ;;  %3626 = vmatpush3.msra.mxu0 %v2874_v9  ;;  %v3093_v9 = vld [vmem:[#allocation7 + $0x48] sm:$0xff] }
 0xc33   :  { %v2656_v22 = vadd.f32 %v2648_v41, %v2632_v47  ;;  %3627 = vmatprep.subr.mxu0 %v5188_v11 }
 0xc34   :  { %v2600_v2 = vcombine.low %v2581_v38, %v2597_v10  ;;  %2603 = vrot.lane.b32.xlu0 %v2599_v25, %s4035_s10  ;;  %v2690_v18 = vcombine.high %v2664_v1, %v2672_v62  ;;  %v2689_v42 = vcombine.low %v2664_v1, %v2672_v62  ;;  %v2601_v49 = vcombine.high %v2581_v38, %v2597_v10  ;;  %v2877_v1 = vld [vmem:[#allocation8 + $0xf] sm:$0x1] }
 0xc35   :  { %v2681_v26 = vcombine.low %v2654_v0, %v2656_v22  ;;  %3628 = vmatpush3.msra.mxu0 %v2873_v36 }
 0xc36   :  { %2607 = vrot.lane.b32.xlu1 %v2600_v2, %s4032_s30  ;;  %v2704_v34 = vrot.slane %v2690_v18, %v4160_v46  ;;  %v2697_v28 = vrot.slane %v2689_v42, %v4160_v46  ;;  %3630 = vmatmul.mubr.msk.f32.vlgmr.msra.gmra.mxu0 %vm89_vm0, %v2872_v20  ;;  %v3449_v18 = vld [vmem:[#allocation8 + $0x11] ss:$0 sm:$0xff] }
 0xc37   :  { %v2688_v27 = vrot.slane %v2681_v26, %v4150_v33 }
 0xc39   :  { %v2706_v52 = vcombine.high %v2680_v24, %v2688_v27  ;;  %v2705_v60 = vcombine.low %v2680_v24, %v2688_v27 }
 0xc3a   :  { %2611 = vrot.lane.b32.xlu1 %v2601_v49, %s4044_s16 }
 0xc3b   :  { %v2720_v59 = vrot.slane %v2706_v52, %v4160_v46  ;;  %v2713_v63 = vrot.slane %v2705_v60, %v4160_v46 }
 0xc3d   :  { %v2724_v37 = vcombine.high %v2704_v34, %v2720_v59  ;;  %v2722_v33 = vcombine.high %v2697_v28, %v2713_v63  ;;  %v2721_v61 = vcombine.low %v2697_v28, %v2713_v63  ;;  %v2723_v44 = vcombine.low %v2704_v34, %v2720_v59 }
 0xc3f   :  { %2734 = vrot.lane.b32.xlu1 %v2724_v37, %s4044_s16  ;;  %2726 = vrot.lane.b32.xlu0 %v2722_v33, %s4035_s10 }
 0xc43   :  { %2730 = vrot.lane.b32.xlu0 %v2723_v44, %s4032_s30 }
 0xca6   :  { %v2604_v39 = vpop.permute.xlu0 %2603 }
 0xca7   :  { %v2614_v53 = vsel %vm1040_vm2, %v2598_v8, %v2604_v39  ;;  %v3448_v8 = vld [vmem:[#allocation8 + $0x10] ss:$0 sm:$0xff] }
 0xca8   :  { %v2608_v23 = vpop.permute.xlu1 %2607 }
 0xca9   :  { %v2615_v30 = vsel %vm1042_vm3, %v2614_v53, %v2608_v23 }
 0xcac   :  { %v2612_v32 = vpop.permute.xlu1 %2611 }
 0xcad   :  { %v2616_v43 = vsel %vm1044_vm4, %v2615_v30, %v2612_v32 }
 0xcae   :  { %3618 = vmatprep.mubr.msk.f32.mxu1 %vm89_vm0, %v2616_v43 }
 0xcb1   :  { %v2727_v46 = vpop.permute.xlu0 %2726  ;;  %v2735_v54 = vpop.permute.xlu1 %2734 }
 0xcb2   :  { %v2737_v48 = vsel %vm1040_vm2, %v2721_v61, %v2727_v46 }
 0xcb5   :  { %v2731_v21 = vpop.permute.xlu0 %2730 }
 0xcb6   :  { %v2738_v31 = vsel %vm1042_vm3, %v2737_v48, %v2731_v21  ;;  %v3000_v48 = vld [vmem:[#allocation5 + $0x110] sm:$0xff]  ;;  %v2999_v21 = vld [vmem:[#allocation5 + $0xc8] sm:$0xff] }
 0xcb7   :  { %v2739_v45 = vsel %vm1044_vm4, %v2738_v31, %v2735_v54  ;;  %3632 = vmatprep.subr.mxu1 %v3000_v48  ;;  %v2998_v54 = vld [vmem:[#allocation5 + $0x80] sm:$0xff]  ;;  %v2997_v31 = vld [vmem:[#allocation5 + $0x38] sm:$0xff] }
 0xcb8   :  { %3619 = vmatmul.mubr.msk.f32.vlgmr.msra.gmra.mxu1 %vm89_vm0, %v2739_v45  ;;  %v3096_v45 = vld [vmem:[#allocation7 + $0x78] sm:$0xff] }
 0xcb9   :  { %3633 = vmatpush3.msra.mxu1 %v3000_v48  ;;  %3643 = vmatprep.subr.mxu0 %v3096_v45 }
 0xcba   :  { %3634 = vmatprep.subr.mxu1 %v2999_v21  ;;  %3644 = vmatpush3.msra.mxu0 %v3096_v45 }
 0xcbb   :  { %3635 = vmatpush3.msra.mxu1 %v2999_v21  ;;  %3645 = vmatprep.subr.mxu0 %v3095_v15  ;;  %v3459_v21 = vld [vmem:[#allocation8 + $0x14] ss:$0 sm:$0xff] }
 0xcbc   :  { %3636 = vmatprep.subr.mxu1 %v2998_v54  ;;  %3646 = vmatpush3.msra.mxu0 %v3095_v15 }
 0xcbd   :  { %3637 = vmatpush3.msra.mxu1 %v2998_v54  ;;  %3647 = vmatprep.subr.mxu0 %v3094_v29 }
 0xcbe   :  { %3638 = vmatprep.subr.mxu1 %v2997_v31  ;;  %3648 = vmatpush3.msra.mxu0 %v3094_v29  ;;  %v3460_v29 = vld [vmem:[#allocation8 + $0x15] ss:$0 sm:$0xff] }
 0xcbf   :  { %3639 = vmatpush3.msra.mxu1 %v2997_v31  ;;  %3649 = vmatprep.subr.mxu0 %v3093_v9 }
 0xcc0   :  { %3650 = vmatpush3.msra.mxu0 %v3093_v9 }
 0xd78   :  { %v3620_v50 = vpop.f32.mrf.mxu1 }
 0xd79   :  { %v2827_v16 = vadd.f32 %v3620_v50, %v3445_v13 }
 0xd7a   :  { %v2821_v55 = vpop.f32.mrf.mxu1 }
 0xd7b   :  { %v2831_v40 = vadd.f32 %v2827_v16, %v4631_v12  ;;  %v2822_v6 = vadd.f32 %v3445_v13, %v2821_v55 }
 0xd7d   :  { %v2830_v38 = vadd.f32 %v2822_v6, %v4629_v17  ;;  %v2837_v4 = vsel %vm89_vm0, %v2831_v40, 0.0  ;;  %v2947_v17 = vpop.f32.mrf.mxu0  ;;  %v3451_v6 = vld [vmem:[#allocation8 + $0x12] ss:$0 sm:$0xff] }
 0xd7e   :  { %2838 = vadd.xlane.f32.xlu1 %v2837_v4  ;;  %v2948_v26 = vadd.f32 %v2947_v17, %v2877_v1  ;;  %v3452_v4 = vld [vmem:[#allocation8 + $0x13] ss:$0 sm:$0xff] }
 0xd7f   :  { %v2834_v3 = vsel %vm89_vm0, %v2830_v38, 0.0  ;;  %v3631_v19 = vpop.f32.mrf.mxu0 }
 0xd80   :  { %2835 = vadd.xlane.f32.xlu0 %v2834_v3  ;;  %v2954_v42 = vrot.slane %v2948_v26, %v5189_v58 }
 0xe07   :  { %v2839_v5 = vpop.xlane.xlu1 %2838 }
 0xe08   :  { %v2841_v11 = vmul.f32 0.03125, %v2839_v5 }
 0xe09   :  { %v2836_v47 = vpop.xlane.xlu0 %2835 }
 0xe0a   :  { %v2840_v41 = vmul.f32 0.03125, %v2836_v47  ;;  %v2843_v51 = vsub.f32 %v2831_v40, %v2841_v11 }
 0xe0c   :  { %v2842_v57 = vsub.f32 %v2830_v38, %v2840_v41  ;;  %v2845_v14 = vmul.f32 %v2843_v51, %v2843_v51 }
 0xe0e   :  { %v2844_v0 = vmul.f32 %v2842_v57, %v2842_v57  ;;  %v2849_v12 = vsel %vm89_vm0, %v2845_v14, 0.0  ;;  %v3089_v14 = vld [vmem:[#allocation7 + $0x8] sm:$0xff] }
 0xe10   :  { %v2846_v35 = vsel %vm89_vm0, %v2844_v0, 0.0  ;;  %v3091_v0 = vld [vmem:[#allocation7 + $0x28] sm:$0xff] }
 0xe11   :  { %2847 = vadd.xlane.f32.xlu0 %v2846_v35  ;;  %v3090_v35 = vld [vmem:[#allocation7 + $0x18] sm:$0xff] }
 0xe15   :  { %2850 = vadd.xlane.f32.xlu0 %v2849_v12  ;;  %v3453_v12 = vld [vmem:[#allocation8 + $0x16] ss:$0 sm:$0xff] }
 0xe9a   :  { %v2848_v22 = vpop.xlane.xlu0 %2847 }
 0xe9b   :  { %v2852_v10 = vmul.f32 0.03125, %v2848_v22 }
 0xe9d   :  { %v2854_v7 = vadd.f32 1e-05, %v2852_v10 }
 0xe9e   :  { %v2851_v62 = vpop.xlane.xlu0 %2850 }
 0xe9f   :  { %3898 = vrsqrt.f32 %v2854_v7  ;;  %v2853_v2 = vmul.f32 0.03125, %v2851_v62 }
 0xea1   :  { %v2855_v25 = vadd.f32 1e-05, %v2853_v2  ;;  %v3456_v2 = vld [vmem:[#allocation8 + $0x17] ss:$0 sm:$0xff] }
 0xea3   :  { %3900 = vrsqrt.f32 %v2855_v25 }
 0xeac   :  { %v3899_v24 = vpop.eup %3898 }
 0xead   :  { %v2858_v27 = vmul.f32 %v3899_v24, %v2842_v57  ;;  %v3092_v57 = vld [vmem:[#allocation7 + $0x38] sm:$0xff] }
 0xeae   :  { %3651 = vmatprep.subr.mxu0 %v3092_v57 }
 0xeaf   :  { %v2864_v56 = vmul.f32 %v3448_v8, %v2858_v27  ;;  %3652 = vmatpush3.msra.mxu0 %v3092_v57 }
 0xeb0   :  { %v3901_v49 = vpop.eup %3900  ;;  %3653 = vmatprep.subr.mxu0 %v3091_v0 }
 0xeb1   :  { %v2870_v52 = vadd.f32 %v3449_v18, %v2864_v56  ;;  %v2859_v60 = vmul.f32 %v3901_v49, %v2843_v51  ;;  %3654 = vmatpush3.msra.mxu0 %v3091_v0 }
 0xeb2   :  { %3655 = vmatprep.subr.mxu0 %v3090_v35 }
 0xeb3   :  { %v2955_v34 = vadd.f32 %v2954_v42, %v2870_v52  ;;  %v2865_v59 = vmul.f32 %v3448_v8, %v2859_v60  ;;  %3656 = vmatpush3.msra.mxu0 %v3090_v35 }
 0xeb4   :  { %3657 = vmatprep.subr.mxu0 %v3089_v14 }
 0xeb5   :  { %v2959_v28 = vsel %vm89_vm0, %v2955_v34, 0.0  ;;  %v2871_v63 = vadd.f32 %v3449_v18, %v2865_v59  ;;  %3658 = vmatpush3.msra.mxu0 %v3089_v14 }
 0xeb6   :  { %2960 = vadd.xlane.f32.xlu1 %v2959_v28 }
 0xeb7   :  { %v2956_v37 = vadd.f32 %v2954_v42, %v2871_v63 }
 0xeb9   :  { %v2962_v33 = vsel %vm89_vm0, %v2956_v37, 0.0 }
 0xeba   :  { %2963 = vadd.xlane.f32.xlu0 %v2962_v33 }
 0xf3f   :  { %v2961_v61 = vpop.xlane.xlu1 %2960 }
 0xf40   :  { %v2965_v44 = vmul.f32 0.03125, %v2961_v61  ;;  %v3228_v61 = vld [vmem:[#allocation5 + $0x118] sm:$0xff] }
 0xf41   :  { %3662 = vmatprep.subr.mxu1 %v3228_v61 }
 0xf42   :  { %v2967_v23 = vsub.f32 %v2955_v34, %v2965_v44  ;;  %v3227_v44 = vld [vmem:[#allocation5 + $0xd0] sm:$0xff] }
 0xf43   :  { %v2964_v39 = vpop.xlane.xlu0 %2963 }
 0xf44   :  { %v2966_v53 = vmul.f32 0.03125, %v2964_v39  ;;  %v2969_v58 = vmul.f32 %v2967_v23, %v2967_v23  ;;  %v3225_v39 = vld [vmem:[#allocation5 + $0x40] sm:$0xff] }
 0xf46   :  { %v2968_v32 = vsub.f32 %v2956_v37, %v2966_v53  ;;  %v2971_v30 = vsel %vm89_vm0, %v2969_v58, 0.0 }
 0xf47   :  { %2972 = vadd.xlane.f32.xlu1 %v2971_v30 }
 0xf48   :  { %v2970_v43 = vmul.f32 %v2968_v32, %v2968_v32 }
 0xf4a   :  { %v2974_v46 = vsel %vm89_vm0, %v2970_v43, 0.0 }
 0xf4b   :  { %2975 = vadd.xlane.f32.xlu0 %v2974_v46 }
 0xfd0   :  { %v2973_v36 = vpop.xlane.xlu1 %2972 }
 0xfd1   :  { %v2977_v20 = vmul.f32 0.03125, %v2973_v36 }
 0xfd3   :  { %v2979_v13 = vadd.f32 1e-05, %v2977_v20 }
 0xfd4   :  { %v2976_v50 = vpop.xlane.xlu0 %2975 }
 0xfd5   :  { %3902 = vrsqrt.f32 %v2979_v13  ;;  %v2978_v16 = vmul.f32 0.03125, %v2976_v50  ;;  %v5190_v13 = vlaneseq }
 0xfd7   :  { %v2980_v55 = vadd.f32 1e-05, %v2978_v16  ;;  %v3318_v50 = vand.u32 127, %v5190_v13  ;;  %v3461_v16 = vld [vmem:[#allocation8 + $0x18] ss:$0 sm:$0xff] }
 0xfd9   :  { %3904 = vrsqrt.f32 %v2980_v55 }
 0xfe2   :  { %v3903_v40 = vpop.eup %3902 }
 0xfe3   :  { %v2983_v38 = vmul.f32 %v3903_v40, %v2967_v23  ;;  %v3226_v23 = vld [vmem:[#allocation5 + $0x88] sm:$0xff]  ;;  %v5191_v40 = vld [vmem:[#allocation15_spill] sm:$0xff] }
 0xfe4   :  { %vm3319_vm7 = vcmp.gt.s32.totalorder %v3318_v50, %v5191_v40 }
 0xfe5   :  { %v2989_v3 = vmul.f32 %v3451_v6, %v2983_v38 }
 0xfe6   :  { %v3905_v5 = vpop.eup %3904 }
 0xfe7   :  { %v2984_v11 = vmul.f32 %v3905_v5, %v2968_v32  ;;  %v2995_v47 = vadd.f32 %v3452_v4, %v2989_v3 }
 0xfe9   :  { %v2990_v41 = vmul.f32 %v3451_v6, %v2984_v11  ;;  %3640 = vmatprep.mubr.msk.f32.mxu1 %vm89_vm0, %v2995_v47 }
 0xfeb   :  { %v2996_v51 = vadd.f32 %v3452_v4, %v2990_v41 }
 0xfed   :  { %3641 = vmatmul.mubr.msk.f32.vlgmr.msra.gmra.mxu1 %vm89_vm0, %v2996_v51 }
 0xfee   :  { %3663 = vmatpush3.msra.mxu1 %v3228_v61 }
 0xfef   :  { %3664 = vmatprep.subr.mxu1 %v3227_v44 }
 0xff0   :  { %3665 = vmatpush3.msra.mxu1 %v3227_v44 }
 0xff1   :  { %3666 = vmatprep.subr.mxu1 %v3226_v23 }
 0xff2   :  { %3667 = vmatpush3.msra.mxu1 %v3226_v23 }
 0xff3   :  { %3668 = vmatprep.subr.mxu1 %v3225_v39 }
 0xff4   :  { %3669 = vmatpush3.msra.mxu1 %v3225_v39 }
0x10ad   :  { %v3642_v17 = vpop.f32.mrf.mxu1 }
0x10ae   :  { %v3084_v19 = vadd.f32 %v3642_v17, %v3453_v12 }
0x10af   :  { %v3078_v22 = vpop.f32.mrf.mxu1 }
0x10b0   :  { %v3079_v10 = vadd.f32 %v3453_v12, %v3078_v22  ;;  %v3088_v62 = vmax.f32 %v3084_v19, 0.0 }
0x10b2   :  { %v3087_v7 = vmax.f32 %v3079_v10, 0.0 }
0x10b4   :  { %3659 = vmatprep.mubr.msk.f32.mxu0 %vm1532_vm6, %v3087_v7 }
0x10b5   :  { %3660 = vmatmul.mubr.msk.f32.vlgmr.msra.gmra.mxu0 %vm1532_vm6, %v3088_v62 }
0x1175   :  { %v3661_v25 = vpop.f32.mrf.mxu0 }
0x1176   :  { %v3180_v1 = vadd.f32 %v3661_v25, %v3456_v2 }
0x1177   :  { %v3174_v26 = vpop.f32.mrf.mxu0 }
0x1178   :  { %v3184_v24 = vadd.f32 %v3180_v1, %v2996_v51  ;;  %v3175_v8 = vadd.f32 %v3456_v2, %v3174_v26 }
0x117a   :  { %v3183_v27 = vadd.f32 %v3175_v8, %v2995_v47  ;;  %v3190_v18 = vsel %vm89_vm0, %v3184_v24, 0.0 }
0x117b   :  { %3191 = vadd.xlane.f32.xlu0 %v3190_v18 }
0x117c   :  { %v3187_v42 = vsel %vm89_vm0, %v3183_v27, 0.0 }
0x117d   :  { %3188 = vadd.xlane.f32.xlu1 %v3187_v42 }
0x1204   :  { %v3192_v56 = vpop.xlane.xlu0 %3191 }
0x1205   :  { %v3194_v49 = vmul.f32 0.03125, %v3192_v56 }
0x1206   :  { %v3189_v52 = vpop.xlane.xlu1 %3188 }
0x1207   :  { %v3196_v60 = vsub.f32 %v3184_v24, %v3194_v49  ;;  %v3193_v34 = vmul.f32 0.03125, %v3189_v52 }
0x1209   :  { %v3195_v59 = vsub.f32 %v3183_v27, %v3193_v34  ;;  %v3198_v28 = vmul.f32 %v3196_v60, %v3196_v60 }
0x120b   :  { %v3202_v63 = vsel %vm89_vm0, %v3198_v28, 0.0  ;;  %v3197_v37 = vmul.f32 %v3195_v59, %v3195_v59 }
0x120c   :  { %3203 = vadd.xlane.f32.xlu0 %v3202_v63 }
0x120d   :  { %v3199_v33 = vsel %vm89_vm0, %v3197_v37, 0.0 }
0x120e   :  { %3200 = vadd.xlane.f32.xlu1 %v3199_v33 }
0x1295   :  { %v3204_v53 = vpop.xlane.xlu0 %3203 }
0x1296   :  { %v3206_v58 = vmul.f32 0.03125, %v3204_v53 }
0x1297   :  { %v3201_v32 = vpop.xlane.xlu1 %3200 }
0x1298   :  { %v3208_v30 = vadd.f32 1e-05, %v3206_v58  ;;  %v3205_v43 = vmul.f32 0.03125, %v3201_v32 }
0x129a   :  { %3906 = vrsqrt.f32 %v3208_v30  ;;  %v3207_v46 = vadd.f32 1e-05, %v3205_v43 }
0x129c   :  { %3908 = vrsqrt.f32 %v3207_v46 }
0x12a7   :  { %v3907_v48 = vpop.eup %3906 }
0x12a8   :  { %v3212_v54 = vmul.f32 %v3907_v48, %v3196_v60 }
0x12a9   :  { %v3909_v31 = vpop.eup %3908 }
0x12aa   :  { %v3211_v45 = vmul.f32 %v3909_v31, %v3195_v59  ;;  %v3218_v15 = vmul.f32 %v3459_v21, %v3212_v54 }
0x12ac   :  { %v3217_v9 = vmul.f32 %v3459_v21, %v3211_v45  ;;  %v3224_v20 = vadd.f32 %v3460_v29, %v3218_v15 }
0x12ae   :  { %v3223_v36 = vadd.f32 %v3460_v29, %v3217_v9 }
0x12b0   :  { %3670 = vmatprep.mubr.msk.f32.mxu1 %vm89_vm0, %v3223_v36 }
0x12b1   :  { %3671 = vmatmul.mubr.msk.f32.vlgmr.msra.gmra.mxu1 %vm89_vm0, %v3224_v20 }
0x1371   :  { %v3672_v55 = vpop.f32.mrf.mxu1 }
0x1372   :  { %v3312_v6 = vadd.f32 %v3672_v55, %v3461_v16 }
0x1373   :  { %v3306_v38 = vpop.f32.mrf.mxu1 }
0x1374   :  { %v3323_v4 = vsel %vm3319_vm7, %v3312_v6, 0.0  ;;  %v3307_v3 = vadd.f32 %v3461_v16, %v3306_v38 }
0x1375   :  { %v3325_v5 = vsub.f32 0.0, %v3323_v4 }
0x1376   :  { %v3322_v11 = vsel %vm3319_vm7, %v3307_v3, 0.0 }
0x1377   :  { %v3328_v47 = vmul.f32 1.442695, %v3325_v5  ;;  %v3324_v41 = vsub.f32 0.0, %v3322_v11 }
0x1379   :  { %3910 = vpow2.f32 %v3328_v47  ;;  %v3326_v51 = vmul.f32 1.442695, %v3324_v41 }
0x137b   :  { %3912 = vpow2.f32 %v3326_v51 }
0x1386   :  { %v3911_v57 = vpop.eup %3910 }
0x1387   :  { %v3331_v0 = vadd.f32 1.0, %v3911_v57 }
0x1388   :  { %v3913_v35 = vpop.eup %3912 }
0x1389   :  { %3914 = vrcp.f32 %v3331_v0  ;;  %v3330_v14 = vadd.f32 1.0, %v3913_v35 }
0x138b   :  { %3916 = vrcp.f32 %v3330_v14 }
0x1396   :  { %v3915_v12 = vpop.eup %3914 }
0x1397   :  { %3366 = vxpose.xlu0.b32.start.end [1/1] (short) (narrow) %v3915_v12, 8 }
0x1398   :  { %v3917_v17 = vpop.eup %3916 }
0x1399   :  { %3334 = vxpose.xlu1.b32.start.end [1/1] (short) (narrow) %v3917_v17, 8 }
0x1413   :  { %v3382_v19 = vpop.trf.xlu0 }
0x1414   :  { %v3399_v22 = vadd.f32 %v3915_v12, %v3382_v19 }
0x1415   :  { %v3350_v10 = vpop.trf.xlu1 }
0x1416   :  { %v3401_v7 = vmul.f32 0.5, %v3399_v22  ;;  %v3398_v62 = vadd.f32 %v3917_v17, %v3350_v10 }
0x1418   :  { %3403 = vst.msk [vmem:[#allocation10 + $0x8] sm:$0xff] %vm1040_vm2, %v3401_v7  ;;  %v3400_v2 = vmul.f32 0.5, %v3398_v62 }
0x141a   :  { %3402 = vst.msk [vmem:[#allocation10] sm:$0xff] %vm1040_vm2, %v3400_v2 }
0x141b   :  { %4009 = shalt.err (!%p4006_p10)
}
0x141c   :  { %3415 = dma.vmem_to_hbm [thread:$0]  %s3410_s18, 256, %s5179_s4, [#allocation4], %s4034_s0, %s4034_s0, %s4035_s10  }
0x141d   :  { %4024 = dma.done.wait [#allocation4], 256  }
0x141e   :  { %4025 = vsyncadd [#allocation4], 4294967040 }
0x141f   :  { %3419 = vsyncpa [#allocation3], 1 }
0x1420   :  { %3420 = vsyncpa [#allocation6], 1 }
0x1421   :  { %3421 = vsyncpa [#allocation9], 1 }
0x1422   :  { %3422 = vsyncpa [#allocation4], 1 }

</bundles_post_ra>
